<compile_context>
chip_gen: v5e
topology: v5e:2x2
jax: 0.10.0
libtpu: 0.0.40
codegen_flags: <defaults>
</compile_context>

<pallas_src>
import numpy as np
import jax
import jax.numpy as jnp
from jax.experimental import pallas as pl
from jax.experimental.pallas import tpu as pltpu

# ---------------- sizes (scaled-down analog of the ResNet-50 pyramid) -------
B = 2            # batch
C_IN = 4         # input channels
H = W = 16       # input spatial
S0 = H * W       # 256
C0 = 8           # stem / layer1 channels   (analog of 64/256)
C1 = 32          # layer2 channels          (analog of 512)  -> att_src_1
C2 = 64          # layer3 channels          (analog of 1024) -> att_src_2
C3 = 128         # layer4 channels          (analog of 2048)
CP = 16          # pyramid channels         (analog of 256)
S1 = 64          # 8x8 spatial of att_src_1
S2 = 16          # 4x4 spatial of att_src_2
S3 = 4           # 2x2 spatial of layer4 output


# ---------------- host-side linear-operator builders (numpy, deterministic) --
def _bilinear_1d(out_size, in_size):
    m = np.zeros((out_size, in_size), np.float32)
    if in_size == 1:
        m[:, 0] = 1.0
        return m
    scale = in_size / out_size
    for i in range(out_size):
        src = (i + 0.5) * scale - 0.5
        src = min(max(src, 0.0), in_size - 1.0)
        lo = int(np.floor(src))
        hi = min(lo + 1, in_size - 1)
        w = src - lo
        m[i, lo] += 1.0 - w
        m[i, hi] += w
    return m


def _bilinear_2d(out_hw, in_hw):
    # F.upsample(mode='bilinear', align_corners=False) as a (S_out, S_in) matrix
    return np.kron(_bilinear_1d(out_hw[0], in_hw[0]),
                   _bilinear_1d(out_hw[1], in_hw[1])).astype(np.float32)


def _avgpool2_matrix(h, w):
    ho, wo = h // 2, w // 2
    m = np.zeros((ho * wo, h * w), np.float32)
    for i in range(ho):
        for j in range(wo):
            for di in range(2):
                for dj in range(2):
                    m[i * wo + j, (2 * i + di) * w + (2 * j + dj)] = 0.25
    return m


def _conv_taps(h, w, k):
    # (k*k, S, S) 0/1 spatial shift matrices (zero padding, stride 1)
    pad = k // 2
    t = np.zeros((k * k, h * w, h * w), np.float32)
    idx = 0
    for dh in range(-pad, pad + 1):
        for dw in range(-pad, pad + 1):
            for i in range(h):
                for j in range(w):
                    ii, jj = i + dh, j + dw
                    if 0 <= ii < h and 0 <= jj < w:
                        t[idx, i * w + j, ii * w + jj] = 1.0
            idx += 1
    return t


def _blockdiag(op):
    # per-sample operator (S_out, S_in) -> batch-block-diagonal right-multiply (B*S_in, B*S_out)
    return np.kron(np.eye(B, dtype=np.float32), op.T.astype(np.float32))


# ---------------- forward math (shared by kernel body and pure-JAX reference) -
def _relu(v):
    return jnp.maximum(v, 0.0)


def _sigmoid(v):
    return 1.0 / (1.0 + jnp.exp(-v))


def _mm(a, b):
    return jnp.dot(a, b, preferred_element_type=jnp.float32)


def _spatial_max(v, s):
    # v: (C, B*s) -> (C, B); max over each sample's block of lanes
    cols = [jnp.max(v[:, b * s:(b + 1) * s], axis=1, keepdims=True) for b in range(B)]
    return jnp.concatenate(cols, axis=1)


def _layernorm(v):
    # nn.LayerNorm(elementwise_affine=False), eps=1e-5, over the last dim
    mu = jnp.mean(v, axis=-1, keepdims=True)
    var = jnp.mean(jnp.square(v - mu), axis=-1, keepdims=True)
    return (v - mu) * jax.lax.rsqrt(var + 1e-5)


def _smooth_conv(xp, w_cat, bias, taps):
    # 3x3 conv (pad=1): 9 spatial-shift matmuls + ONE fused tap-weight matmul
    xs = jnp.concatenate([_mm(xp, taps[k]) for k in range(9)], axis=0)   # (9*CP, B*S)
    return _mm(w_cat, xs) + bias                                         # (CP, B*S)


def _cbam(xa, fvecs, wa1, ba1, wa2, ba2, msp, bsp, pmean, ebcast, s):
    # CBAMPyrAttention: xa = smoothed pyramid map (CP, B*s), fvecs = (Catt, B*s)
    red_mean = _mm(xa, pmean)                                    # (CP, B)
    red_max = _spatial_max(xa, s)                                # (CP, B)
    red = jnp.concatenate([red_mean, red_max], axis=1)           # (CP, 2B) fused mean/max path
    hid = _relu(_mm(wa1, red) + ba1)                             # channel_attention1 + ReLU
    exc = _mm(wa2, hid) + ba2                                    # channel_attention2, (Catt, 2B)
    exc = _sigmoid(exc[:, :B] + exc[:, B:])                      # (Catt, B)
    att = _mm(exc, ebcast) * fvecs                               # exc[:, :, None, None] * fvecs
    feat = jnp.concatenate([jnp.mean(att, axis=0, keepdims=True),
                            jnp.max(att, axis=0, keepdims=True),
                            jnp.mean(xa, axis=0, keepdims=True),
                            jnp.max(xa, axis=0, keepdims=True)], axis=0)   # (4, B*s)
    lin = (_mm(feat[0:1], msp[0]) + _mm(feat[1:2], msp[1]) +
           _mm(feat[2:3], msp[2]) + _mm(feat[3:4], msp[3]))      # 7x7 spatial conv, (1, B*s)
    att_chan = _sigmoid(lin + bsp)
    return att * att_chan                                        # (Catt, B*s)


def _forward_math(x, p):
    """Whole forward on channels-on-sublanes / (batch*spatial)-on-lanes 2-D arrays."""
    # --- backbone ---
    # TODO(synk): the pretrained torchvision ResNet-50 backbone is replaced by a reduced
    # stand-in (1x1 conv + ReLU stages with 2x2 average-pool downsampling); the full
    # pretrained bottleneck stack / maxpool stem has no self-contained Pallas equivalent.
    h = _relu(_mm(p['w_stem'], x) + p['b_stem'])         # (C0, B*S0)
    h = _mm(h, p['ds_stem'])                             # stem downsample -> (C0, B*S1)
    h = _relu(_mm(p['w_l1'], h) + p['b_l1'])             # layer1
    a1 = _relu(_mm(p['w_l2'], h) + p['b_l2'])            # layer2 -> att_src_1 (C1, B*S1)
    h = _relu(_mm(p['w_l3'], a1) + p['b_l3'])
    a2 = _mm(h, p['ds_l3'])                              # layer3 -> att_src_2 (C2, B*S2)
    h = _relu(_mm(p['w_l4'], a2) + p['b_l4'])
    x4 = _mm(h, p['ds_l4'])                              # layer4 output (C3, B*S3)

    # --- FPN top-down path ---
    top = _mm(p['w_top'], x4) + p['b_top']               # top_layer (CP, B*S3)
    xv = _spatial_max(x4, S3)                            # AdaptiveMaxPool2d((1,1)) -> (C3, B)
    f1p = (_mm(p['w_lat1'], a1) + p['b_lat1']) + _mm(top, p['up1'])   # fvec1_pyr (CP, B*S1)
    f2p = (_mm(p['w_lat2'], a2) + p['b_lat2']) + _mm(f1p, p['up2'])   # fvec2_pyr (CP, B*S2)
    out1 = _smooth_conv(f1p, p['w_sm1'], p['b_sm1'], p['t1r'])
    out2 = _smooth_conv(f2p, p['w_sm2'], p['b_sm2'], p['t2r'])

    # --- CBAM attention ensembles ---
    att1 = _cbam(out1, a1, p['wa11'], p['ba11'], p['wa12'], p['ba12'],
                 p['msp1'], p['bsp1'], p['p1'], p['e1'], S1)          # (C1, B*S1)
    att2 = _cbam(out2, a2, p['wa21'], p['ba21'], p['wa22'], p['ba22'],
                 p['msp2'], p['bsp2'], p['p2'], p['e2'], S2)          # (C2, B*S2)

    # --- pooled heads + LayerNorms, packed lane-dense as (B, C3+C1+C2) ---
    f1v = _mm(att1, p['p1'])                             # AdaptiveAvgPool2d -> (C1, B)
    f2v = _mm(att2, p['p2'])                             # (C2, B)
    packed = jnp.transpose(jnp.concatenate([xv, f1v, f2v], axis=0))   # (B, 224)
    return jnp.concatenate([_layernorm(packed[:, :C3]),
                            _layernorm(packed[:, C3:C3 + C1]),
                            _layernorm(packed[:, C3 + C1:])], axis=1)


# ---------------- Pallas wrapper ---------------------------------------------
def attention_ensemble_extractor(x_nchw, params):
    """x_nchw: (B, C_IN, H, W) float32. Returns (x, fvec1, fvec2) like the torch module."""
    # channels -> sublanes, (batch*spatial) -> lanes: lane-dense, whole batch in one shot
    x2d = jnp.transpose(x_nchw, (1, 0, 2, 3)).reshape(C_IN, B * H * W)
    names = tuple(params.keys())
    args = [params[n] for n in names]

    def _kernel(*refs):
        x_ref, out_ref = refs[0], refs[-1]
        p = {n: r[...] for n, r in zip(names, refs[1:-1])}
        out_ref[...] = _forward_math(x_ref[...], p)

    out = pl.pallas_call(
        _kernel,
        out_shape=jax.ShapeDtypeStruct((B, C3 + C1 + C2), jnp.float32),
        in_specs=[pl.BlockSpec(memory_space=pltpu.MemorySpace.VMEM)] * (1 + len(args)),
        out_specs=pl.BlockSpec(memory_space=pltpu.MemorySpace.VMEM),
    )(x2d, *args)

    return out[:, :C3], out[:, C3:C3 + C1], out[:, C3 + C1:]


# ---------------- plain-JAX reference (same math, no Pallas) ------------------
def _reference(x_nchw, params):
    x2d = jnp.transpose(x_nchw, (1, 0, 2, 3)).reshape(C_IN, B * H * W)
    y = _forward_math(x2d, params)
    return y[:, :C3], y[:, C3:C3 + C1], y[:, C3 + C1:]


# ---------------- parameter / constant construction ---------------------------
def _init_params(key):
    ks = iter(jax.random.split(key, 40))

    def nrm(shape, s=0.1):
        return jax.random.normal(next(ks), shape, jnp.float32) * s

    def fold_3x3(w_raw):  # (CP, CP, 3, 3) -> (CP, 9*CP), column index = k*CP + c_in
        return jnp.reshape(jnp.transpose(jnp.reshape(w_raw, (CP, CP, 9)), (0, 2, 1)),
                           (CP, 9 * CP))

    p = {}
    # backbone stand-in weights (1x1 convs as (C_out, C_in) matrices, biases (C_out, 1))
    p['w_stem'], p['b_stem'] = nrm((C0, C_IN)), nrm((C0, 1))
    p['w_l1'], p['b_l1'] = nrm((C0, C0)), nrm((C0, 1))
    p['w_l2'], p['b_l2'] = nrm((C1, C0)), nrm((C1, 1))
    p['w_l3'], p['b_l3'] = nrm((C2, C1)), nrm((C2, 1))
    p['w_l4'], p['b_l4'] = nrm((C3, C2)), nrm((C3, 1))
    # FPN 1x1 convs
    p['w_top'], p['b_top'] = nrm((CP, C3)), nrm((CP, 1))
    p['w_lat1'], p['b_lat1'] = nrm((CP, C1)), nrm((CP, 1))
    p['w_lat2'], p['b_lat2'] = nrm((CP, C2)), nrm((CP, 1))
    # 3x3 smooth convs: fused tap weights
    p['w_sm1'], p['b_sm1'] = fold_3x3(nrm((CP, CP, 3, 3))), nrm((CP, 1))
    p['w_sm2'], p['b_sm2'] = fold_3x3(nrm((CP, CP, 3, 3))), nrm((CP, 1))
    # CBAM1 (channels_in=CP, attention_channels=C1)
    p['wa11'], p['ba11'] = nrm((CP, CP)), nrm((CP, 1))
    p['wa12'], p['ba12'] = nrm((C1, CP)), nrm((C1, 1))
    w7_1 = np.asarray(nrm((4, 7 * 7)))
    p['bsp1'] = nrm((1, 1))
    # CBAM2 (channels_in=CP, attention_channels=C2)
    p['wa21'], p['ba21'] = nrm((CP, CP)), nrm((CP, 1))
    p['wa22'], p['ba22'] = nrm((C2, CP)), nrm((C2, 1))
    w7_2 = np.asarray(nrm((4, 7 * 7)))
    p['bsp2'] = nrm((1, 1))

    # 7x7 spatial conv (4->1 channels) as dense per-channel operators, batch-block-diagonal
    t7_1 = _conv_taps(8, 8, 7)
    t7_2 = _conv_taps(4, 4, 7)
    msp1_s = np.einsum('ck,kts->tcs', w7_1, t7_1)               # (S1, 4, S1)
    msp2_s = np.einsum('ck,kts->tcs', w7_2, t7_2)               # (S2, 4, S2)
    p['msp1'] = np.stack([_blockdiag(msp1_s[:, c, :]) for c in range(4)])   # (4, B*S1, B*S1)
    p['msp2'] = np.stack([_blockdiag(msp2_s[:, c, :]) for c in range(4)])   # (4, B*S2, B*S2)

    # constant spatial operators (all right-multiply, batch-block-diagonal)
    p['ds_stem'] = _blockdiag(_avgpool2_matrix(16, 16))         # (B*S0, B*S1)
    p['ds_l3'] = _blockdiag(_avgpool2_matrix(8, 8))             # (B*S1, B*S2)
    p['ds_l4'] = _blockdiag(_avgpool2_matrix(4, 4))             # (B*S2, B*S3)
    p['up1'] = _blockdiag(_bilinear_2d((8, 8), (2, 2)))         # (B*S3, B*S1)
    p['up2'] = _blockdiag(_bilinear_2d((4, 4), (8, 8)))         # (B*S1, B*S2)
    t1 = _conv_taps(8, 8, 3)
    t2 = _conv_taps(4, 4, 3)
    p['t1r'] = np.stack([_blockdiag(t1[k]) for k in range(9)])  # (9, B*S1, B*S1)
    p['t2r'] = np.stack([_blockdiag(t2[k]) for k in range(9)])  # (9, B*S2, B*S2)
    e1 = np.kron(np.eye(B, dtype=np.float32), np.ones((1, S1), np.float32))  # (B, B*S1)
    e2 = np.kron(np.eye(B, dtype=np.float32), np.ones((1, S2), np.float32))  # (B, B*S2)
    p['e1'], p['p1'] = e1, e1.T / S1
    p['e2'], p['p2'] = e2, e2.T / S2

    return {k: jnp.asarray(v, jnp.float32) for k, v in p.items()}


if __name__ == "__main__":
    key = jax.random.PRNGKey(0)
    kx, kp = jax.random.split(key)
    x = jax.random.normal(kx, (B, C_IN, H, W), jnp.float32)   # NCHW like PyTorch
    params = _init_params(kp)

    outs = attention_ensemble_extractor(x, params)
    outs = [jax.block_until_ready(o) for o in outs]

    refs = _reference(x, params)
    for o, r in zip(outs, refs):
        np.testing.assert_allclose(np.asarray(o), np.asarray(r), rtol=1e-4, atol=1e-4)

    print("KERNEL_OK")
</pallas_src>

<mosaic_0001>
module attributes {stable_mosaic.version = 11 : i64} {
  func.func @_kernel(%arg0: memref<4x512xf32, #tpu.memory_space<vmem>>, %arg1: memref<8x4xf32, #tpu.memory_space<vmem>>, %arg2: memref<8x1xf32, #tpu.memory_space<vmem>>, %arg3: memref<8x8xf32, #tpu.memory_space<vmem>>, %arg4: memref<8x1xf32, #tpu.memory_space<vmem>>, %arg5: memref<32x8xf32, #tpu.memory_space<vmem>>, %arg6: memref<32x1xf32, #tpu.memory_space<vmem>>, %arg7: memref<64x32xf32, #tpu.memory_space<vmem>>, %arg8: memref<64x1xf32, #tpu.memory_space<vmem>>, %arg9: memref<128x64xf32, #tpu.memory_space<vmem>>, %arg10: memref<128x1xf32, #tpu.memory_space<vmem>>, %arg11: memref<16x128xf32, #tpu.memory_space<vmem>>, %arg12: memref<16x1xf32, #tpu.memory_space<vmem>>, %arg13: memref<16x32xf32, #tpu.memory_space<vmem>>, %arg14: memref<16x1xf32, #tpu.memory_space<vmem>>, %arg15: memref<16x64xf32, #tpu.memory_space<vmem>>, %arg16: memref<16x1xf32, #tpu.memory_space<vmem>>, %arg17: memref<16x144xf32, #tpu.memory_space<vmem>>, %arg18: memref<16x1xf32, #tpu.memory_space<vmem>>, %arg19: memref<16x144xf32, #tpu.memory_space<vmem>>, %arg20: memref<16x1xf32, #tpu.memory_space<vmem>>, %arg21: memref<16x16xf32, #tpu.memory_space<vmem>>, %arg22: memref<16x1xf32, #tpu.memory_space<vmem>>, %arg23: memref<32x16xf32, #tpu.memory_space<vmem>>, %arg24: memref<32x1xf32, #tpu.memory_space<vmem>>, %arg25: memref<1x1xf32, #tpu.memory_space<vmem>>, %arg26: memref<16x16xf32, #tpu.memory_space<vmem>>, %arg27: memref<16x1xf32, #tpu.memory_space<vmem>>, %arg28: memref<64x16xf32, #tpu.memory_space<vmem>>, %arg29: memref<64x1xf32, #tpu.memory_space<vmem>>, %arg30: memref<1x1xf32, #tpu.memory_space<vmem>>, %arg31: memref<4x128x128xf32, #tpu.memory_space<vmem>>, %arg32: memref<4x32x32xf32, #tpu.memory_space<vmem>>, %arg33: memref<512x128xf32, #tpu.memory_space<vmem>>, %arg34: memref<128x32xf32, #tpu.memory_space<vmem>>, %arg35: memref<32x8xf32, #tpu.memory_space<vmem>>, %arg36: memref<8x128xf32, #tpu.memory_space<vmem>>, %arg37: memref<128x32xf32, #tpu.memory_space<vmem>>, %arg38: memref<9x128x128xf32, #tpu.memory_space<vmem>>, %arg39: memref<9x32x32xf32, #tpu.memory_space<vmem>>, %arg40: memref<2x128xf32, #tpu.memory_space<vmem>>, %arg41: memref<128x2xf32, #tpu.memory_space<vmem>>, %arg42: memref<2x32xf32, #tpu.memory_space<vmem>>, %arg43: memref<32x2xf32, #tpu.memory_space<vmem>>, %arg44: memref<2x224xf32, #tpu.memory_space<vmem>>) attributes {dimension_semantics = [], scalar_prefetch = 0 : i64, scratch_operands = 0 : i64, tpu.core_type = #tpu.core_type<tc>} {
    %c0 = arith.constant 0 : index
    %c0_0 = arith.constant 0 : index
    %0 = vector.load %arg1[%c0, %c0_0] : memref<8x4xf32, #tpu.memory_space<vmem>>, vector<8x4xf32>
    %c0_1 = arith.constant 0 : index
    %c0_2 = arith.constant 0 : index
    %1 = vector.load %arg2[%c0_1, %c0_2] : memref<8x1xf32, #tpu.memory_space<vmem>>, vector<8x1xf32>
    %c0_3 = arith.constant 0 : index
    %c0_4 = arith.constant 0 : index
    %2 = vector.load %arg3[%c0_3, %c0_4] : memref<8x8xf32, #tpu.memory_space<vmem>>, vector<8x8xf32>
    %c0_5 = arith.constant 0 : index
    %c0_6 = arith.constant 0 : index
    %3 = vector.load %arg4[%c0_5, %c0_6] : memref<8x1xf32, #tpu.memory_space<vmem>>, vector<8x1xf32>
    %c0_7 = arith.constant 0 : index
    %c0_8 = arith.constant 0 : index
    %4 = vector.load %arg5[%c0_7, %c0_8] : memref<32x8xf32, #tpu.memory_space<vmem>>, vector<32x8xf32>
    %c0_9 = arith.constant 0 : index
    %c0_10 = arith.constant 0 : index
    %5 = vector.load %arg6[%c0_9, %c0_10] : memref<32x1xf32, #tpu.memory_space<vmem>>, vector<32x1xf32>
    %c0_11 = arith.constant 0 : index
    %c0_12 = arith.constant 0 : index
    %6 = vector.load %arg7[%c0_11, %c0_12] : memref<64x32xf32, #tpu.memory_space<vmem>>, vector<64x32xf32>
    %c0_13 = arith.constant 0 : index
    %c0_14 = arith.constant 0 : index
    %7 = vector.load %arg8[%c0_13, %c0_14] : memref<64x1xf32, #tpu.memory_space<vmem>>, vector<64x1xf32>
    %c0_15 = arith.constant 0 : index
    %c0_16 = arith.constant 0 : index
    %8 = vector.load %arg9[%c0_15, %c0_16] : memref<128x64xf32, #tpu.memory_space<vmem>>, vector<128x64xf32>
    %c0_17 = arith.constant 0 : index
    %c0_18 = arith.constant 0 : index
    %9 = vector.load %arg10[%c0_17, %c0_18] : memref<128x1xf32, #tpu.memory_space<vmem>>, vector<128x1xf32>
    %c0_19 = arith.constant 0 : index
    %c0_20 = arith.constant 0 : index
    %10 = vector.load %arg11[%c0_19, %c0_20] : memref<16x128xf32, #tpu.memory_space<vmem>>, vector<16x128xf32>
    %c0_21 = arith.constant 0 : index
    %c0_22 = arith.constant 0 : index
    %11 = vector.load %arg12[%c0_21, %c0_22] : memref<16x1xf32, #tpu.memory_space<vmem>>, vector<16x1xf32>
    %c0_23 = arith.constant 0 : index
    %c0_24 = arith.constant 0 : index
    %12 = vector.load %arg13[%c0_23, %c0_24] : memref<16x32xf32, #tpu.memory_space<vmem>>, vector<16x32xf32>
    %c0_25 = arith.constant 0 : index
    %c0_26 = arith.constant 0 : index
    %13 = vector.load %arg14[%c0_25, %c0_26] : memref<16x1xf32, #tpu.memory_space<vmem>>, vector<16x1xf32>
    %c0_27 = arith.constant 0 : index
    %c0_28 = arith.constant 0 : index
    %14 = vector.load %arg15[%c0_27, %c0_28] : memref<16x64xf32, #tpu.memory_space<vmem>>, vector<16x64xf32>
    %c0_29 = arith.constant 0 : index
    %c0_30 = arith.constant 0 : index
    %15 = vector.load %arg16[%c0_29, %c0_30] : memref<16x1xf32, #tpu.memory_space<vmem>>, vector<16x1xf32>
    %c0_31 = arith.constant 0 : index
    %c0_32 = arith.constant 0 : index
    %16 = vector.load %arg17[%c0_31, %c0_32] : memref<16x144xf32, #tpu.memory_space<vmem>>, vector<16x144xf32>
    %c0_33 = arith.constant 0 : index
    %c0_34 = arith.constant 0 : index
    %17 = vector.load %arg18[%c0_33, %c0_34] : memref<16x1xf32, #tpu.memory_space<vmem>>, vector<16x1xf32>
    %c0_35 = arith.constant 0 : index
    %c0_36 = arith.constant 0 : index
    %18 = vector.load %arg19[%c0_35, %c0_36] : memref<16x144xf32, #tpu.memory_space<vmem>>, vector<16x144xf32>
    %c0_37 = arith.constant 0 : index
    %c0_38 = arith.constant 0 : index
    %19 = vector.load %arg20[%c0_37, %c0_38] : memref<16x1xf32, #tpu.memory_space<vmem>>, vector<16x1xf32>
    %c0_39 = arith.constant 0 : index
    %c0_40 = arith.constant 0 : index
    %20 = vector.load %arg21[%c0_39, %c0_40] : memref<16x16xf32, #tpu.memory_space<vmem>>, vector<16x16xf32>
    %c0_41 = arith.constant 0 : index
    %c0_42 = arith.constant 0 : index
    %21 = vector.load %arg22[%c0_41, %c0_42] : memref<16x1xf32, #tpu.memory_space<vmem>>, vector<16x1xf32>
    %c0_43 = arith.constant 0 : index
    %c0_44 = arith.constant 0 : index
    %22 = vector.load %arg23[%c0_43, %c0_44] : memref<32x16xf32, #tpu.memory_space<vmem>>, vector<32x16xf32>
    %c0_45 = arith.constant 0 : index
    %c0_46 = arith.constant 0 : index
    %23 = vector.load %arg24[%c0_45, %c0_46] : memref<32x1xf32, #tpu.memory_space<vmem>>, vector<32x1xf32>
    %c0_47 = arith.constant 0 : index
    %c0_48 = arith.constant 0 : index
    %24 = vector.load %arg25[%c0_47, %c0_48] : memref<1x1xf32, #tpu.memory_space<vmem>>, vector<1x1xf32>
    %c0_49 = arith.constant 0 : index
    %c0_50 = arith.constant 0 : index
    %25 = vector.load %arg26[%c0_49, %c0_50] : memref<16x16xf32, #tpu.memory_space<vmem>>, vector<16x16xf32>
    %c0_51 = arith.constant 0 : index
    %c0_52 = arith.constant 0 : index
    %26 = vector.load %arg27[%c0_51, %c0_52] : memref<16x1xf32, #tpu.memory_space<vmem>>, vector<16x1xf32>
    %c0_53 = arith.constant 0 : index
    %c0_54 = arith.constant 0 : index
    %27 = vector.load %arg28[%c0_53, %c0_54] : memref<64x16xf32, #tpu.memory_space<vmem>>, vector<64x16xf32>
    %c0_55 = arith.constant 0 : index
    %c0_56 = arith.constant 0 : index
    %28 = vector.load %arg29[%c0_55, %c0_56] : memref<64x1xf32, #tpu.memory_space<vmem>>, vector<64x1xf32>
    %c0_57 = arith.constant 0 : index
    %c0_58 = arith.constant 0 : index
    %29 = vector.load %arg30[%c0_57, %c0_58] : memref<1x1xf32, #tpu.memory_space<vmem>>, vector<1x1xf32>
    %c0_59 = arith.constant 0 : index
    %c0_60 = arith.constant 0 : index
    %c0_61 = arith.constant 0 : index
    %30 = vector.load %arg31[%c0_59, %c0_60, %c0_61] : memref<4x128x128xf32, #tpu.memory_space<vmem>>, vector<4x128x128xf32>
    %c0_62 = arith.constant 0 : index
    %c0_63 = arith.constant 0 : index
    %c0_64 = arith.constant 0 : index
    %31 = vector.load %arg32[%c0_62, %c0_63, %c0_64] : memref<4x32x32xf32, #tpu.memory_space<vmem>>, vector<4x32x32xf32>
    %c0_65 = arith.constant 0 : index
    %c0_66 = arith.constant 0 : index
    %32 = vector.load %arg33[%c0_65, %c0_66] : memref<512x128xf32, #tpu.memory_space<vmem>>, vector<512x128xf32>
    %c0_67 = arith.constant 0 : index
    %c0_68 = arith.constant 0 : index
    %33 = vector.load %arg34[%c0_67, %c0_68] : memref<128x32xf32, #tpu.memory_space<vmem>>, vector<128x32xf32>
    %c0_69 = arith.constant 0 : index
    %c0_70 = arith.constant 0 : index
    %34 = vector.load %arg35[%c0_69, %c0_70] : memref<32x8xf32, #tpu.memory_space<vmem>>, vector<32x8xf32>
    %c0_71 = arith.constant 0 : index
    %c0_72 = arith.constant 0 : index
    %35 = vector.load %arg36[%c0_71, %c0_72] : memref<8x128xf32, #tpu.memory_space<vmem>>, vector<8x128xf32>
    %c0_73 = arith.constant 0 : index
    %c0_74 = arith.constant 0 : index
    %36 = vector.load %arg37[%c0_73, %c0_74] : memref<128x32xf32, #tpu.memory_space<vmem>>, vector<128x32xf32>
    %c0_75 = arith.constant 0 : index
    %c0_76 = arith.constant 0 : index
    %c0_77 = arith.constant 0 : index
    %37 = vector.load %arg38[%c0_75, %c0_76, %c0_77] : memref<9x128x128xf32, #tpu.memory_space<vmem>>, vector<9x128x128xf32>
    %c0_78 = arith.constant 0 : index
    %c0_79 = arith.constant 0 : index
    %c0_80 = arith.constant 0 : index
    %38 = vector.load %arg39[%c0_78, %c0_79, %c0_80] : memref<9x32x32xf32, #tpu.memory_space<vmem>>, vector<9x32x32xf32>
    %c0_81 = arith.constant 0 : index
    %c0_82 = arith.constant 0 : index
    %39 = vector.load %arg40[%c0_81, %c0_82] : memref<2x128xf32, #tpu.memory_space<vmem>>, vector<2x128xf32>
    %c0_83 = arith.constant 0 : index
    %c0_84 = arith.constant 0 : index
    %40 = vector.load %arg41[%c0_83, %c0_84] : memref<128x2xf32, #tpu.memory_space<vmem>>, vector<128x2xf32>
    %c0_85 = arith.constant 0 : index
    %c0_86 = arith.constant 0 : index
    %41 = vector.load %arg42[%c0_85, %c0_86] : memref<2x32xf32, #tpu.memory_space<vmem>>, vector<2x32xf32>
    %c0_87 = arith.constant 0 : index
    %c0_88 = arith.constant 0 : index
    %42 = vector.load %arg43[%c0_87, %c0_88] : memref<32x2xf32, #tpu.memory_space<vmem>>, vector<32x2xf32>
    %c0_89 = arith.constant 0 : index
    %c0_90 = arith.constant 0 : index
    %43 = vector.load %arg0[%c0_89, %c0_90] : memref<4x512xf32, #tpu.memory_space<vmem>>, vector<4x512xf32>
    %cst = arith.constant dense<0.000000e+00> : vector<8x512xf32>
    %44 = tpu.matmul %0, %43, %cst {dimension_numbers = #tpu.dot_dimension_numbers<[1], [0], [0], [1], [0, 0, 1, 1], [], []>} : vector<8x4xf32>, vector<4x512xf32>, vector<8x512xf32> -> vector<8x512xf32>
    %45 = vector.broadcast %1 : vector<8x1xf32> to vector<8x512xf32>
    %46 = arith.addf %44, %45 : vector<8x512xf32>
    %cst_91 = arith.constant 0.000000e+00 : f32
    %47 = vector.broadcast %cst_91 : f32 to vector<8x512xf32>
    %48 = arith.maximumf %46, %47 : vector<8x512xf32>
    %cst_92 = arith.constant dense<0.000000e+00> : vector<8x128xf32>
    %49 = tpu.matmul %48, %32, %cst_92 {dimension_numbers = #tpu.dot_dimension_numbers<[1], [0], [0], [1], [0, 0, 1, 1], [], []>} : vector<8x512xf32>, vector<512x128xf32>, vector<8x128xf32> -> vector<8x128xf32>
    %cst_93 = arith.constant dense<0.000000e+00> : vector<8x128xf32>
    %50 = tpu.matmul %2, %49, %cst_93 {dimension_numbers = #tpu.dot_dimension_numbers<[1], [0], [0], [1], [0, 0, 1, 1], [], []>} : vector<8x8xf32>, vector<8x128xf32>, vector<8x128xf32> -> vector<8x128xf32>
    %51 = vector.broadcast %3 : vector<8x1xf32> to vector<8x128xf32>
    %52 = arith.addf %50, %51 : vector<8x128xf32>
    %cst_94 = arith.constant 0.000000e+00 : f32
    %53 = vector.broadcast %cst_94 : f32 to vector<8x128xf32>
    %54 = arith.maximumf %52, %53 : vector<8x128xf32>
    %cst_95 = arith.constant dense<0.000000e+00> : vector<32x128xf32>
    %55 = tpu.matmul %4, %54, %cst_95 {dimension_numbers = #tpu.dot_dimension_numbers<[1], [0], [0], [1], [0, 0, 1, 1], [], []>} : vector<32x8xf32>, vector<8x128xf32>, vector<32x128xf32> -> vector<32x128xf32>
    %56 = vector.broadcast %5 : vector<32x1xf32> to vector<32x128xf32>
    %57 = arith.addf %55, %56 : vector<32x128xf32>
    %cst_96 = arith.constant 0.000000e+00 : f32
    %58 = vector.broadcast %cst_96 : f32 to vector<32x128xf32>
    %59 = arith.maximumf %57, %58 : vector<32x128xf32>
    %cst_97 = arith.constant dense<0.000000e+00> : vector<64x128xf32>
    %60 = tpu.matmul %6, %59, %cst_97 {dimension_numbers = #tpu.dot_dimension_numbers<[1], [0], [0], [1], [0, 0, 1, 1], [], []>} : vector<64x32xf32>, vector<32x128xf32>, vector<64x128xf32> -> vector<64x128xf32>
    %61 = vector.broadcast %7 : vector<64x1xf32> to vector<64x128xf32>
    %62 = arith.addf %60, %61 : vector<64x128xf32>
    %cst_98 = arith.constant 0.000000e+00 : f32
    %63 = vector.broadcast %cst_98 : f32 to vector<64x128xf32>
    %64 = arith.maximumf %62, %63 : vector<64x128xf32>
    %cst_99 = arith.constant dense<0.000000e+00> : vector<64x32xf32>
    %65 = tpu.matmul %64, %33, %cst_99 {dimension_numbers = #tpu.dot_dimension_numbers<[1], [0], [0], [1], [0, 0, 1, 1], [], []>} : vector<64x128xf32>, vector<128x32xf32>, vector<64x32xf32> -> vector<64x32xf32>
    %cst_100 = arith.constant dense<0.000000e+00> : vector<128x32xf32>
    %66 = tpu.matmul %8, %65, %cst_100 {dimension_numbers = #tpu.dot_dimension_numbers<[1], [0], [0], [1], [0, 0, 1, 1], [], []>} : vector<128x64xf32>, vector<64x32xf32>, vector<128x32xf32> -> vector<128x32xf32>
    %67 = vector.broadcast %9 : vector<128x1xf32> to vector<128x32xf32>
    %68 = arith.addf %66, %67 : vector<128x32xf32>
    %cst_101 = arith.constant 0.000000e+00 : f32
    %69 = vector.broadcast %cst_101 : f32 to vector<128x32xf32>
    %70 = arith.maximumf %68, %69 : vector<128x32xf32>
    %cst_102 = arith.constant dense<0.000000e+00> : vector<128x8xf32>
    %71 = tpu.matmul %70, %34, %cst_102 {dimension_numbers = #tpu.dot_dimension_numbers<[1], [0], [0], [1], [0, 0, 1, 1], [], []>} : vector<128x32xf32>, vector<32x8xf32>, vector<128x8xf32> -> vector<128x8xf32>
    %cst_103 = arith.constant dense<0.000000e+00> : vector<16x8xf32>
    %72 = tpu.matmul %10, %71, %cst_103 {dimension_numbers = #tpu.dot_dimension_numbers<[1], [0], [0], [1], [0, 0, 1, 1], [], []>} : vector<16x128xf32>, vector<128x8xf32>, vector<16x8xf32> -> vector<16x8xf32>
    %73 = vector.broadcast %11 : vector<16x1xf32> to vector<16x8xf32>
    %74 = arith.addf %72, %73 : vector<16x8xf32>
    %75 = vector.extract_strided_slice %71 {offsets = [0, 0], sizes = [128, 4], strides = [1, 1]} : vector<128x8xf32> to vector<128x4xf32>
    %cst_104 = arith.constant dense<0xFF800000> : vector<128xf32>
    %76 = vector.multi_reduction <maximumf>, %75, %cst_104 [1] : vector<128x4xf32> to vector<128xf32>
    %77 = vector.shape_cast %76 : vector<128xf32> to vector<128x1xf32>
    %78 = vector.extract_strided_slice %71 {offsets = [0, 4], sizes = [128, 4], strides = [1, 1]} : vector<128x8xf32> to vector<128x4xf32>
    %cst_105 = arith.constant dense<0xFF800000> : vector<128xf32>
    %79 = vector.multi_reduction <maximumf>, %78, %cst_105 [1] : vector<128x4xf32> to vector<128xf32>
    %80 = vector.shape_cast %79 : vector<128xf32> to vector<128x1xf32>
    %81 = tpu.concatenate %77, %80 in 1 : vector<128x1xf32>, vector<128x1xf32> -> vector<128x2xf32>
    %cst_106 = arith.constant dense<0.000000e+00> : vector<16x128xf32>
    %82 = tpu.matmul %12, %59, %cst_106 {dimension_numbers = #tpu.dot_dimension_numbers<[1], [0], [0], [1], [0, 0, 1, 1], [], []>} : vector<16x32xf32>, vector<32x128xf32>, vector<16x128xf32> -> vector<16x128xf32>
    %83 = vector.broadcast %13 : vector<16x1xf32> to vector<16x128xf32>
    %84 = arith.addf %82, %83 : vector<16x128xf32>
    %cst_107 = arith.constant dense<0.000000e+00> : vector<16x128xf32>
    %85 = tpu.matmul %74, %35, %cst_107 {dimension_numbers = #tpu.dot_dimension_numbers<[1], [0], [0], [1], [0, 0, 1, 1], [], []>} : vector<16x8xf32>, vector<8x128xf32>, vector<16x128xf32> -> vector<16x128xf32>
    %86 = arith.addf %84, %85 : vector<16x128xf32>
    %cst_108 = arith.constant dense<0.000000e+00> : vector<16x32xf32>
    %87 = tpu.matmul %14, %65, %cst_108 {dimension_numbers = #tpu.dot_dimension_numbers<[1], [0], [0], [1], [0, 0, 1, 1], [], []>} : vector<16x64xf32>, vector<64x32xf32>, vector<16x32xf32> -> vector<16x32xf32>
    %88 = vector.broadcast %15 : vector<16x1xf32> to vector<16x32xf32>
    %89 = arith.addf %87, %88 : vector<16x32xf32>
    %cst_109 = arith.constant dense<0.000000e+00> : vector<16x32xf32>
    %90 = tpu.matmul %86, %36, %cst_109 {dimension_numbers = #tpu.dot_dimension_numbers<[1], [0], [0], [1], [0, 0, 1, 1], [], []>} : vector<16x128xf32>, vector<128x32xf32>, vector<16x32xf32> -> vector<16x32xf32>
    %91 = arith.addf %89, %90 : vector<16x32xf32>
    %92 = vector.extract_strided_slice %37 {offsets = [0, 0, 0], sizes = [1, 128, 128], strides = [1, 1, 1]} : vector<9x128x128xf32> to vector<1x128x128xf32>
    %93 = vector.shape_cast %92 : vector<1x128x128xf32> to vector<128x128xf32>
    %cst_110 = arith.constant dense<0.000000e+00> : vector<16x128xf32>
    %94 = tpu.matmul %86, %93, %cst_110 {dimension_numbers = #tpu.dot_dimension_numbers<[1], [0], [0], [1], [0, 0, 1, 1], [], []>} : vector<16x128xf32>, vector<128x128xf32>, vector<16x128xf32> -> vector<16x128xf32>
    %95 = vector.extract_strided_slice %37 {offsets = [1, 0, 0], sizes = [1, 128, 128], strides = [1, 1, 1]} : vector<9x128x128xf32> to vector<1x128x128xf32>
    %96 = vector.shape_cast %95 : vector<1x128x128xf32> to vector<128x128xf32>
    %cst_111 = arith.constant dense<0.000000e+00> : vector<16x128xf32>
    %97 = tpu.matmul %86, %96, %cst_111 {dimension_numbers = #tpu.dot_dimension_numbers<[1], [0], [0], [1], [0, 0, 1, 1], [], []>} : vector<16x128xf32>, vector<128x128xf32>, vector<16x128xf32> -> vector<16x128xf32>
    %98 = vector.extract_strided_slice %37 {offsets = [2, 0, 0], sizes = [1, 128, 128], strides = [1, 1, 1]} : vector<9x128x128xf32> to vector<1x128x128xf32>
    %99 = vector.shape_cast %98 : vector<1x128x128xf32> to vector<128x128xf32>
    %cst_112 = arith.constant dense<0.000000e+00> : vector<16x128xf32>
    %100 = tpu.matmul %86, %99, %cst_112 {dimension_numbers = #tpu.dot_dimension_numbers<[1], [0], [0], [1], [0, 0, 1, 1], [], []>} : vector<16x128xf32>, vector<128x128xf32>, vector<16x128xf32> -> vector<16x128xf32>
    %101 = vector.extract_strided_slice %37 {offsets = [3, 0, 0], sizes = [1, 128, 128], strides = [1, 1, 1]} : vector<9x128x128xf32> to vector<1x128x128xf32>
    %102 = vector.shape_cast %101 : vector<1x128x128xf32> to vector<128x128xf32>
    %cst_113 = arith.constant dense<0.000000e+00> : vector<16x128xf32>
    %103 = tpu.matmul %86, %102, %cst_113 {dimension_numbers = #tpu.dot_dimension_numbers<[1], [0], [0], [1], [0, 0, 1, 1], [], []>} : vector<16x128xf32>, vector<128x128xf32>, vector<16x128xf32> -> vector<16x128xf32>
    %104 = vector.extract_strided_slice %37 {offsets = [4, 0, 0], sizes = [1, 128, 128], strides = [1, 1, 1]} : vector<9x128x128xf32> to vector<1x128x128xf32>
    %105 = vector.shape_cast %104 : vector<1x128x128xf32> to vector<128x128xf32>
    %cst_114 = arith.constant dense<0.000000e+00> : vector<16x128xf32>
    %106 = tpu.matmul %86, %105, %cst_114 {dimension_numbers = #tpu.dot_dimension_numbers<[1], [0], [0], [1], [0, 0, 1, 1], [], []>} : vector<16x128xf32>, vector<128x128xf32>, vector<16x128xf32> -> vector<16x128xf32>
    %107 = vector.extract_strided_slice %37 {offsets = [5, 0, 0], sizes = [1, 128, 128], strides = [1, 1, 1]} : vector<9x128x128xf32> to vector<1x128x128xf32>
    %108 = vector.shape_cast %107 : vector<1x128x128xf32> to vector<128x128xf32>
    %cst_115 = arith.constant dense<0.000000e+00> : vector<16x128xf32>
    %109 = tpu.matmul %86, %108, %cst_115 {dimension_numbers = #tpu.dot_dimension_numbers<[1], [0], [0], [1], [0, 0, 1, 1], [], []>} : vector<16x128xf32>, vector<128x128xf32>, vector<16x128xf32> -> vector<16x128xf32>
    %110 = vector.extract_strided_slice %37 {offsets = [6, 0, 0], sizes = [1, 128, 128], strides = [1, 1, 1]} : vector<9x128x128xf32> to vector<1x128x128xf32>
    %111 = vector.shape_cast %110 : vector<1x128x128xf32> to vector<128x128xf32>
    %cst_116 = arith.constant dense<0.000000e+00> : vector<16x128xf32>
    %112 = tpu.matmul %86, %111, %cst_116 {dimension_numbers = #tpu.dot_dimension_numbers<[1], [0], [0], [1], [0, 0, 1, 1], [], []>} : vector<16x128xf32>, vector<128x128xf32>, vector<16x128xf32> -> vector<16x128xf32>
    %113 = vector.extract_strided_slice %37 {offsets = [7, 0, 0], sizes = [1, 128, 128], strides = [1, 1, 1]} : vector<9x128x128xf32> to vector<1x128x128xf32>
    %114 = vector.shape_cast %113 : vector<1x128x128xf32> to vector<128x128xf32>
    %cst_117 = arith.constant dense<0.000000e+00> : vector<16x128xf32>
    %115 = tpu.matmul %86, %114, %cst_117 {dimension_numbers = #tpu.dot_dimension_numbers<[1], [0], [0], [1], [0, 0, 1, 1], [], []>} : vector<16x128xf32>, vector<128x128xf32>, vector<16x128xf32> -> vector<16x128xf32>
    %116 = vector.extract_strided_slice %37 {offsets = [8, 0, 0], sizes = [1, 128, 128], strides = [1, 1, 1]} : vector<9x128x128xf32> to vector<1x128x128xf32>
    %117 = vector.shape_cast %116 : vector<1x128x128xf32> to vector<128x128xf32>
    %cst_118 = arith.constant dense<0.000000e+00> : vector<16x128xf32>
    %118 = tpu.matmul %86, %117, %cst_118 {dimension_numbers = #tpu.dot_dimension_numbers<[1], [0], [0], [1], [0, 0, 1, 1], [], []>} : vector<16x128xf32>, vector<128x128xf32>, vector<16x128xf32> -> vector<16x128xf32>
    %119 = tpu.concatenate %94, %97, %100, %103, %106, %109, %112, %115, %118 in 0 : vector<16x128xf32>, vector<16x128xf32>, vector<16x128xf32>, vector<16x128xf32>, vector<16x128xf32>, vector<16x128xf32>, vector<16x128xf32>, vector<16x128xf32>, vector<16x128xf32> -> vector<144x128xf32>
    %cst_119 = arith.constant dense<0.000000e+00> : vector<16x128xf32>
    %120 = tpu.matmul %16, %119, %cst_119 {dimension_numbers = #tpu.dot_dimension_numbers<[1], [0], [0], [1], [0, 0, 1, 1], [], []>} : vector<16x144xf32>, vector<144x128xf32>, vector<16x128xf32> -> vector<16x128xf32>
    %121 = vector.broadcast %17 : vector<16x1xf32> to vector<16x128xf32>
    %122 = arith.addf %120, %121 : vector<16x128xf32>
    %123 = vector.extract_strided_slice %38 {offsets = [0, 0, 0], sizes = [1, 32, 32], strides = [1, 1, 1]} : vector<9x32x32xf32> to vector<1x32x32xf32>
    %124 = vector.shape_cast %123 : vector<1x32x32xf32> to vector<32x32xf32>
    %cst_120 = arith.constant dense<0.000000e+00> : vector<16x32xf32>
    %125 = tpu.matmul %91, %124, %cst_120 {dimension_numbers = #tpu.dot_dimension_numbers<[1], [0], [0], [1], [0, 0, 1, 1], [], []>} : vector<16x32xf32>, vector<32x32xf32>, vector<16x32xf32> -> vector<16x32xf32>
    %126 = vector.extract_strided_slice %38 {offsets = [1, 0, 0], sizes = [1, 32, 32], strides = [1, 1, 1]} : vector<9x32x32xf32> to vector<1x32x32xf32>
    %127 = vector.shape_cast %126 : vector<1x32x32xf32> to vector<32x32xf32>
    %cst_121 = arith.constant dense<0.000000e+00> : vector<16x32xf32>
    %128 = tpu.matmul %91, %127, %cst_121 {dimension_numbers = #tpu.dot_dimension_numbers<[1], [0], [0], [1], [0, 0, 1, 1], [], []>} : vector<16x32xf32>, vector<32x32xf32>, vector<16x32xf32> -> vector<16x32xf32>
    %129 = vector.extract_strided_slice %38 {offsets = [2, 0, 0], sizes = [1, 32, 32], strides = [1, 1, 1]} : vector<9x32x32xf32> to vector<1x32x32xf32>
    %130 = vector.shape_cast %129 : vector<1x32x32xf32> to vector<32x32xf32>
    %cst_122 = arith.constant dense<0.000000e+00> : vector<16x32xf32>
    %131 = tpu.matmul %91, %130, %cst_122 {dimension_numbers = #tpu.dot_dimension_numbers<[1], [0], [0], [1], [0, 0, 1, 1], [], []>} : vector<16x32xf32>, vector<32x32xf32>, vector<16x32xf32> -> vector<16x32xf32>
    %132 = vector.extract_strided_slice %38 {offsets = [3, 0, 0], sizes = [1, 32, 32], strides = [1, 1, 1]} : vector<9x32x32xf32> to vector<1x32x32xf32>
    %133 = vector.shape_cast %132 : vector<1x32x32xf32> to vector<32x32xf32>
    %cst_123 = arith.constant dense<0.000000e+00> : vector<16x32xf32>
    %134 = tpu.matmul %91, %133, %cst_123 {dimension_numbers = #tpu.dot_dimension_numbers<[1], [0], [0], [1], [0, 0, 1, 1], [], []>} : vector<16x32xf32>, vector<32x32xf32>, vector<16x32xf32> -> vector<16x32xf32>
    %135 = vector.extract_strided_slice %38 {offsets = [4, 0, 0], sizes = [1, 32, 32], strides = [1, 1, 1]} : vector<9x32x32xf32> to vector<1x32x32xf32>
    %136 = vector.shape_cast %135 : vector<1x32x32xf32> to vector<32x32xf32>
    %cst_124 = arith.constant dense<0.000000e+00> : vector<16x32xf32>
    %137 = tpu.matmul %91, %136, %cst_124 {dimension_numbers = #tpu.dot_dimension_numbers<[1], [0], [0], [1], [0, 0, 1, 1], [], []>} : vector<16x32xf32>, vector<32x32xf32>, vector<16x32xf32> -> vector<16x32xf32>
    %138 = vector.extract_strided_slice %38 {offsets = [5, 0, 0], sizes = [1, 32, 32], strides = [1, 1, 1]} : vector<9x32x32xf32> to vector<1x32x32xf32>
    %139 = vector.shape_cast %138 : vector<1x32x32xf32> to vector<32x32xf32>
    %cst_125 = arith.constant dense<0.000000e+00> : vector<16x32xf32>
    %140 = tpu.matmul %91, %139, %cst_125 {dimension_numbers = #tpu.dot_dimension_numbers<[1], [0], [0], [1], [0, 0, 1, 1], [], []>} : vector<16x32xf32>, vector<32x32xf32>, vector<16x32xf32> -> vector<16x32xf32>
    %141 = vector.extract_strided_slice %38 {offsets = [6, 0, 0], sizes = [1, 32, 32], strides = [1, 1, 1]} : vector<9x32x32xf32> to vector<1x32x32xf32>
    %142 = vector.shape_cast %141 : vector<1x32x32xf32> to vector<32x32xf32>
    %cst_126 = arith.constant dense<0.000000e+00> : vector<16x32xf32>
    %143 = tpu.matmul %91, %142, %cst_126 {dimension_numbers = #tpu.dot_dimension_numbers<[1], [0], [0], [1], [0, 0, 1, 1], [], []>} : vector<16x32xf32>, vector<32x32xf32>, vector<16x32xf32> -> vector<16x32xf32>
    %144 = vector.extract_strided_slice %38 {offsets = [7, 0, 0], sizes = [1, 32, 32], strides = [1, 1, 1]} : vector<9x32x32xf32> to vector<1x32x32xf32>
    %145 = vector.shape_cast %144 : vector<1x32x32xf32> to vector<32x32xf32>
    %cst_127 = arith.constant dense<0.000000e+00> : vector<16x32xf32>
    %146 = tpu.matmul %91, %145, %cst_127 {dimension_numbers = #tpu.dot_dimension_numbers<[1], [0], [0], [1], [0, 0, 1, 1], [], []>} : vector<16x32xf32>, vector<32x32xf32>, vector<16x32xf32> -> vector<16x32xf32>
    %147 = vector.extract_strided_slice %38 {offsets = [8, 0, 0], sizes = [1, 32, 32], strides = [1, 1, 1]} : vector<9x32x32xf32> to vector<1x32x32xf32>
    %148 = vector.shape_cast %147 : vector<1x32x32xf32> to vector<32x32xf32>
    %cst_128 = arith.constant dense<0.000000e+00> : vector<16x32xf32>
    %149 = tpu.matmul %91, %148, %cst_128 {dimension_numbers = #tpu.dot_dimension_numbers<[1], [0], [0], [1], [0, 0, 1, 1], [], []>} : vector<16x32xf32>, vector<32x32xf32>, vector<16x32xf32> -> vector<16x32xf32>
    %150 = tpu.concatenate %125, %128, %131, %134, %137, %140, %143, %146, %149 in 0 : vector<16x32xf32>, vector<16x32xf32>, vector<16x32xf32>, vector<16x32xf32>, vector<16x32xf32>, vector<16x32xf32>, vector<16x32xf32>, vector<16x32xf32>, vector<16x32xf32> -> vector<144x32xf32>
    %cst_129 = arith.constant dense<0.000000e+00> : vector<16x32xf32>
    %151 = tpu.matmul %18, %150, %cst_129 {dimension_numbers = #tpu.dot_dimension_numbers<[1], [0], [0], [1], [0, 0, 1, 1], [], []>} : vector<16x144xf32>, vector<144x32xf32>, vector<16x32xf32> -> vector<16x32xf32>
    %152 = vector.broadcast %19 : vector<16x1xf32> to vector<16x32xf32>
    %153 = arith.addf %151, %152 : vector<16x32xf32>
    %cst_130 = arith.constant dense<0.000000e+00> : vector<16x2xf32>
    %154 = tpu.matmul %122, %40, %cst_130 {dimension_numbers = #tpu.dot_dimension_numbers<[1], [0], [0], [1], [0, 0, 1, 1], [], []>} : vector<16x128xf32>, vector<128x2xf32>, vector<16x2xf32> -> vector<16x2xf32>
    %155 = vector.extract_strided_slice %122 {offsets = [0, 0], sizes = [16, 64], strides = [1, 1]} : vector<16x128xf32> to vector<16x64xf32>
    %cst_131 = arith.constant dense<0xFF800000> : vector<16xf32>
    %156 = vector.multi_reduction <maximumf>, %155, %cst_131 [1] : vector<16x64xf32> to vector<16xf32>
    %157 = vector.shape_cast %156 : vector<16xf32> to vector<16x1xf32>
    %158 = vector.extract_strided_slice %122 {offsets = [0, 64], sizes = [16, 64], strides = [1, 1]} : vector<16x128xf32> to vector<16x64xf32>
    %cst_132 = arith.constant dense<0xFF800000> : vector<16xf32>
    %159 = vector.multi_reduction <maximumf>, %158, %cst_132 [1] : vector<16x64xf32> to vector<16xf32>
    %160 = vector.shape_cast %159 : vector<16xf32> to vector<16x1xf32>
    %161 = tpu.concatenate %157, %160 in 1 : vector<16x1xf32>, vector<16x1xf32> -> vector<16x2xf32>
    %162 = tpu.concatenate %154, %161 in 1 : vector<16x2xf32>, vector<16x2xf32> -> vector<16x4xf32>
    %cst_133 = arith.constant dense<0.000000e+00> : vector<16x4xf32>
    %163 = tpu.matmul %20, %162, %cst_133 {dimension_numbers = #tpu.dot_dimension_numbers<[1], [0], [0], [1], [0, 0, 1, 1], [], []>} : vector<16x16xf32>, vector<16x4xf32>, vector<16x4xf32> -> vector<16x4xf32>
    %164 = vector.broadcast %21 : vector<16x1xf32> to vector<16x4xf32>
    %165 = arith.addf %163, %164 : vector<16x4xf32>
    %cst_134 = arith.constant 0.000000e+00 : f32
    %166 = vector.broadcast %cst_134 : f32 to vector<16x4xf32>
    %167 = arith.maximumf %165, %166 : vector<16x4xf32>
    %cst_135 = arith.constant dense<0.000000e+00> : vector<32x4xf32>
    %168 = tpu.matmul %22, %167, %cst_135 {dimension_numbers = #tpu.dot_dimension_numbers<[1], [0], [0], [1], [0, 0, 1, 1], [], []>} : vector<32x16xf32>, vector<16x4xf32>, vector<32x4xf32> -> vector<32x4xf32>
    %169 = vector.broadcast %23 : vector<32x1xf32> to vector<32x4xf32>
    %170 = arith.addf %168, %169 : vector<32x4xf32>
    %171 = vector.extract_strided_slice %170 {offsets = [0, 0], sizes = [32, 2], strides = [1, 1]} : vector<32x4xf32> to vector<32x2xf32>
    %172 = vector.extract_strided_slice %170 {offsets = [0, 2], sizes = [32, 2], strides = [1, 1]} : vector<32x4xf32> to vector<32x2xf32>
    %173 = arith.addf %171, %172 : vector<32x2xf32>
    %cst_136 = arith.constant 0.000000e+00 : f32
    %174 = vector.broadcast %cst_136 : f32 to vector<32x2xf32>
    %175 = arith.subf %174, %173 : vector<32x2xf32>
    %176 = math.exp %175 : vector<32x2xf32>
    %cst_137 = arith.constant 1.000000e+00 : f32
    %177 = vector.broadcast %cst_137 : f32 to vector<32x2xf32>
    %178 = arith.addf %177, %176 : vector<32x2xf32>
    %cst_138 = arith.constant 1.000000e+00 : f32
    %179 = vector.broadcast %cst_138 : f32 to vector<32x2xf32>
    %180 = arith.divf %179, %178 : vector<32x2xf32>
    %cst_139 = arith.constant dense<0.000000e+00> : vector<32x128xf32>
    %181 = tpu.matmul %180, %39, %cst_139 {dimension_numbers = #tpu.dot_dimension_numbers<[1], [0], [0], [1], [0, 0, 1, 1], [], []>} : vector<32x2xf32>, vector<2x128xf32>, vector<32x128xf32> -> vector<32x128xf32>
    %182 = arith.mulf %181, %59 : vector<32x128xf32>
    %cst_140 = arith.constant dense<0.000000e+00> : vector<128xf32>
    %183 = vector.multi_reduction <add>, %182, %cst_140 [0] : vector<32x128xf32> to vector<128xf32>
    %184 = vector.shape_cast %183 : vector<128xf32> to vector<1x128xf32>
    %cst_141 = arith.constant 3.200000e+01 : f32
    %185 = vector.broadcast %cst_141 : f32 to vector<1x128xf32>
    %186 = arith.divf %184, %185 : vector<1x128xf32>
    %cst_142 = arith.constant dense<0xFF800000> : vector<128xf32>
    %187 = vector.multi_reduction <maximumf>, %182, %cst_142 [0] : vector<32x128xf32> to vector<128xf32>
    %188 = vector.shape_cast %187 : vector<128xf32> to vector<1x128xf32>
    %cst_143 = arith.constant dense<0.000000e+00> : vector<128xf32>
    %189 = vector.multi_reduction <add>, %122, %cst_143 [0] : vector<16x128xf32> to vector<128xf32>
    %190 = vector.shape_cast %189 : vector<128xf32> to vector<1x128xf32>
    %cst_144 = arith.constant 1.600000e+01 : f32
    %191 = vector.broadcast %cst_144 : f32 to vector<1x128xf32>
    %192 = arith.divf %190, %191 : vector<1x128xf32>
    %cst_145 = arith.constant dense<0xFF800000> : vector<128xf32>
    %193 = vector.multi_reduction <maximumf>, %122, %cst_145 [0] : vector<16x128xf32> to vector<128xf32>
    %194 = vector.shape_cast %193 : vector<128xf32> to vector<1x128xf32>
    %195 = tpu.concatenate %186, %188, %192, %194 in 0 : vector<1x128xf32>, vector<1x128xf32>, vector<1x128xf32>, vector<1x128xf32> -> vector<4x128xf32>
    %196 = vector.extract_strided_slice %195 {offsets = [0, 0], sizes = [1, 128], strides = [1, 1]} : vector<4x128xf32> to vector<1x128xf32>
    %197 = vector.extract_strided_slice %30 {offsets = [0, 0, 0], sizes = [1, 128, 128], strides = [1, 1, 1]} : vector<4x128x128xf32> to vector<1x128x128xf32>
    %198 = vector.shape_cast %197 : vector<1x128x128xf32> to vector<128x128xf32>
    %cst_146 = arith.constant dense<0.000000e+00> : vector<1x128xf32>
    %199 = tpu.matmul %196, %198, %cst_146 {dimension_numbers = #tpu.dot_dimension_numbers<[1], [0], [0], [1], [0, 0, 1, 1], [], []>} : vector<1x128xf32>, vector<128x128xf32>, vector<1x128xf32> -> vector<1x128xf32>
    %200 = vector.extract_strided_slice %195 {offsets = [1, 0], sizes = [1, 128], strides = [1, 1]} : vector<4x128xf32> to vector<1x128xf32>
    %201 = vector.extract_strided_slice %30 {offsets = [1, 0, 0], sizes = [1, 128, 128], strides = [1, 1, 1]} : vector<4x128x128xf32> to vector<1x128x128xf32>
    %202 = vector.shape_cast %201 : vector<1x128x128xf32> to vector<128x128xf32>
    %cst_147 = arith.constant dense<0.000000e+00> : vector<1x128xf32>
    %203 = tpu.matmul %200, %202, %cst_147 {dimension_numbers = #tpu.dot_dimension_numbers<[1], [0], [0], [1], [0, 0, 1, 1], [], []>} : vector<1x128xf32>, vector<128x128xf32>, vector<1x128xf32> -> vector<1x128xf32>
    %204 = arith.addf %199, %203 : vector<1x128xf32>
    %205 = vector.extract_strided_slice %195 {offsets = [2, 0], sizes = [1, 128], strides = [1, 1]} : vector<4x128xf32> to vector<1x128xf32>
    %206 = vector.extract_strided_slice %30 {offsets = [2, 0, 0], sizes = [1, 128, 128], strides = [1, 1, 1]} : vector<4x128x128xf32> to vector<1x128x128xf32>
    %207 = vector.shape_cast %206 : vector<1x128x128xf32> to vector<128x128xf32>
    %cst_148 = arith.constant dense<0.000000e+00> : vector<1x128xf32>
    %208 = tpu.matmul %205, %207, %cst_148 {dimension_numbers = #tpu.dot_dimension_numbers<[1], [0], [0], [1], [0, 0, 1, 1], [], []>} : vector<1x128xf32>, vector<128x128xf32>, vector<1x128xf32> -> vector<1x128xf32>
    %209 = arith.addf %204, %208 : vector<1x128xf32>
    %210 = vector.extract_strided_slice %195 {offsets = [3, 0], sizes = [1, 128], strides = [1, 1]} : vector<4x128xf32> to vector<1x128xf32>
    %211 = vector.extract_strided_slice %30 {offsets = [3, 0, 0], sizes = [1, 128, 128], strides = [1, 1, 1]} : vector<4x128x128xf32> to vector<1x128x128xf32>
    %212 = vector.shape_cast %211 : vector<1x128x128xf32> to vector<128x128xf32>
    %cst_149 = arith.constant dense<0.000000e+00> : vector<1x128xf32>
    %213 = tpu.matmul %210, %212, %cst_149 {dimension_numbers = #tpu.dot_dimension_numbers<[1], [0], [0], [1], [0, 0, 1, 1], [], []>} : vector<1x128xf32>, vector<128x128xf32>, vector<1x128xf32> -> vector<1x128xf32>
    %214 = arith.addf %209, %213 : vector<1x128xf32>
    %215 = vector.broadcast %24 : vector<1x1xf32> to vector<1x128xf32>
    %216 = arith.addf %214, %215 : vector<1x128xf32>
    %cst_150 = arith.constant 0.000000e+00 : f32
    %217 = vector.broadcast %cst_150 : f32 to vector<1x128xf32>
    %218 = arith.subf %217, %216 : vector<1x128xf32>
    %219 = math.exp %218 : vector<1x128xf32>
    %cst_151 = arith.constant 1.000000e+00 : f32
    %220 = vector.broadcast %cst_151 : f32 to vector<1x128xf32>
    %221 = arith.addf %220, %219 : vector<1x128xf32>
    %cst_152 = arith.constant 1.000000e+00 : f32
    %222 = vector.broadcast %cst_152 : f32 to vector<1x128xf32>
    %223 = arith.divf %222, %221 : vector<1x128xf32>
    %224 = vector.broadcast %223 : vector<1x128xf32> to vector<32x128xf32>
    %225 = arith.mulf %182, %224 : vector<32x128xf32>
    %cst_153 = arith.constant dense<0.000000e+00> : vector<16x2xf32>
    %226 = tpu.matmul %153, %42, %cst_153 {dimension_numbers = #tpu.dot_dimension_numbers<[1], [0], [0], [1], [0, 0, 1, 1], [], []>} : vector<16x32xf32>, vector<32x2xf32>, vector<16x2xf32> -> vector<16x2xf32>
    %227 = vector.extract_strided_slice %153 {offsets = [0, 0], sizes = [16, 16], strides = [1, 1]} : vector<16x32xf32> to vector<16x16xf32>
    %cst_154 = arith.constant dense<0xFF800000> : vector<16xf32>
    %228 = vector.multi_reduction <maximumf>, %227, %cst_154 [1] : vector<16x16xf32> to vector<16xf32>
    %229 = vector.shape_cast %228 : vector<16xf32> to vector<16x1xf32>
    %230 = vector.extract_strided_slice %153 {offsets = [0, 16], sizes = [16, 16], strides = [1, 1]} : vector<16x32xf32> to vector<16x16xf32>
    %cst_155 = arith.constant dense<0xFF800000> : vector<16xf32>
    %231 = vector.multi_reduction <maximumf>, %230, %cst_155 [1] : vector<16x16xf32> to vector<16xf32>
    %232 = vector.shape_cast %231 : vector<16xf32> to vector<16x1xf32>
    %233 = tpu.concatenate %229, %232 in 1 : vector<16x1xf32>, vector<16x1xf32> -> vector<16x2xf32>
    %234 = tpu.concatenate %226, %233 in 1 : vector<16x2xf32>, vector<16x2xf32> -> vector<16x4xf32>
    %cst_156 = arith.constant dense<0.000000e+00> : vector<16x4xf32>
    %235 = tpu.matmul %25, %234, %cst_156 {dimension_numbers = #tpu.dot_dimension_numbers<[1], [0], [0], [1], [0, 0, 1, 1], [], []>} : vector<16x16xf32>, vector<16x4xf32>, vector<16x4xf32> -> vector<16x4xf32>
    %236 = vector.broadcast %26 : vector<16x1xf32> to vector<16x4xf32>
    %237 = arith.addf %235, %236 : vector<16x4xf32>
    %cst_157 = arith.constant 0.000000e+00 : f32
    %238 = vector.broadcast %cst_157 : f32 to vector<16x4xf32>
    %239 = arith.maximumf %237, %238 : vector<16x4xf32>
    %cst_158 = arith.constant dense<0.000000e+00> : vector<64x4xf32>
    %240 = tpu.matmul %27, %239, %cst_158 {dimension_numbers = #tpu.dot_dimension_numbers<[1], [0], [0], [1], [0, 0, 1, 1], [], []>} : vector<64x16xf32>, vector<16x4xf32>, vector<64x4xf32> -> vector<64x4xf32>
    %241 = vector.broadcast %28 : vector<64x1xf32> to vector<64x4xf32>
    %242 = arith.addf %240, %241 : vector<64x4xf32>
    %243 = vector.extract_strided_slice %242 {offsets = [0, 0], sizes = [64, 2], strides = [1, 1]} : vector<64x4xf32> to vector<64x2xf32>
    %244 = vector.extract_strided_slice %242 {offsets = [0, 2], sizes = [64, 2], strides = [1, 1]} : vector<64x4xf32> to vector<64x2xf32>
    %245 = arith.addf %243, %244 : vector<64x2xf32>
    %cst_159 = arith.constant 0.000000e+00 : f32
    %246 = vector.broadcast %cst_159 : f32 to vector<64x2xf32>
    %247 = arith.subf %246, %245 : vector<64x2xf32>
    %248 = math.exp %247 : vector<64x2xf32>
    %cst_160 = arith.constant 1.000000e+00 : f32
    %249 = vector.broadcast %cst_160 : f32 to vector<64x2xf32>
    %250 = arith.addf %249, %248 : vector<64x2xf32>
    %cst_161 = arith.constant 1.000000e+00 : f32
    %251 = vector.broadcast %cst_161 : f32 to vector<64x2xf32>
    %252 = arith.divf %251, %250 : vector<64x2xf32>
    %cst_162 = arith.constant dense<0.000000e+00> : vector<64x32xf32>
    %253 = tpu.matmul %252, %41, %cst_162 {dimension_numbers = #tpu.dot_dimension_numbers<[1], [0], [0], [1], [0, 0, 1, 1], [], []>} : vector<64x2xf32>, vector<2x32xf32>, vector<64x32xf32> -> vector<64x32xf32>
    %254 = arith.mulf %253, %65 : vector<64x32xf32>
    %cst_163 = arith.constant dense<0.000000e+00> : vector<32xf32>
    %255 = vector.multi_reduction <add>, %254, %cst_163 [0] : vector<64x32xf32> to vector<32xf32>
    %256 = vector.shape_cast %255 : vector<32xf32> to vector<1x32xf32>
    %cst_164 = arith.constant 6.400000e+01 : f32
    %257 = vector.broadcast %cst_164 : f32 to vector<1x32xf32>
    %258 = arith.divf %256, %257 : vector<1x32xf32>
    %cst_165 = arith.constant dense<0xFF800000> : vector<32xf32>
    %259 = vector.multi_reduction <maximumf>, %254, %cst_165 [0] : vector<64x32xf32> to vector<32xf32>
    %260 = vector.shape_cast %259 : vector<32xf32> to vector<1x32xf32>
    %cst_166 = arith.constant dense<0.000000e+00> : vector<32xf32>
    %261 = vector.multi_reduction <add>, %153, %cst_166 [0] : vector<16x32xf32> to vector<32xf32>
    %262 = vector.shape_cast %261 : vector<32xf32> to vector<1x32xf32>
    %cst_167 = arith.constant 1.600000e+01 : f32
    %263 = vector.broadcast %cst_167 : f32 to vector<1x32xf32>
    %264 = arith.divf %262, %263 : vector<1x32xf32>
    %cst_168 = arith.constant dense<0xFF800000> : vector<32xf32>
    %265 = vector.multi_reduction <maximumf>, %153, %cst_168 [0] : vector<16x32xf32> to vector<32xf32>
    %266 = vector.shape_cast %265 : vector<32xf32> to vector<1x32xf32>
    %267 = tpu.concatenate %258, %260, %264, %266 in 0 : vector<1x32xf32>, vector<1x32xf32>, vector<1x32xf32>, vector<1x32xf32> -> vector<4x32xf32>
    %268 = vector.extract_strided_slice %267 {offsets = [0, 0], sizes = [1, 32], strides = [1, 1]} : vector<4x32xf32> to vector<1x32xf32>
    %269 = vector.extract_strided_slice %31 {offsets = [0, 0, 0], sizes = [1, 32, 32], strides = [1, 1, 1]} : vector<4x32x32xf32> to vector<1x32x32xf32>
    %270 = vector.shape_cast %269 : vector<1x32x32xf32> to vector<32x32xf32>
    %cst_169 = arith.constant dense<0.000000e+00> : vector<1x32xf32>
    %271 = tpu.matmul %268, %270, %cst_169 {dimension_numbers = #tpu.dot_dimension_numbers<[1], [0], [0], [1], [0, 0, 1, 1], [], []>} : vector<1x32xf32>, vector<32x32xf32>, vector<1x32xf32> -> vector<1x32xf32>
    %272 = vector.extract_strided_slice %267 {offsets = [1, 0], sizes = [1, 32], strides = [1, 1]} : vector<4x32xf32> to vector<1x32xf32>
    %273 = vector.extract_strided_slice %31 {offsets = [1, 0, 0], sizes = [1, 32, 32], strides = [1, 1, 1]} : vector<4x32x32xf32> to vector<1x32x32xf32>
    %274 = vector.shape_cast %273 : vector<1x32x32xf32> to vector<32x32xf32>
    %cst_170 = arith.constant dense<0.000000e+00> : vector<1x32xf32>
    %275 = tpu.matmul %272, %274, %cst_170 {dimension_numbers = #tpu.dot_dimension_numbers<[1], [0], [0], [1], [0, 0, 1, 1], [], []>} : vector<1x32xf32>, vector<32x32xf32>, vector<1x32xf32> -> vector<1x32xf32>
    %276 = arith.addf %271, %275 : vector<1x32xf32>
    %277 = vector.extract_strided_slice %267 {offsets = [2, 0], sizes = [1, 32], strides = [1, 1]} : vector<4x32xf32> to vector<1x32xf32>
    %278 = vector.extract_strided_slice %31 {offsets = [2, 0, 0], sizes = [1, 32, 32], strides = [1, 1, 1]} : vector<4x32x32xf32> to vector<1x32x32xf32>
    %279 = vector.shape_cast %278 : vector<1x32x32xf32> to vector<32x32xf32>
    %cst_171 = arith.constant dense<0.000000e+00> : vector<1x32xf32>
    %280 = tpu.matmul %277, %279, %cst_171 {dimension_numbers = #tpu.dot_dimension_numbers<[1], [0], [0], [1], [0, 0, 1, 1], [], []>} : vector<1x32xf32>, vector<32x32xf32>, vector<1x32xf32> -> vector<1x32xf32>
    %281 = arith.addf %276, %280 : vector<1x32xf32>
    %282 = vector.extract_strided_slice %267 {offsets = [3, 0], sizes = [1, 32], strides = [1, 1]} : vector<4x32xf32> to vector<1x32xf32>
    %283 = vector.extract_strided_slice %31 {offsets = [3, 0, 0], sizes = [1, 32, 32], strides = [1, 1, 1]} : vector<4x32x32xf32> to vector<1x32x32xf32>
    %284 = vector.shape_cast %283 : vector<1x32x32xf32> to vector<32x32xf32>
    %cst_172 = arith.constant dense<0.000000e+00> : vector<1x32xf32>
    %285 = tpu.matmul %282, %284, %cst_172 {dimension_numbers = #tpu.dot_dimension_numbers<[1], [0], [0], [1], [0, 0, 1, 1], [], []>} : vector<1x32xf32>, vector<32x32xf32>, vector<1x32xf32> -> vector<1x32xf32>
    %286 = arith.addf %281, %285 : vector<1x32xf32>
    %287 = vector.broadcast %29 : vector<1x1xf32> to vector<1x32xf32>
    %288 = arith.addf %286, %287 : vector<1x32xf32>
    %cst_173 = arith.constant 0.000000e+00 : f32
    %289 = vector.broadcast %cst_173 : f32 to vector<1x32xf32>
    %290 = arith.subf %289, %288 : vector<1x32xf32>
    %291 = math.exp %290 : vector<1x32xf32>
    %cst_174 = arith.constant 1.000000e+00 : f32
    %292 = vector.broadcast %cst_174 : f32 to vector<1x32xf32>
    %293 = arith.addf %292, %291 : vector<1x32xf32>
    %cst_175 = arith.constant 1.000000e+00 : f32
    %294 = vector.broadcast %cst_175 : f32 to vector<1x32xf32>
    %295 = arith.divf %294, %293 : vector<1x32xf32>
    %296 = vector.broadcast %295 : vector<1x32xf32> to vector<64x32xf32>
    %297 = arith.mulf %254, %296 : vector<64x32xf32>
    %cst_176 = arith.constant dense<0.000000e+00> : vector<32x2xf32>
    %298 = tpu.matmul %225, %40, %cst_176 {dimension_numbers = #tpu.dot_dimension_numbers<[1], [0], [0], [1], [0, 0, 1, 1], [], []>} : vector<32x128xf32>, vector<128x2xf32>, vector<32x2xf32> -> vector<32x2xf32>
    %cst_177 = arith.constant dense<0.000000e+00> : vector<64x2xf32>
    %299 = tpu.matmul %297, %42, %cst_177 {dimension_numbers = #tpu.dot_dimension_numbers<[1], [0], [0], [1], [0, 0, 1, 1], [], []>} : vector<64x32xf32>, vector<32x2xf32>, vector<64x2xf32> -> vector<64x2xf32>
    %300 = tpu.concatenate %81, %298, %299 in 0 : vector<128x2xf32>, vector<32x2xf32>, vector<64x2xf32> -> vector<224x2xf32>
    %301 = tpu.transpose %300, [1, 0] : vector<224x2xf32> -> vector<2x224xf32>
    %302 = vector.extract_strided_slice %301 {offsets = [0, 0], sizes = [2, 128], strides = [1, 1]} : vector<2x224xf32> to vector<2x128xf32>
    %cst_178 = arith.constant dense<0.000000e+00> : vector<2xf32>
    %303 = vector.multi_reduction <add>, %302, %cst_178 [1] : vector<2x128xf32> to vector<2xf32>
    %304 = vector.shape_cast %303 : vector<2xf32> to vector<2x1xf32>
    %cst_179 = arith.constant 1.280000e+02 : f32
    %305 = vector.broadcast %cst_179 : f32 to vector<2x1xf32>
    %306 = arith.divf %304, %305 : vector<2x1xf32>
    %307 = vector.broadcast %306 : vector<2x1xf32> to vector<2x128xf32>
    %308 = arith.subf %302, %307 : vector<2x128xf32>
    %309 = arith.mulf %308, %308 : vector<2x128xf32>
    %cst_180 = arith.constant dense<0.000000e+00> : vector<2xf32>
    %310 = vector.multi_reduction <add>, %309, %cst_180 [1] : vector<2x128xf32> to vector<2xf32>
    %311 = vector.shape_cast %310 : vector<2xf32> to vector<2x1xf32>
    %cst_181 = arith.constant 1.280000e+02 : f32
    %312 = vector.broadcast %cst_181 : f32 to vector<2x1xf32>
    %313 = arith.divf %311, %312 : vector<2x1xf32>
    %314 = vector.broadcast %306 : vector<2x1xf32> to vector<2x128xf32>
    %315 = arith.subf %302, %314 : vector<2x128xf32>
    %cst_182 = arith.constant 9.99999974E-6 : f32
    %316 = vector.broadcast %cst_182 : f32 to vector<2x1xf32>
    %317 = arith.addf %313, %316 : vector<2x1xf32>
    %318 = math.rsqrt %317 : vector<2x1xf32>
    %319 = vector.broadcast %318 : vector<2x1xf32> to vector<2x128xf32>
    %320 = arith.mulf %315, %319 : vector<2x128xf32>
    %321 = vector.extract_strided_slice %301 {offsets = [0, 128], sizes = [2, 32], strides = [1, 1]} : vector<2x224xf32> to vector<2x32xf32>
    %cst_183 = arith.constant dense<0.000000e+00> : vector<2xf32>
    %322 = vector.multi_reduction <add>, %321, %cst_183 [1] : vector<2x32xf32> to vector<2xf32>
    %323 = vector.shape_cast %322 : vector<2xf32> to vector<2x1xf32>
    %cst_184 = arith.constant 3.200000e+01 : f32
    %324 = vector.broadcast %cst_184 : f32 to vector<2x1xf32>
    %325 = arith.divf %323, %324 : vector<2x1xf32>
    %326 = vector.broadcast %325 : vector<2x1xf32> to vector<2x32xf32>
    %327 = arith.subf %321, %326 : vector<2x32xf32>
    %328 = arith.mulf %327, %327 : vector<2x32xf32>
    %cst_185 = arith.constant dense<0.000000e+00> : vector<2xf32>
    %329 = vector.multi_reduction <add>, %328, %cst_185 [1] : vector<2x32xf32> to vector<2xf32>
    %330 = vector.shape_cast %329 : vector<2xf32> to vector<2x1xf32>
    %cst_186 = arith.constant 3.200000e+01 : f32
    %331 = vector.broadcast %cst_186 : f32 to vector<2x1xf32>
    %332 = arith.divf %330, %331 : vector<2x1xf32>
    %333 = vector.broadcast %325 : vector<2x1xf32> to vector<2x32xf32>
    %334 = arith.subf %321, %333 : vector<2x32xf32>
    %cst_187 = arith.constant 9.99999974E-6 : f32
    %335 = vector.broadcast %cst_187 : f32 to vector<2x1xf32>
    %336 = arith.addf %332, %335 : vector<2x1xf32>
    %337 = math.rsqrt %336 : vector<2x1xf32>
    %338 = vector.broadcast %337 : vector<2x1xf32> to vector<2x32xf32>
    %339 = arith.mulf %334, %338 : vector<2x32xf32>
    %340 = vector.extract_strided_slice %301 {offsets = [0, 160], sizes = [2, 64], strides = [1, 1]} : vector<2x224xf32> to vector<2x64xf32>
    %cst_188 = arith.constant dense<0.000000e+00> : vector<2xf32>
    %341 = vector.multi_reduction <add>, %340, %cst_188 [1] : vector<2x64xf32> to vector<2xf32>
    %342 = vector.shape_cast %341 : vector<2xf32> to vector<2x1xf32>
    %cst_189 = arith.constant 6.400000e+01 : f32
    %343 = vector.broadcast %cst_189 : f32 to vector<2x1xf32>
    %344 = arith.divf %342, %343 : vector<2x1xf32>
    %345 = vector.broadcast %344 : vector<2x1xf32> to vector<2x64xf32>
    %346 = arith.subf %340, %345 : vector<2x64xf32>
    %347 = arith.mulf %346, %346 : vector<2x64xf32>
    %cst_190 = arith.constant dense<0.000000e+00> : vector<2xf32>
    %348 = vector.multi_reduction <add>, %347, %cst_190 [1] : vector<2x64xf32> to vector<2xf32>
    %349 = vector.shape_cast %348 : vector<2xf32> to vector<2x1xf32>
    %cst_191 = arith.constant 6.400000e+01 : f32
    %350 = vector.broadcast %cst_191 : f32 to vector<2x1xf32>
    %351 = arith.divf %349, %350 : vector<2x1xf32>
    %352 = vector.broadcast %344 : vector<2x1xf32> to vector<2x64xf32>
    %353 = arith.subf %340, %352 : vector<2x64xf32>
    %cst_192 = arith.constant 9.99999974E-6 : f32
    %354 = vector.broadcast %cst_192 : f32 to vector<2x1xf32>
    %355 = arith.addf %351, %354 : vector<2x1xf32>
    %356 = math.rsqrt %355 : vector<2x1xf32>
    %357 = vector.broadcast %356 : vector<2x1xf32> to vector<2x64xf32>
    %358 = arith.mulf %353, %357 : vector<2x64xf32>
    %359 = tpu.concatenate %320, %339, %358 in 1 : vector<2x128xf32>, vector<2x32xf32>, vector<2x64xf32> -> vector<2x224xf32>
    %c0_193 = arith.constant 0 : index
    %c0_194 = arith.constant 0 : index
    %360 = vector.load %arg44[%c0_193, %c0_194] : memref<2x224xf32, #tpu.memory_space<vmem>>, vector<2x224xf32>
    tpu.vector_store %arg44[%c0_193, %c0_194], %359 {strides = array<i32>} : memref<2x224xf32, #tpu.memory_space<vmem>>, vector<2x224xf32>,
    return
  }
}

</mosaic_0001>

<bundles_post_ra>
// kernel: tpu_custom_call.1
= control target key start
LH: loop header
LB: loop body
LE: loop exit
PB: predicated region body
PF: predicated region fallthrough
CT: control target
= control target key end

     0   :  { %s4170_s6 = smov 1   ;;  %s4171_s10 = smov 2   ;;  %s5392_s0 = inlined_call_operand.smem [shape: u32[45], index: -1, kind: input, shape index: {}] }
   0x1   :  { %s4236_s5 = sld [smem:[%s5392_s0]]   ;;  %s4172_s14 = smov 3  }
   0x2   :  { %s4241_s9 = sld [smem:[%s5392_s0 + %s4170_s6]]   ;;  %s4173_s18 = smov 4  }
   0x3   :  { %s4246_s13 = sld [smem:[%s5392_s0 + %s4171_s10]]   ;;  %s4174_s22 = smov 5  }
   0x4   :  { %s4251_s17 = sld [smem:[%s5392_s0 + %s4172_s14]]   ;;  %s4175_s26 = smov 6  }
   0x5   :  { %s4256_s21 = sld [smem:[%s5392_s0 + %s4173_s18]]   ;;  %s4176_s30 = smov 7  }
   0x6   :  { %s4261_s25 = sld [smem:[%s5392_s0 + %s4174_s22]]   ;;  %s4177_s4 = smov 8  }
   0x7   :  { %s4266_s29 = sld [smem:[%s5392_s0 + %s4175_s26]]   ;;  %s4178_s10 = smov 9  }
   0x8   :  { %s4271_s3 = sld [smem:[%s5392_s0 + %s4176_s30]]   ;;  %s4179_s15 = smov 10  }
   0x9   :  { %s4276_s8 = sld [smem:[%s5392_s0 + %s4177_s4]]   ;;  %s4180_s20 = smov 11  }
   0xa   :  { %s4281_s14 = sld [smem:[%s5392_s0 + %s4178_s10]]   ;;  %s4181_s26 = smov 12  }
   0xb   :  { %s4286_s19 = sld [smem:[%s5392_s0 + %s4179_s15]]   ;;  %s4182_s1 = smov 13  }
   0xc   :  { %5417 = sst [smem:[#allocation14_spill]] %s4261_s25  ;;  %s4183_s7 = smov 14  }
   0xd   :  { %s4291_s24 = sld [smem:[%s5392_s0 + %s4180_s20]]   ;;  %s4184_s15 = smov 15  }
   0xe   :  { %5418 = sst [smem:[#allocation15_spill]] %s4271_s3  ;;  %s4185_s22 = smov 16  }
   0xf   :  { %s4296_s30 = sld [smem:[%s5392_s0 + %s4181_s26]]   ;;  %s4186_s28 = smov 17  }
  0x10   :  { %5419 = sst [smem:[#allocation16_spill]] %s4281_s14  ;;  %s4195_s10 = smov 26  }
  0x11   :  { %s4301_s6 = sld [smem:[%s5392_s0 + %s4182_s1]]   ;;  %s4196_s16 = smov 27  }
  0x12   :  { %s4306_s12 = sld [smem:[%s5392_s0 + %s4183_s7]]   ;;  %s4187_s7 = smov 18  }
  0x13   :  { %5420 = sst [smem:[#allocation17_spill]] %s4291_s24  ;;  %s4197_s23 = smov 28  }
  0x14   :  { %s4311_s20 = sld [smem:[%s5392_s0 + %s4184_s15]]   ;;  %s4188_s15 = smov 19  }
  0x15   :  { %s4316_s27 = sld [smem:[%s5392_s0 + %s4185_s22]]   ;;  %s4189_s22 = smov 20  }
  0x16   :  { %s4321_s4 = sld [smem:[%s5392_s0 + %s4186_s28]]   ;;  %s4190_s28 = smov 21  }
  0x17   :  { %5421 = sst [smem:[#allocation18_spill]] %s4301_s6  ;;  %s4198_s1 = smov 29  }
  0x18   :  { %s4326_s6 = sld [smem:[%s5392_s0 + %s4187_s7]]   ;;  %s4191_s7 = smov 22  }
  0x19   :  { %s4336_s24 = sld [smem:[%s5392_s0 + %s4189_s22]]   ;;  %s4193_s22 = smov 24  }
  0x1a   :  { %5422 = sst [smem:[#allocation19_spill]] %s4311_s20 }
  0x1b   :  { %5423 = sst [smem:[#allocation20_spill]] %s4316_s27 }
  0x1c   :  { %5424 = sst [smem:[#allocation21_spill]] %s4321_s4 }
  0x1d   :  { %s4331_s20 = sld [smem:[%s5392_s0 + %s4188_s15]]   ;;  %s4192_s15 = smov 23  }
  0x1e   :  { %s4341_s4 = sld [smem:[%s5392_s0 + %s4190_s28]]   ;;  %s4194_s28 = smov 25  }
  0x1f   :  { %5426 = sst [smem:[#allocation23_spill]] %s4336_s24 }
  0x20   :  { %s4346_s14 = sld [smem:[%s5392_s0 + %s4191_s7]]   ;;  %s4203_s7 = smov 35  }
  0x21   :  { %s4356_s24 = sld [smem:[%s5392_s0 + %s4193_s22]]  }
  0x22   :  { %s4379_s3 = sld [smem:[%s5392_s0 + %s4198_s1]]   ;;  %s4202_s1 = smov 34  }
  0x23   :  { %5425 = sst [smem:[#allocation22_spill]] %s4331_s20 }
  0x24   :  { %5427 = sst [smem:[#allocation24_spill]] %s4341_s4 }
  0x25   :  { %s4351_s20 = sld [smem:[%s5392_s0 + %s4192_s15]]  }
  0x26   :  { %5428 = sst [smem:[#allocation25_spill]] %s4346_s14 }
  0x27   :  { %5430 = sst [smem:[#allocation27_spill]] %s4356_s24 }
  0x28   :  { %s3757_s4 = sld [smem:[%s5392_s0 + %s4194_s28]]  }
  0x29   :  { %s4364_s14 = sld [smem:[%s5392_s0 + %s4195_s10]]   ;;  %s4199_s10 = smov 31  }
  0x2a   :  { %s4374_s24 = sld [smem:[%s5392_s0 + %s4197_s23]]   ;;  %s4201_s23 = smov 33  }
  0x2b   :  { %5429 = sst [smem:[#allocation26_spill]] %s4351_s20 }
  0x2c   :  { %s4369_s20 = sld [smem:[%s5392_s0 + %s4196_s16]]   ;;  %s4200_s16 = smov 32  }
  0x2d   :  { %5434 = sst [smem:[#allocation31_spill]] %s4379_s3  ;;  %s4207_s3 = smov 39  }
  0x2e   :  { %v94_v0 = vstv %s3757_s4  ;;  %s4394_s28 = sld [smem:[%s5392_s0 + %s4201_s23]]   ;;  %s4204_s4 = smov 36  }
  0x2f   :  { %5431 = sst [smem:[#allocation28_spill]] %s4364_s14  ;;  %95 = vst [vmem:[#allocation2] sm:$0x1] %v94_v0  ;;  %s4205_s23 = smov 37  }
  0x30   :  { %5433 = sst [smem:[#allocation30_spill]] %s4374_s24  ;;  %s4206_s24 = smov 38  }
  0x31   :  { %s4384_s14 = sld [smem:[%s5392_s0 + %s4199_s10]]  }
  0x32   :  { %5432 = sst [smem:[#allocation29_spill]] %s4369_s20 }
  0x33   :  { %s4389_s20 = sld [smem:[%s5392_s0 + %s4200_s16]]  }
  0x34   :  { %s4399_s10 = sld [smem:[%s5392_s0 + %s4202_s1]]  }
  0x35   :  { %s4404_s16 = sld [smem:[%s5392_s0 + %s4203_s7]]  }
  0x36   :  { %s4409_s22 = sld [smem:[%s5392_s0 + %s4204_s4]]   ;;  %s4208_s4 = smov 40  }
  0x37   :  { %s4414_s25 = sld [smem:[%s5392_s0 + %s4205_s23]]  }
  0x39   :  { %5435 = sst [smem:[#allocation32_spill]] %s4389_s20  ;;  %s4209_s20 = smov 41  }
  0x3a   :  { %5436 = sst [smem:[#allocation33_spill]] %s4399_s10 }
  0x3b   :  { %5437 = sst [smem:[#allocation34_spill]] %s4404_s16 }
  0x3c   :  { %5438 = sst [smem:[#allocation35_spill]] %s4409_s22 }
  0x3d   :  { %5439 = sst [smem:[#allocation36_spill]] %s4414_s25 }
  0x3e   :  { %s4419_s10 = sld [smem:[%s5392_s0 + %s4206_s24]]   ;;  %s4210_s24 = smov 42  }
  0x3f   :  { %s4424_s16 = sld [smem:[%s5392_s0 + %s4207_s3]]   ;;  %s4211_s3 = smov 43  }
  0x40   :  { %s4429_s22 = sld [smem:[%s5392_s0 + %s4208_s4]]   ;;  %s4212_s4 = smov 44  }
  0x41   :  { %s4434_s25 = sld [smem:[%s5392_s0 + %s4209_s20]]   ;;  %s4213_s20 = smov 30  }
  0x42   :  { %s4439_s27 = sld [smem:[%s5392_s0 + %s4210_s24]]  }
  0x45   :  { %5440 = sst [smem:[#allocation37_spill]] %s4424_s16 }
  0x46   :  { %5441 = sst [smem:[#allocation38_spill]] %s4429_s22 }
  0x47   :  { %5442 = sst [smem:[#allocation39_spill]] %s4434_s25 }
  0x48   :  { %s4444_s16 = sld [smem:[%s5392_s0 + %s4211_s3]]  }
  0x49   :  { %s4449_s22 = sld [smem:[%s5392_s0 + %s4212_s4]]  }
  0x4a   :  { %s3762_s25 = sld [smem:[%s5392_s0 + %s4213_s20]]  }
  0x50   :  { %v96_v1 = vstv %s3762_s25 }
  0x51   :  { %97 = vst [vmem:[#allocation3] sm:$0x1] %v96_v1 }
  0x52   :  { %98 = vsyncpa [#allocation5], 0 }
  0x53   :  { %99 = vsyncpa [#allocation8], 0 }
  0x54   :  { %100 = vsyncpa [#allocation6], 0  ;;  %s182_s24 = sshll.u32 %s4394_s28, 4  ;;  %s4214_s1 = smov [#allocation7]   ;;  %s183_s24 = int_to_ptr.hbm [resolvable:$true] %s182_s24 }
  0x55   :  { %s184_s2 = sshll.u32 %s4214_s1, 4  ;;  %s167_s3 = sshll.u32 %s4384_s14, 4  ;;  %s185_s2 = int_to_ptr.vmem [resolvable:$true] %s184_s2  ;;  %s168_s3 = int_to_ptr.hbm [resolvable:$true] %s167_s3 }
  0x56   :  { %s4068_s7 = sshra.s32 %s183_s24, 4  ;;  %s4072_s0 = scalar_lea.hbm %s4394_s28, 512  ;;  %s4069_s7 = int_to_ptr.hbm [resolvable:$true] %s4068_s7 }
  0x57   :  { %s4070_s11 = scalar_lea.hbm %s4069_s7, 512  ;;  %p4073_p1 = scmp.lt.s32.totalorder %s4069_s7, %s4394_s28 }
  0x58   :  { %p4071_p0 = scmp.ne.s32.totalorder %s4069_s7, %s4070_s11  ;;  %p4074_p2 = scmp.lt.s32.totalorder %s4072_s0, %s4070_s11 }
  0x5a   :  { %p4075_p3 = por %p4074_p2, %p4073_p1 }
  0x5c   :  { %p4076_p4 = pnand %p4075_p3, %p4071_p0 }
  0x5e   :  { %4079 = shalt.err (!%p4076_p4)
}
  0x5f   :  { %s4215_s25 = smov 128   ;;  %s4216_s4 = smov 8  }
  0x60   :  { %190 = dma.hbm_to_vmem [thread:$0]  %s183_s24, 8192, %s185_s2, [#allocation8], %s4215_s25, %s4215_s25, %s4216_s4  }
  0x61   :  { %s4217_s15 = smov [#allocation4]   ;;  %s203_s20 = sshll.u32 %s4419_s10, 4  ;;  %s204_s20 = int_to_ptr.hbm [resolvable:$true] %s203_s20 }
  0x62   :  { %s169_s18 = sshll.u32 %s4217_s15, 4  ;;  %s4092_s23 = sshra.s32 %s168_s3, 4  ;;  %s170_s18 = int_to_ptr.vmem [resolvable:$true] %s169_s18  ;;  %s4093_s23 = int_to_ptr.hbm [resolvable:$true] %s4092_s23 }
  0x63   :  { %s4094_s28 = scalar_lea.hbm %s4093_s23, 512  ;;  %s4096_s26 = scalar_lea.hbm %s4384_s14, 512 }
  0x64   :  { %p4095_p5 = scmp.ne.s32.totalorder %s4093_s23, %s4094_s28  ;;  %p4097_p6 = scmp.lt.s32.totalorder %s4093_s23, %s4384_s14 }
  0x65   :  { %p4098_p7 = scmp.lt.s32.totalorder %s4096_s26, %s4094_s28 }
  0x67   :  { %p4099_p8 = por %p4098_p7, %p4097_p6 }
  0x69   :  { %p4100_p9 = pnand %p4099_p8, %p4095_p5 }
  0x6b   :  { %4103 = shalt.err (!%p4100_p9)
}
  0x6c   :  { %175 = dma.hbm_to_vmem [thread:$0]  %s168_s3, 8192, %s170_s18, [#allocation5], %s4215_s25, %s4215_s25, %s4216_s4  }
  0x6d   :  { %s4218_s24 = smov [#allocation9]   ;;  %s4116_s2 = sshra.s32 %s204_s20, 4  ;;  %s4117_s2 = int_to_ptr.hbm [resolvable:$true] %s4116_s2 }
  0x6e   :  { %s205_s1 = sshll.u32 %s4218_s24, 4  ;;  %s4118_s7 = scalar_lea.hbm %s4117_s2, 1152  ;;  %s206_s1 = int_to_ptr.vmem [resolvable:$true] %s205_s1 }
  0x6f   :  { %p4119_p10 = scmp.ne.s32.totalorder %s4117_s2, %s4118_s7  ;;  %s4120_s11 = scalar_lea.hbm %s4419_s10, 1152 }
  0x70   :  { %p4121_p11 = scmp.lt.s32.totalorder %s4117_s2, %s4419_s10  ;;  %p4122_p12 = scmp.lt.s32.totalorder %s4120_s11, %s4118_s7 }
  0x72   :  { %p4123_p13 = por %p4122_p12, %p4121_p11 }
  0x74   :  { %p4124_p0 = pnand %p4123_p13, %p4119_p10 }
  0x76   :  { %4127 = shalt.err (!%p4124_p0)
}
  0x77   :  { %211 = dma.hbm_to_vmem [thread:$0]  %s204_s20, 18432, %s206_s1, [#allocation8], %s4215_s25, %s4215_s25, %s4216_s4  }
  0x78   :  { %4164 = dma.done.wait [#allocation5], 8192  }
  0x79   :  { %4165 = vsyncadd [#allocation5], 4294959104 }
  0x7a   :  { %4166 = dma.done.wait [#allocation8], 26624  }
  0x7b   :  { %4167 = vsyncadd [#allocation8], 4294940672  ;;  %v4219_v2 = vmov 0   ;;  %v235_v3 = vld [vmem:[%s4246_s13] sm:$0xff]  ;;  %v736_v4 = vld [vmem:[%s4236_s5 + $0x8] sm:$0xff]  ;;  %vm755_vm0 = vcmask 1043456  }
  0x7c   :  { %3965 = vset.pattern.permute.xlu0 %v4219_v2  ;;  %3966 = vset.pattern.permute.xlu1 %v4219_v2  ;;  %746 = vst [vmem:[#allocation1 + $0x10] ss:$2 sm:$0xff] %v736_v4  ;;  %v735_v5 = vld [vmem:[%s4236_s5] sm:$0xff]  ;;  %vm751_vm1 = vcmask 31744   ;;  %v257_v13 = vld [vmem:[%s4276_s8 + $0x18] sm:$0xff]  ;;  %v260_v14 = vld [vmem:[%s4276_s8 + $0x30] sm:$0xff] }
  0x7d   :  { %3967 = vset.pattern.permute.xlu2 %v4219_v2  ;;  %739 = vperm.xlu0 %3965, %v235_v3   ;;  %744 = vst [vmem:[#allocation1] ss:$2 sm:$0xff] %v735_v5  ;;  %v237_v6 = vld [vmem:[%s4256_s21] sm:$0xff]  ;;  %v279_v15 = vld [vmem:[%s4286_s19 + $0x8] sm:$0xff]  ;;  %v285_v17 = vld [vmem:[%s4286_s19 + $0x38] sm:$0xff]  ;;  %vm933_vm2 = vcmask 64512  }
  0x7e   :  { %v234_v7 = vld [vmem:[%s4241_s9] sm:$0xff]  ;;  %v288_v18 = vld [vmem:[%s4286_s19 + $0x50] sm:$0xff]  ;;  %v291_v23 = vld [vmem:[%s4286_s19 + $0x68] sm:$0xff]  ;;  %s5443_s5 = sld [smem:[#allocation20_spill]]  ;;  %vm1063_vm3 = vcmask 261120   ;;  %vm1258_vm4 = vcmask 523264  }
  0x7f   :  { %v254_v12 = vld [vmem:[%s4276_s8] sm:$0xff]  ;;  %v445_v29 = vld [vmem:[#allocation7 + $0x68] sm:$0xff]  ;;  %v444_v33 = vld [vmem:[#allocation7 + $0x60] sm:$0xff]  ;;  %s5444_s9 = sld [smem:[#allocation14_spill]]  ;;  %vm1999_vm5 = vcmask 130048   ;;  %vm2356_vm6 = vcmask 1048064  }
  0x80   :  { %v282_v16 = vld [vmem:[%s4286_s19 + $0x20] sm:$0xff]  ;;  %v461_v30 = vld [vmem:[#allocation7 + $0xe8] sm:$0xff]  ;;  %v460_v34 = vld [vmem:[#allocation7 + $0xe0] sm:$0xff]  ;;  %s5445_s13 = sld [smem:[#allocation15_spill]]  ;;  %vm1631_vm7 = vcmask 7168   ;;  %s4220_s18 = smov 2  }
  0x81   :  { %v447_v19 = vld [vmem:[#allocation7 + $0x78] sm:$0xff]  ;;  %v446_v25 = vld [vmem:[#allocation7 + $0x70] sm:$0xff]  ;;  %v477_v31 = vld [vmem:[#allocation7 + $0x168] sm:$0xff]  ;;  %s5447_s21 = sld [smem:[#allocation16_spill]]  ;;  %vm2373_vm8 = vcmask 15360   ;;  %s4221_s28 = smov 126  }
  0x82   :  { %v463_v20 = vld [vmem:[#allocation7 + $0xf8] sm:$0xff]  ;;  %v462_v26 = vld [vmem:[#allocation7 + $0xf0] sm:$0xff]  ;;  %v493_v32 = vld [vmem:[#allocation7 + $0x1e8] sm:$0xff]  ;;  %s5450_s14 = sld [smem:[#allocation35_spill]]  ;;  %vm2586_vm9 = vcmask 1041408   ;;  %vm2831_vm14 = vcmask 261248  }
  0x83   :  { %v749_v8 = vld.sshfl [vmem:[#allocation1 + $0x10] sm:$0xff pattern:$0x75316420]  ;;  %v750_v9 = vld.sshfl [vmem:[#allocation1 + $0x18] sm:$0xff pattern:$0x75316420] }
  0x84   :  { %3781 = vmatpush.msk.msra.mxu2 %vm755_vm0, %v749_v8  ;;  %3783 = vmatpush.msk.msra.mxu3 %vm755_vm0, %v750_v9  ;;  %v747_v10 = vld.sshfl [vmem:[#allocation1] sm:$0xff pattern:$0x75316420]  ;;  %v748_v11 = vld.sshfl [vmem:[#allocation1 + $0x8] sm:$0xff pattern:$0x75316420] }
  0x85   :  { %930 = vperm.xlu0 %3965, %v237_v6   ;;  %3782 = vmatmul.msk.f32.vlgmr.msra.gmra.mxu2 %vm751_vm1, %v234_v7  ;;  %v479_v21 = vld [vmem:[#allocation7 + $0x178] sm:$0xff]  ;;  %v478_v27 = vld [vmem:[#allocation7 + $0x170] sm:$0xff]  ;;  %v476_v35 = vld [vmem:[#allocation7 + $0x160] sm:$0xff]  ;;  %s5455_s10 = sld [smem:[#allocation21_spill]]  ;;  %s4227_s11 = smov [#allocation10]  }
  0x86   :  { %3784 = vmatmul.msk.f32.vlgmr.msra.gmra.mxu3 %vm751_vm1, %v234_v7  ;;  %3777 = vmatpush.msk.msra.mxu0 %vm755_vm0, %v747_v10  ;;  %v495_v22 = vld [vmem:[#allocation7 + $0x1f8] sm:$0xff]  ;;  %v494_v28 = vld [vmem:[#allocation7 + $0x1f0] sm:$0xff]  ;;  %v492_v36 = vld [vmem:[#allocation7 + $0x1e0] sm:$0xff]  ;;  %s5456_s3 = sld [smem:[#allocation39_spill]] }
  0x87   :  { %3779 = vmatpush.msk.msra.mxu1 %vm755_vm0, %v748_v11  ;;  %3778 = vmatmul.msk.f32.vlgmr.msra.gmra.mxu0 %vm751_vm1, %v234_v7  ;;  %v296_v24 = vld [vmem:[%s4296_s30] sm:$0xff]  ;;  %v301_v37 = vld [vmem:[%s4306_s12 + $0x8] sm:$0xff]  ;;  %v441_v46 = vld [vmem:[#allocation7 + $0x48] sm:$0xff]  ;;  %s5457_s0 = sld [smem:[#allocation25_spill]] }
  0x88   :  { %3780 = vmatmul.msk.f32.vlgmr.msra.gmra.mxu1 %vm751_vm1, %v234_v7  ;;  %848 = vmatpush.msrb.mxu0 %v447_v19  ;;  %v443_v38 = vld [vmem:[#allocation7 + $0x58] sm:$0xff]  ;;  %v442_v42 = vld [vmem:[#allocation7 + $0x50] sm:$0xff]  ;;  %v457_v47 = vld [vmem:[#allocation7 + $0xc8] sm:$0xff]  ;;  %s5458_s25 = sld [smem:[#allocation27_spill]] }
  0x89   :  { %868 = vmatpush.msrb.mxu1 %v463_v20  ;;  %888 = vmatpush.msrb.mxu2 %v479_v21  ;;  %v459_v39 = vld [vmem:[#allocation7 + $0xd8] sm:$0xff]  ;;  %v458_v43 = vld [vmem:[#allocation7 + $0xd0] sm:$0xff]  ;;  %v473_v48 = vld [vmem:[#allocation7 + $0x148] sm:$0xff]  ;;  %s5459_s4 = sld [smem:[#allocation22_spill]] }
  0x8a   :  { %908 = vmatpush.msrb.mxu3 %v495_v22  ;;  %849 = vmatpush.msrb.mxu0 %v446_v25  ;;  %v475_v40 = vld [vmem:[#allocation7 + $0x158] sm:$0xff]  ;;  %v474_v44 = vld [vmem:[#allocation7 + $0x150] sm:$0xff]  ;;  %v489_v49 = vld [vmem:[#allocation7 + $0x1c8] sm:$0xff]  ;;  %s5460_s15 = sld [smem:[#allocation24_spill]] }
  0x8b   :  { %869 = vmatpush.msrb.mxu1 %v462_v26  ;;  %889 = vmatpush.msrb.mxu2 %v478_v27  ;;  %v491_v41 = vld [vmem:[#allocation7 + $0x1d8] sm:$0xff]  ;;  %v490_v45 = vld [vmem:[#allocation7 + $0x1d0] sm:$0xff]  ;;  %v440_v50 = vld [vmem:[#allocation7 + $0x40] sm:$0xff]  ;;  %s5461_s20 = sld [smem:[#allocation26_spill]] }
  0x8c   :  { %909 = vmatpush.msrb.mxu3 %v494_v28  ;;  %850 = vmatpush.msrb.mxu0 %v445_v29  ;;  %v310_v51 = vld [vmem:[%s4326_s6] sm:$0xff]  ;;  %v456_v52 = vld [vmem:[#allocation7 + $0xc0] sm:$0xff]  ;;  %v437_v63 = vld [vmem:[#allocation7 + $0x28] sm:$0xff]  ;;  %s5462_s23 = sld [smem:[#allocation23_spill]] }
  0x8d   :  { %1025 = vperm.xlu0 %3965, %v254_v12   ;;  %870 = vmatpush.msrb.mxu1 %v461_v30  ;;  %v472_v53 = vld [vmem:[#allocation7 + $0x140] sm:$0xff]  ;;  %v439_v55 = vld [vmem:[#allocation7 + $0x38] sm:$0xff]  ;;  %v438_v59 = vld [vmem:[#allocation7 + $0x30] sm:$0xff]  ;;  %s5463_s26 = sld [smem:[#allocation38_spill]] }
  0x8e   :  { %890 = vmatpush.msrb.mxu2 %v477_v31  ;;  %910 = vmatpush.msrb.mxu3 %v493_v32  ;;  %v488_v54 = vld [vmem:[#allocation7 + $0x1c0] sm:$0xff]  ;;  %v455_v56 = vld [vmem:[#allocation7 + $0xb8] sm:$0xff]  ;;  %v454_v60 = vld [vmem:[#allocation7 + $0xb0] sm:$0xff]  ;;  %s5464_s24 = sld [smem:[#allocation29_spill]] }
  0x8f   :  { %851 = vmatpush.msrb.mxu0 %v444_v33  ;;  %871 = vmatpush.msrb.mxu1 %v460_v34  ;;  %v471_v57 = vld [vmem:[#allocation7 + $0x138] sm:$0xff]  ;;  %v470_v61 = vld [vmem:[#allocation7 + $0x130] sm:$0xff]  ;;  %v453_v0 = vld [vmem:[#allocation7 + $0xa8] sm:$0xff]  ;;  %s5465_s1 = sld [smem:[#allocation31_spill]] }
  0x90   :  { %891 = vmatpush.msrb.mxu2 %v476_v35  ;;  %911 = vmatpush.msrb.mxu3 %v492_v36  ;;  %v487_v58 = vld [vmem:[#allocation7 + $0x1b8] sm:$0xff]  ;;  %v486_v62 = vld [vmem:[#allocation7 + $0x1b0] sm:$0xff]  ;;  %v469_v1 = vld [vmem:[#allocation7 + $0x128] sm:$0xff]  ;;  %s5466_s2 = sld [smem:[#allocation28_spill]] }
  0x91   :  { %852 = vmatpush.msrb.mxu0 %v443_v38  ;;  %872 = vmatpush.msrb.mxu1 %v459_v39  ;;  %v485_v2 = vld [vmem:[#allocation7 + $0x1a8] sm:$0xff]  ;;  %v436_v3 = vld [vmem:[#allocation7 + $0x20] sm:$0xff]  ;;  %v435_v7 = vld [vmem:[#allocation7 + $0x18] sm:$0xff]  ;;  %s5467_s7 = sld [smem:[#allocation30_spill]] }
  0x92   :  { %892 = vmatpush.msrb.mxu2 %v475_v40  ;;  %912 = vmatpush.msrb.mxu3 %v491_v41  ;;  %v452_v4 = vld [vmem:[#allocation7 + $0xa0] sm:$0xff]  ;;  %v451_v8 = vld [vmem:[#allocation7 + $0x98] sm:$0xff]  ;;  %v434_v11 = vld [vmem:[#allocation7 + $0x10] sm:$0xff] }
  0x93   :  { %853 = vmatpush.msrb.mxu0 %v442_v42  ;;  %873 = vmatpush.msrb.mxu1 %v458_v43  ;;  %v468_v5 = vld [vmem:[#allocation7 + $0x120] sm:$0xff]  ;;  %v467_v9 = vld [vmem:[#allocation7 + $0x118] sm:$0xff]  ;;  %v450_v12 = vld [vmem:[#allocation7 + $0x90] sm:$0xff] }
  0x94   :  { %893 = vmatpush.msrb.mxu2 %v474_v44  ;;  %913 = vmatpush.msrb.mxu3 %v490_v45  ;;  %v484_v6 = vld [vmem:[#allocation7 + $0x1a0] sm:$0xff]  ;;  %v483_v10 = vld [vmem:[#allocation7 + $0x198] sm:$0xff]  ;;  %v245_v36 = vld [vmem:[%s4266_s29 + $0x18] sm:$0xff] }
  0x95   :  { %1040 = vperm.xlu0 %3965, %v257_v13   ;;  %854 = vmatpush.msrb.mxu0 %v441_v46  ;;  %v466_v13 = vld [vmem:[#allocation7 + $0x110] sm:$0xff]  ;;  %v432_v19 = vld [vmem:[#allocation7] sm:$0xff] }
  0x96   :  { %874 = vmatpush.msrb.mxu1 %v457_v47  ;;  %894 = vmatpush.msrb.mxu2 %v473_v48  ;;  %v448_v20 = vld [vmem:[#allocation7 + $0x80] sm:$0xff]  ;;  %v242_v39 = vld [vmem:[%s4266_s29] sm:$0xff] }
  0x97   :  { %914 = vmatpush.msrb.mxu3 %v489_v49  ;;  %855 = vmatpush.msrb.mxu0 %v440_v50  ;;  %v464_v21 = vld [vmem:[#allocation7 + $0x100] sm:$0xff]  ;;  %v258_v44 = vld [vmem:[%s4276_s8 + $0x20] sm:$0xff] }
  0x98   :  { %875 = vmatpush.msrb.mxu1 %v456_v52  ;;  %895 = vmatpush.msrb.mxu2 %v472_v53  ;;  %v480_v22 = vld [vmem:[#allocation7 + $0x180] sm:$0xff]  ;;  %v261_v52 = vld [vmem:[%s4276_s8 + $0x38] sm:$0xff] }
  0x99   :  { %915 = vmatpush.msrb.mxu3 %v488_v54  ;;  %856 = vmatpush.msrb.mxu0 %v439_v55  ;;  %v244_v38 = vld [vmem:[%s4266_s29 + $0x10] sm:$0xff]  ;;  %v255_v40 = vld [vmem:[%s4276_s8 + $0x8] sm:$0xff]  ;;  %v286_v55 = vld [vmem:[%s4286_s19 + $0x40] sm:$0xff] }
  0x9a   :  { %876 = vmatpush.msrb.mxu1 %v455_v56  ;;  %896 = vmatpush.msrb.mxu2 %v471_v57  ;;  %v256_v41 = vld [vmem:[%s4276_s8 + $0x10] sm:$0xff]  ;;  %v259_v46 = vld [vmem:[%s4276_s8 + $0x28] sm:$0xff]  ;;  %v289_v56 = vld [vmem:[%s4286_s19 + $0x58] sm:$0xff]  ;;  %s5449_s8 = sld [smem:[#allocation17_spill]] }
  0x9b   :  { %916 = vmatpush.msrb.mxu3 %v487_v58  ;;  %857 = vmatpush.msrb.mxu0 %v438_v59  ;;  %v280_v53 = vld [vmem:[%s4286_s19 + $0x10] sm:$0xff]  ;;  %v283_v54 = vld [vmem:[%s4286_s19 + $0x28] sm:$0xff]  ;;  %v278_v57 = vld [vmem:[%s4286_s19] sm:$0xff] }
  0x9c   :  { %877 = vmatpush.msrb.mxu1 %v454_v60  ;;  %897 = vmatpush.msrb.mxu2 %v470_v61  ;;  %v292_v58 = vld [vmem:[%s4286_s19 + $0x70] sm:$0xff]  ;;  %v281_v59 = vld [vmem:[%s4286_s19 + $0x18] sm:$0xff]  ;;  %v297_v60 = vld [vmem:[%s4296_s30 + $0x8] sm:$0xff]  ;;  %s5452_s30 = sld [smem:[#allocation19_spill]] }
  0x9d   :  { %1055 = vperm.xlu0 %3965, %v260_v14   ;;  %917 = vmatpush.msrb.mxu3 %v486_v62  ;;  %v482_v14 = vld [vmem:[#allocation7 + $0x190] sm:$0xff]  ;;  %v284_v61 = vld [vmem:[%s4286_s19 + $0x30] sm:$0xff] }
  0x9e   :  { %858 = vmatpush.msrb.mxu0 %v437_v63  ;;  %878 = vmatpush.msrb.mxu1 %v453_v0  ;;  %v304_v62 = vld [vmem:[%s5443_s5] sm:$0xff]  ;;  %v287_v63 = vld [vmem:[%s4286_s19 + $0x48] sm:$0xff] }
  0x9f   :  { %898 = vmatpush.msrb.mxu2 %v469_v1  ;;  %918 = vmatpush.msrb.mxu3 %v485_v2 }
  0xa0   :  { %859 = vmatpush.msrb.mxu0 %v436_v3  ;;  %879 = vmatpush.msrb.mxu1 %v452_v4  ;;  %v311_v3 = vld [vmem:[%s4326_s6 + $0x8] sm:$0xff]  ;;  %s5453_s6 = sld [smem:[#allocation36_spill]] }
  0xa1   :  { %899 = vmatpush.msrb.mxu2 %v468_v5  ;;  %919 = vmatpush.msrb.mxu3 %v484_v6  ;;  %v238_v5 = vld [vmem:[%s5444_s9] sm:$0xff] }
  0xa2   :  { %860 = vmatpush.msrb.mxu0 %v435_v7  ;;  %880 = vmatpush.msrb.mxu1 %v451_v8  ;;  %v290_v6 = vld [vmem:[%s4286_s19 + $0x60] sm:$0xff]  ;;  %v239_v7 = vld [vmem:[%s5444_s9 + $0x8] sm:$0xff]  ;;  %v293_v8 = vld [vmem:[%s4286_s19 + $0x78] sm:$0xff]  ;;  %s5451_s19 = sld [smem:[#allocation18_spill]] }
  0xa3   :  { %900 = vmatpush.msrb.mxu2 %v467_v9  ;;  %920 = vmatpush.msrb.mxu3 %v483_v10  ;;  %v240_v9 = vld [vmem:[%s5444_s9 + $0x10] sm:$0xff]  ;;  %v300_v10 = vld [vmem:[%s4306_s12] sm:$0xff]  ;;  %s5454_s12 = sld [smem:[#allocation37_spill]] }
  0xa4   :  { %861 = vmatpush.msrb.mxu0 %v434_v11  ;;  %881 = vmatpush.msrb.mxu1 %v450_v12  ;;  %v241_v11 = vld [vmem:[%s5444_s9 + $0x18] sm:$0xff]  ;;  %v305_v12 = vld [vmem:[%s5443_s5 + $0x8] sm:$0xff]  ;;  %s3720_s5 = sshll.u32 %s4227_s11, 4  ;;  %s3722_s9 = sshll.u32 %s4449_s22, 4  ;;  %s3721_s5 = int_to_ptr.vmem [resolvable:$true] %s3720_s5  ;;  %s3723_s9 = int_to_ptr.hbm [resolvable:$true] %s3722_s9 }
  0xa5   :  { %1185 = vperm.xlu0 %3965, %v279_v15   ;;  %901 = vmatpush.msrb.mxu2 %v466_v13  ;;  %v433_v15 = vld [vmem:[#allocation7 + $0x8] sm:$0xff] }
  0xa6   :  { %921 = vmatpush.msrb.mxu3 %v482_v14  ;;  %862 = vmatpush.msrb.mxu0 %v433_v15 }
  0xa7   :  { %975 = vperm.xlu1 %3966, %v245_v36  }
  0xa8   :  { %863 = vmatpush.msrb.mxu0 %v432_v19 }
  0xad   :  { %1200 = vperm.xlu0 %3965, %v282_v16   ;;  %v449_v16 = vld [vmem:[#allocation7 + $0x88] sm:$0xff] }
  0xae   :  { %882 = vmatpush.msrb.mxu1 %v449_v16 }
  0xaf   :  { %970 = vperm.xlu1 %3966, %v244_v38  }
  0xb0   :  { %883 = vmatpush.msrb.mxu1 %v448_v20 }
  0xb5   :  { %1215 = vperm.xlu0 %3965, %v285_v17   ;;  %v465_v17 = vld [vmem:[#allocation7 + $0x108] sm:$0xff] }
  0xb6   :  { %902 = vmatpush.msrb.mxu2 %v465_v17 }
  0xb7   :  { %1030 = vperm.xlu1 %3966, %v255_v40  }
  0xb8   :  { %903 = vmatpush.msrb.mxu2 %v464_v21 }
  0xbd   :  { %1230 = vperm.xlu0 %3965, %v288_v18   ;;  %v481_v18 = vld [vmem:[#allocation7 + $0x188] sm:$0xff] }
  0xbe   :  { %922 = vmatpush.msrb.mxu3 %v481_v18 }
  0xbf   :  { %1045 = vperm.xlu1 %3966, %v258_v44  }
  0xc0   :  { %923 = vmatpush.msrb.mxu3 %v480_v22 }
  0xc5   :  { %1245 = vperm.xlu0 %3965, %v291_v23  }
  0xc7   :  { %1060 = vperm.xlu1 %3966, %v261_v52  }
  0xcd   :  { %1503 = vperm.xlu0 %3965, %v296_v24  }
  0xcf   :  { %1190 = vperm.xlu1 %3966, %v280_v53  }
  0xd5   :  { %1655 = vperm.xlu0 %3965, %v301_v37   ;;  %v243_v37 = vld [vmem:[%s4266_s29 + $0x8] sm:$0xff]  ;;  %s5448_s29 = sld [smem:[#allocation34_spill]] }
  0xd6   :  { %965 = vperm.xlu2 %3967, %v243_v37   ;;  %v250_v37 = vld [vmem:[%s5445_s13 + $0x20] sm:$0xff] }
  0xd7   :  { %1205 = vperm.xlu1 %3966, %v283_v54  }
  0xdd   :  { %1991 = vperm.xlu0 %3965, %v310_v51   ;;  %v236_v51 = vld [vmem:[%s4251_s17] sm:$0xff]  ;;  %s5446_s17 = sld [smem:[#allocation33_spill]] }
  0xde   :  { %960 = vperm.xlu2 %3967, %v242_v39  }
  0xdf   :  { %1220 = vperm.xlu1 %3966, %v286_v55  }
  0xe3   :  { %v508_v36 = vld [vmem:[%s5446_s17 + $0x60] sm:$0xff]  ;;  %v507_v38 = vld [vmem:[%s5446_s17 + $0x58] sm:$0xff]  ;;  %v506_v39 = vld [vmem:[%s5446_s17 + $0x50] sm:$0xff] }
  0xe4   :  { %v505_v40 = vld [vmem:[%s5446_s17 + $0x48] sm:$0xff]  ;;  %v502_v44 = vld [vmem:[%s5446_s17 + $0x30] sm:$0xff]  ;;  %v496_v52 = vld [vmem:[%s5446_s17] sm:$0xff] }
  0xe6   :  { %1035 = vperm.xlu2 %3967, %v256_v41   ;;  %v504_v41 = vld [vmem:[%s5446_s17 + $0x40] sm:$0xff] }
  0xe7   :  { %1235 = vperm.xlu1 %3966, %v289_v56  }
  0xee   :  { %1050 = vperm.xlu2 %3967, %v259_v46   ;;  %v500_v46 = vld [vmem:[%s5446_s17 + $0x20] sm:$0xff] }
  0xef   :  { %v740_v23 = vpop.permute.xlu0 %739  ;;  %1250 = vperm.xlu1 %3966, %v292_v58  }
  0xf6   :  { %1180 = vperm.xlu2 %3967, %v278_v57  }
  0xf7   :  { %1508 = vperm.xlu1 %3966, %v297_v60   ;;  %v931_v0 = vpop.permute.xlu0 %930 }
  0xfe   :  { %1195 = vperm.xlu2 %3967, %v281_v59  }
  0xff   :  { %1720 = vperm.xlu1 %3966, %v304_v62   ;;  %v1026_v53 = vpop.permute.xlu0 %1025 }
 0x104   :  { %v781_v24 = vpop.f32.mrf.mxu0 }
 0x105   :  { %v782_v25 = vadd.f32 %v781_v24, %v740_v23  ;;  %v801_v26 = vpop.f32.mrf.mxu1 }
 0x106   :  { %v802_v27 = vadd.f32 %v801_v26, %v740_v23  ;;  %1210 = vperm.xlu2 %3967, %v284_v61  }
 0x107   :  { %v844_v28 = vmax.f32 %v782_v25, 0.0  ;;  %1996 = vperm.xlu1 %3966, %v311_v3  }
 0x108   :  { %v845_v29 = vmax.f32 %v802_v27, 0.0  ;;  %v821_v30 = vpop.f32.mrf.mxu2 }
 0x109   :  { %v822_v31 = vadd.f32 %v821_v30, %v740_v23  ;;  %v841_v32 = vpop.f32.mrf.mxu3  ;;  %864 = vmatmul.f32.vlgmr.msrb.gmra.mxu0 %v844_v28  ;;  %v248_v30 = vld [vmem:[%s5445_s13 + $0x10] sm:$0xff] }
 0x10a   :  { %v842_v33 = vadd.f32 %v841_v32, %v740_v23  ;;  %884 = vmatmul.f32.vlgmr.msrb.gmra.mxu1 %v845_v29  ;;  %v246_v29 = vld [vmem:[%s5445_s13] sm:$0xff]  ;;  %v249_v32 = vld [vmem:[%s5445_s13 + $0x18] sm:$0xff] }
 0x10b   :  { %v846_v34 = vmax.f32 %v822_v31, 0.0  ;;  %v247_v31 = vld [vmem:[%s5445_s13 + $0x8] sm:$0xff] }
 0x10c   :  { %v847_v35 = vmax.f32 %v842_v33, 0.0  ;;  %v511_v33 = vld [vmem:[%s5446_s17 + $0x78] sm:$0xff] }
 0x10d   :  { %904 = vmatmul.f32.vlgmr.msrb.gmra.mxu2 %v846_v34  ;;  %v510_v34 = vld [vmem:[%s5446_s17 + $0x70] sm:$0xff]  ;;  %1137 = vmatpush.msra.mxu3 %v511_v33  ;;  %v262_v33 = vld [vmem:[%s5447_s21] sm:$0xff] }
 0x10e   :  { %924 = vmatmul.f32.vlgmr.msrb.gmra.mxu3 %v847_v35  ;;  %1225 = vperm.xlu2 %3967, %v287_v63   ;;  %v509_v35 = vld [vmem:[%s5446_s17 + $0x68] sm:$0xff] }
 0x10f   :  { %1138 = vmatpush.msra.mxu3 %v510_v34  ;;  %v263_v34 = vld [vmem:[%s5447_s21 + $0x8] sm:$0xff] }
 0x111   :  { %1139 = vmatpush.msra.mxu3 %v509_v35  ;;  %v264_v35 = vld [vmem:[%s5447_s21 + $0x10] sm:$0xff] }
 0x113   :  { %1140 = vmatpush.msra.mxu3 %v508_v36  ;;  %v265_v36 = vld [vmem:[%s5447_s21 + $0x18] sm:$0xff] }
 0x115   :  { %1141 = vmatpush.msra.mxu3 %v507_v38  ;;  %v267_v38 = vld [vmem:[%s5447_s21 + $0x28] sm:$0xff] }
 0x116   :  { %1240 = vperm.xlu2 %3967, %v290_v6  }
 0x117   :  { %1142 = vmatpush.msra.mxu3 %v506_v39  ;;  %v268_v39 = vld [vmem:[%s5447_s21 + $0x30] sm:$0xff] }
 0x119   :  { %v976_v15 = vpop.permute.xlu1 %975  ;;  %1143 = vmatpush.msra.mxu3 %v505_v40  ;;  %v269_v40 = vld [vmem:[%s5447_s21 + $0x38] sm:$0xff] }
 0x11b   :  { %1144 = vmatpush.msra.mxu3 %v504_v41  ;;  %v270_v41 = vld [vmem:[%s5447_s21 + $0x40] sm:$0xff] }
 0x11e   :  { %1255 = vperm.xlu2 %3967, %v293_v8  }
 0x121   :  { %v971_v18 = vpop.permute.xlu1 %970 }
 0x126   :  { %1650 = vperm.xlu2 %3967, %v300_v10  }
 0x129   :  { %v1031_v58 = vpop.permute.xlu1 %1030 }
 0x12e   :  { %1725 = vperm.xlu2 %3967, %v305_v12  }
 0x130   :  { %v966_v17 = vpop.permute.xlu2 %965 }
 0x131   :  { %v1046_v6 = vpop.permute.xlu1 %1045 }
 0x138   :  { %v961_v24 = vpop.permute.xlu2 %960 }
 0x140   :  { %v1036_v62 = vpop.permute.xlu2 %1035 }
 0x148   :  { %v1051_v10 = vpop.permute.xlu2 %1050 }
 0x186   :  { %v865_v42 = vpop.f32.mrf.mxu0 }
 0x187   :  { %v885_v43 = vpop.f32.mrf.mxu1 }
 0x188   :  { %v886_v45 = vadd.f32 %v885_v43, %v865_v42  ;;  %v251_v42 = vld [vmem:[%s5445_s13 + $0x28] sm:$0xff]  ;;  %v503_v43 = vld [vmem:[%s5446_s17 + $0x38] sm:$0xff] }
 0x189   :  { %1145 = vmatpush.msra.mxu3 %v503_v43  ;;  %v272_v43 = vld [vmem:[%s5447_s21 + $0x50] sm:$0xff] }
 0x18b   :  { %1146 = vmatpush.msra.mxu3 %v502_v44  ;;  %v515_v44 = vld [vmem:[%s5448_s29 + $0x18] sm:$0xff] }
 0x190   :  { %v905_v47 = vpop.f32.mrf.mxu2 }
 0x191   :  { %v906_v48 = vadd.f32 %v905_v47, %v886_v45  ;;  %v925_v49 = vpop.f32.mrf.mxu3  ;;  %v501_v45 = vld [vmem:[%s5446_s17 + $0x28] sm:$0xff]  ;;  %v252_v47 = vld [vmem:[%s5445_s13 + $0x30] sm:$0xff] }
 0x192   :  { %1147 = vmatpush.msra.mxu3 %v501_v45  ;;  %v273_v45 = vld [vmem:[%s5447_s21 + $0x58] sm:$0xff] }
 0x193   :  { %v926_v50 = vadd.f32 %v925_v49, %v906_v48  ;;  %v499_v48 = vld [vmem:[%s5446_s17 + $0x18] sm:$0xff] }
 0x194   :  { %1148 = vmatpush.msra.mxu3 %v500_v46  ;;  %v253_v49 = vld [vmem:[%s5445_s13 + $0x38] sm:$0xff]  ;;  %v514_v46 = vld [vmem:[%s5448_s29 + $0x10] sm:$0xff]  ;;  %s4152_s13 = sshra.s32 %s3723_s9, 4  ;;  %s4153_s13 = int_to_ptr.hbm [resolvable:$true] %s4152_s13 }
 0x195   :  { %952 = vmatpush.msra.mxu0 %v926_v50  ;;  %v498_v50 = vld [vmem:[%s5446_s17 + $0x10] sm:$0xff]  ;;  %p4157_p2 = scmp.lt.s32.totalorder %s4153_s13, %s4449_s22 }
 0x196   :  { %3785 = vmatmul.msk.f32.vlgmr.msra.gmra.mxu0 %vm933_vm2, %v236_v51  ;;  %1149 = vmatpush.msra.mxu3 %v499_v48  ;;  %v497_v51 = vld [vmem:[%s5446_s17 + $0x8] sm:$0xff]  ;;  %s4154_s17 = scalar_lea.hbm %s4153_s13, 4 }
 0x197   :  { %v513_v48 = vld [vmem:[%s5448_s29 + $0x8] sm:$0xff]  ;;  %p4155_p1 = scmp.ne.s32.totalorder %s4153_s13, %s4154_s17 }
 0x198   :  { %1150 = vmatpush.msra.mxu3 %v498_v50  ;;  %v275_v50 = vld [vmem:[%s5447_s21 + $0x68] sm:$0xff] }
 0x19a   :  { %1151 = vmatpush.msra.mxu3 %v497_v51  ;;  %v276_v51 = vld [vmem:[%s5447_s21 + $0x70] sm:$0xff] }
 0x19c   :  { %1152 = vmatpush.msra.mxu3 %v496_v52  ;;  %v277_v52 = vld [vmem:[%s5447_s21 + $0x78] sm:$0xff] }
 0x213   :  { %v954_v1 = vpop.f32.mrf.mxu0 }
 0x214   :  { %v955_v2 = vadd.f32 %v954_v1, %v931_v0 }
 0x216   :  { %v957_v4 = vmax.f32 %v955_v2, 0.0  ;;  %v1041_v2 = vpop.permute.xlu0 %1040 }
 0x218   :  { %1005 = vmatpush.msra.mxu1 %v957_v4 }
 0x219   :  { %3786 = vmatmul.msk.f32.vlgmr.msra.gmra.mxu1 %vm933_vm2, %v238_v5 }
 0x21a   :  { %1448 = vmatpush.msrb.mxu1 %v515_v44 }
 0x21c   :  { %1449 = vmatpush.msrb.mxu1 %v514_v46 }
 0x21e   :  { %1450 = vmatpush.msrb.mxu1 %v513_v48 }
 0x221   :  { %3787 = vmatmul.msk.f32.gmra.mxu1 %vm933_vm2, %v239_v7 }
 0x229   :  { %3788 = vmatmul.msk.f32.gmra.mxu1 %vm933_vm2, %v240_v9 }
 0x231   :  { %3789 = vmatmul.msk.f32.gmra.mxu1 %vm933_vm2, %v241_v11 }
 0x296   :  { %v1007_v13 = vpop.f32.mrf.mxu1 }
 0x297   :  { %v1008_v25 = vadd.f32 %v1007_v13, %v961_v24 }
 0x299   :  { %v4537_v28 = vmax.f32 %v1008_v25, 0.0 }
 0x29e   :  { %v1010_v14 = vpop.f32.mrf.mxu1 }
 0x29f   :  { %v1011_v22 = vadd.f32 %v1010_v14, %v966_v17  ;;  %v1056_v14 = vpop.permute.xlu0 %1055 }
 0x2a1   :  { %v4533_v27 = vmax.f32 %v1011_v22, 0.0 }
 0x2a6   :  { %v1013_v16 = vpop.f32.mrf.mxu1 }
 0x2a7   :  { %v1014_v20 = vadd.f32 %v1013_v16, %v971_v18  ;;  %v1061_v18 = vpop.permute.xlu1 %1060 }
 0x2a9   :  { %v4529_v26 = vmax.f32 %v1014_v20, 0.0 }
 0x2ae   :  { %v1016_v19 = vpop.f32.mrf.mxu1 }
 0x2af   :  { %v1017_v21 = vadd.f32 %v1016_v19, %v976_v15 }
 0x2b1   :  { %v4527_v23 = vmax.f32 %v1017_v21, 0.0 }
 0x2b3   :  { %1100 = vmatpush.msrb.mxu0 %v4527_v23  ;;  %3902 = vmatpush.msra.mxu2 %v4527_v23 }
 0x2b5   :  { %1101 = vmatpush.msrb.mxu0 %v4529_v26  ;;  %3903 = vmatpush.msra.mxu2 %v4529_v26 }
 0x2b7   :  { %1102 = vmatpush.msrb.mxu0 %v4533_v27  ;;  %3904 = vmatpush.msra.mxu2 %v4533_v27 }
 0x2b9   :  { %1103 = vmatpush.msrb.mxu0 %v4537_v28  ;;  %3905 = vmatpush.msra.mxu2 %v4537_v28 }
 0x2ba   :  { %3790 = vmatmul.msk.f32.vlgmr.msrb.gmra.mxu0 %vm1063_vm3, %v246_v29  ;;  %3792 = vmatmul.msk.f32.vlgmr.msra.gmra.mxu2 %vm1063_vm3, %v248_v30 }
 0x2c2   :  { %3791 = vmatmul.msk.f32.gmra.mxu0 %vm1063_vm3, %v247_v31  ;;  %3793 = vmatmul.msk.f32.gmra.mxu2 %vm1063_vm3, %v249_v32 }
 0x2ca   :  { %3794 = vmatmul.msk.f32.gmra.mxu2 %vm1063_vm3, %v250_v37  ;;  %v266_v37 = vld [vmem:[%s5447_s21 + $0x20] sm:$0xff] }
 0x2d2   :  { %3795 = vmatmul.msk.f32.gmra.mxu2 %vm1063_vm3, %v251_v42  ;;  %v271_v42 = vld [vmem:[%s5447_s21 + $0x48] sm:$0xff] }
 0x2da   :  { %3796 = vmatmul.msk.f32.gmra.mxu2 %vm1063_vm3, %v252_v47  ;;  %v274_v47 = vld [vmem:[%s5447_s21 + $0x60] sm:$0xff]  ;;  %s4156_s21 = scalar_lea.hbm %s4449_s22, 4 }
 0x2db   :  { %p4158_p3 = scmp.lt.s32.totalorder %s4156_s21, %s4154_s17 }
 0x2dd   :  { %p4159_p4 = por %p4158_p3, %p4157_p2 }
 0x2df   :  { %p4160_p5 = pnand %p4159_p4, %p4155_p1 }
 0x2e2   :  { %3797 = vmatmul.msk.f32.gmra.mxu2 %vm1063_vm3, %v253_v49  ;;  %v512_v49 = vld [vmem:[%s5448_s29] sm:$0xff] }
 0x2e3   :  { %1451 = vmatpush.msrb.mxu1 %v512_v49 }
 0x337   :  { %v1105_v54 = vpop.f32.mrf.mxu0 }
 0x338   :  { %v1106_v55 = vadd.f32 %v1105_v54, %v1026_v53  ;;  %v1181_v53 = vpop.permute.xlu2 %1180 }
 0x33a   :  { %v1129_v56 = vmax.f32 %v1106_v55, 0.0 }
 0x33c   :  { %1153 = vmatmul.f32.vlgmr.msra.gmra.mxu3 %v1129_v56 }
 0x33d   :  { %v1111_v57 = vpop.f32.mrf.mxu2 }
 0x33e   :  { %v1112_v0 = vadd.f32 %v1111_v57, %v1036_v62  ;;  %v1186_v57 = vpop.permute.xlu0 %1185 }
 0x33f   :  { %v1108_v59 = vpop.f32.mrf.mxu0 }
 0x340   :  { %v1109_v60 = vadd.f32 %v1108_v59, %v1031_v58  ;;  %v1131_v1 = vmax.f32 %v1112_v0, 0.0 }
 0x342   :  { %v1130_v61 = vmax.f32 %v1109_v60, 0.0 }
 0x344   :  { %1156 = vmatmul.f32.gmra.mxu3 %v1130_v61  ;;  %v1191_v61 = vpop.permute.xlu1 %1190 }
 0x345   :  { %v1114_v63 = vpop.f32.mrf.mxu2 }
 0x346   :  { %v1115_v4 = vadd.f32 %v1114_v63, %v1041_v2 }
 0x348   :  { %v1132_v5 = vmax.f32 %v1115_v4, 0.0 }
 0x34c   :  { %1159 = vmatmul.f32.gmra.mxu3 %v1131_v1  ;;  %v1196_v1 = vpop.permute.xlu2 %1195 }
 0x34d   :  { %v1117_v3 = vpop.f32.mrf.mxu2 }
 0x34e   :  { %v1118_v7 = vadd.f32 %v1117_v3, %v1046_v6 }
 0x350   :  { %v1133_v9 = vmax.f32 %v1118_v7, 0.0 }
 0x354   :  { %1162 = vmatmul.f32.gmra.mxu3 %v1132_v5  ;;  %v1201_v5 = vpop.permute.xlu0 %1200 }
 0x355   :  { %v1120_v8 = vpop.f32.mrf.mxu2 }
 0x356   :  { %v1121_v11 = vadd.f32 %v1120_v8, %v1051_v10 }
 0x358   :  { %v1134_v13 = vmax.f32 %v1121_v11, 0.0 }
 0x35c   :  { %1165 = vmatmul.f32.gmra.mxu3 %v1133_v9  ;;  %v1206_v9 = vpop.permute.xlu1 %1205 }
 0x35d   :  { %v1123_v12 = vpop.f32.mrf.mxu2 }
 0x35e   :  { %v1124_v15 = vadd.f32 %v1123_v12, %v1056_v14 }
 0x360   :  { %v1135_v16 = vmax.f32 %v1124_v15, 0.0 }
 0x364   :  { %1168 = vmatmul.f32.gmra.mxu3 %v1134_v13  ;;  %v1211_v13 = vpop.permute.xlu2 %1210 }
 0x365   :  { %v1126_v17 = vpop.f32.mrf.mxu2 }
 0x366   :  { %v1127_v19 = vadd.f32 %v1126_v17, %v1061_v18  ;;  %v1216_v17 = vpop.permute.xlu0 %1215 }
 0x368   :  { %v1136_v20 = vmax.f32 %v1127_v19, 0.0 }
 0x36c   :  { %1171 = vmatmul.f32.gmra.mxu3 %v1135_v16 }
 0x374   :  { %1174 = vmatmul.f32.gmra.mxu3 %v1136_v20 }
 0x3bf   :  { %v4575_v21 = vpop.f32.mrf.mxu3 }
 0x3c7   :  { %v4577_v22 = vpop.f32.mrf.mxu3 }
 0x3cf   :  { %v4579_v24 = vpop.f32.mrf.mxu3 }
 0x3d7   :  { %v4581_v25 = vpop.f32.mrf.mxu3 }
 0x3df   :  { %v4583_v29 = vpop.f32.mrf.mxu3 }
 0x3e7   :  { %v4585_v30 = vpop.f32.mrf.mxu3 }
 0x3ef   :  { %v4587_v31 = vpop.f32.mrf.mxu3 }
 0x3f7   :  { %v4589_v32 = vpop.f32.mrf.mxu3 }
 0x3f8   :  { %1315 = vmatpush.msra.mxu0 %v4589_v32 }
 0x3fa   :  { %1316 = vmatpush.msra.mxu0 %v4587_v31 }
 0x3fc   :  { %1317 = vmatpush.msra.mxu0 %v4585_v30 }
 0x3fe   :  { %1318 = vmatpush.msra.mxu0 %v4583_v29 }
 0x400   :  { %1319 = vmatpush.msra.mxu0 %v4581_v25 }
 0x402   :  { %1320 = vmatpush.msra.mxu0 %v4579_v24 }
 0x404   :  { %1321 = vmatpush.msra.mxu0 %v4577_v22 }
 0x406   :  { %1322 = vmatpush.msra.mxu0 %v4575_v21 }
 0x407   :  { %3798 = vmatmul.msk.f32.vlgmr.msra.gmra.mxu0 %vm1258_vm4, %v262_v33  ;;  %v1221_v33 = vpop.permute.xlu1 %1220 }
 0x40f   :  { %3799 = vmatmul.msk.f32.gmra.mxu0 %vm1258_vm4, %v263_v34 }
 0x417   :  { %3800 = vmatmul.msk.f32.gmra.mxu0 %vm1258_vm4, %v264_v35 }
 0x41f   :  { %3801 = vmatmul.msk.f32.gmra.mxu0 %vm1258_vm4, %v265_v36 }
 0x427   :  { %3802 = vmatmul.msk.f32.gmra.mxu0 %vm1258_vm4, %v266_v37  ;;  %v1226_v37 = vpop.permute.xlu2 %1225 }
 0x42f   :  { %3803 = vmatmul.msk.f32.gmra.mxu0 %vm1258_vm4, %v267_v38  ;;  %v1241_v49 = vpop.permute.xlu2 %1240 }
 0x437   :  { %3804 = vmatmul.msk.f32.gmra.mxu0 %vm1258_vm4, %v268_v39 }
 0x43f   :  { %3805 = vmatmul.msk.f32.gmra.mxu0 %vm1258_vm4, %v269_v40 }
 0x447   :  { %3806 = vmatmul.msk.f32.gmra.mxu0 %vm1258_vm4, %v270_v41  ;;  %v1231_v41 = vpop.permute.xlu0 %1230 }
 0x44f   :  { %3807 = vmatmul.msk.f32.gmra.mxu0 %vm1258_vm4, %v271_v42 }
 0x457   :  { %3808 = vmatmul.msk.f32.gmra.mxu0 %vm1258_vm4, %v272_v43 }
 0x45f   :  { %3809 = vmatmul.msk.f32.gmra.mxu0 %vm1258_vm4, %v273_v45  ;;  %v1236_v45 = vpop.permute.xlu1 %1235 }
 0x467   :  { %3810 = vmatmul.msk.f32.gmra.mxu0 %vm1258_vm4, %v274_v47 }
 0x46f   :  { %3811 = vmatmul.msk.f32.gmra.mxu0 %vm1258_vm4, %v275_v50 }
 0x477   :  { %3812 = vmatmul.msk.f32.gmra.mxu0 %vm1258_vm4, %v276_v51 }
 0x47f   :  { %3813 = vmatmul.msk.f32.gmra.mxu0 %vm1258_vm4, %v277_v52 }
 0x484   :  { %v1324_v54 = vpop.f32.mrf.mxu0 }
 0x485   :  { %v1325_v55 = vadd.f32 %v1324_v54, %v1181_v53  ;;  %v1246_v53 = vpop.permute.xlu0 %1245 }
 0x487   :  { %v1372_v56 = vmax.f32 %v1325_v55, 0.0 }
 0x489   :  { %3814 = vmatmul.msk.f32.vlgmr.msrb.gmra.mxu1 %vm1063_vm3, %v1372_v56 }
 0x48c   :  { %v1327_v58 = vpop.f32.mrf.mxu0 }
 0x48d   :  { %v1328_v59 = vadd.f32 %v1327_v58, %v1186_v57  ;;  %v1251_v57 = vpop.permute.xlu1 %1250 }
 0x48f   :  { %v1373_v60 = vmax.f32 %v1328_v59, 0.0 }
 0x491   :  { %3815 = vmatmul.msk.f32.gmra.mxu1 %vm1063_vm3, %v1373_v60 }
 0x494   :  { %v1330_v62 = vpop.f32.mrf.mxu0 }
 0x495   :  { %v1331_v63 = vadd.f32 %v1330_v62, %v1191_v61  ;;  %v1256_v61 = vpop.permute.xlu2 %1255 }
 0x497   :  { %v1374_v0 = vmax.f32 %v1331_v63, 0.0 }
 0x499   :  { %3816 = vmatmul.msk.f32.gmra.mxu1 %vm1063_vm3, %v1374_v0 }
 0x49c   :  { %v1333_v2 = vpop.f32.mrf.mxu0 }
 0x49d   :  { %v1334_v3 = vadd.f32 %v1333_v2, %v1196_v1 }
 0x49f   :  { %v1375_v4 = vmax.f32 %v1334_v3, 0.0 }
 0x4a1   :  { %3817 = vmatmul.msk.f32.gmra.mxu1 %vm1063_vm3, %v1375_v4 }
 0x4a4   :  { %v1336_v6 = vpop.f32.mrf.mxu0 }
 0x4a5   :  { %v1337_v7 = vadd.f32 %v1336_v6, %v1201_v5 }
 0x4a7   :  { %v1376_v8 = vmax.f32 %v1337_v7, 0.0 }
 0x4a9   :  { %3818 = vmatmul.msk.f32.gmra.mxu1 %vm1063_vm3, %v1376_v8 }
 0x4ac   :  { %v1339_v10 = vpop.f32.mrf.mxu0 }
 0x4ad   :  { %v1340_v11 = vadd.f32 %v1339_v10, %v1206_v9 }
 0x4af   :  { %v1377_v12 = vmax.f32 %v1340_v11, 0.0 }
 0x4b1   :  { %3819 = vmatmul.msk.f32.gmra.mxu1 %vm1063_vm3, %v1377_v12 }
 0x4b4   :  { %v1342_v14 = vpop.f32.mrf.mxu0 }
 0x4b5   :  { %v1343_v15 = vadd.f32 %v1342_v14, %v1211_v13 }
 0x4b7   :  { %v1378_v16 = vmax.f32 %v1343_v15, 0.0 }
 0x4b9   :  { %3820 = vmatmul.msk.f32.gmra.mxu1 %vm1063_vm3, %v1378_v16 }
 0x4bc   :  { %v1345_v18 = vpop.f32.mrf.mxu0 }
 0x4bd   :  { %v1346_v19 = vadd.f32 %v1345_v18, %v1216_v17  ;;  %v294_v17 = vld [vmem:[%s5449_s8] sm:$0xff]  ;;  %v295_v18 = vld [vmem:[%s5449_s8 + $0x8] sm:$0xff] }
 0x4bf   :  { %v1379_v20 = vmax.f32 %v1346_v19, 0.0  ;;  %v516_v19 = vld [vmem:[%s5450_s14] sm:$0xff] }
 0x4c0   :  { %1708 = vmatpush.msrb.mxu3 %v516_v19  ;;  %v526_v19 = vld [vmem:[%s5453_s6 + $0x48] sm:$0xff] }
 0x4c1   :  { %3821 = vmatmul.msk.f32.gmra.mxu1 %vm1063_vm3, %v1379_v20  ;;  %v298_v20 = vld [vmem:[%s5451_s19] sm:$0xff] }
 0x4c4   :  { %v1348_v34 = vpop.f32.mrf.mxu0 }
 0x4c5   :  { %v1349_v35 = vadd.f32 %v1348_v34, %v1221_v33  ;;  %v299_v33 = vld [vmem:[%s5451_s19 + $0x8] sm:$0xff]  ;;  %v302_v34 = vld [vmem:[%s5452_s30] sm:$0xff] }
 0x4c7   :  { %v1380_v36 = vmax.f32 %v1349_v35, 0.0  ;;  %v303_v35 = vld [vmem:[%s5452_s30 + $0x8] sm:$0xff] }
 0x4c9   :  { %3822 = vmatmul.msk.f32.gmra.mxu1 %vm1063_vm3, %v1380_v36  ;;  %v1504_v36 = vpop.permute.xlu0 %1503 }
 0x4cc   :  { %v1351_v38 = vpop.f32.mrf.mxu0 }
 0x4cd   :  { %v1352_v39 = vadd.f32 %v1351_v38, %v1226_v37 }
 0x4cf   :  { %v1381_v40 = vmax.f32 %v1352_v39, 0.0  ;;  %v1509_v39 = vpop.permute.xlu1 %1508 }
 0x4d1   :  { %3823 = vmatmul.msk.f32.gmra.mxu1 %vm1063_vm3, %v1381_v40 }
 0x4d4   :  { %v1354_v42 = vpop.f32.mrf.mxu0 }
 0x4d5   :  { %v1355_v43 = vadd.f32 %v1354_v42, %v1231_v41  ;;  %v596_v42 = vld [vmem:[#allocation9 + $0x1f8] sm:$0xff] }
 0x4d6   :  { %1851 = vmatpush.msra.mxu1 %v596_v42  ;;  %v555_v42 = vld [vmem:[#allocation9 + $0xb0] sm:$0xff] }
 0x4d7   :  { %v1382_v44 = vmax.f32 %v1355_v43, 0.0  ;;  %v564_v43 = vld [vmem:[#allocation9 + $0xf8] sm:$0xff] }
 0x4d8   :  { %1805 = vmatpush.msrb.mxu0 %v564_v43  ;;  %v587_v43 = vld [vmem:[#allocation9 + $0x1b0] sm:$0xff] }
 0x4d9   :  { %3824 = vmatmul.msk.f32.gmra.mxu1 %vm1063_vm3, %v1382_v44  ;;  %v595_v44 = vld [vmem:[#allocation9 + $0x1f0] sm:$0xff] }
 0x4da   :  { %1852 = vmatpush.msra.mxu1 %v595_v44  ;;  %v523_v44 = vld [vmem:[%s5453_s6 + $0x30] sm:$0xff] }
 0x4dc   :  { %v1357_v46 = vpop.f32.mrf.mxu0 }
 0x4dd   :  { %v1358_v47 = vadd.f32 %v1357_v46, %v1236_v45  ;;  %v563_v45 = vld [vmem:[#allocation9 + $0xf0] sm:$0xff]  ;;  %v594_v46 = vld [vmem:[#allocation9 + $0x1e8] sm:$0xff] }
 0x4de   :  { %1806 = vmatpush.msrb.mxu0 %v563_v45  ;;  %1853 = vmatpush.msra.mxu1 %v594_v46  ;;  %v539_v45 = vld [vmem:[#allocation9 + $0x30] sm:$0xff]  ;;  %v586_v46 = vld [vmem:[#allocation9 + $0x1a8] sm:$0xff] }
 0x4df   :  { %v1383_v48 = vmax.f32 %v1358_v47, 0.0  ;;  %v562_v47 = vld [vmem:[#allocation9 + $0xe8] sm:$0xff] }
 0x4e0   :  { %1807 = vmatpush.msrb.mxu0 %v562_v47  ;;  %v554_v47 = vld [vmem:[#allocation9 + $0xa8] sm:$0xff] }
 0x4e1   :  { %3825 = vmatmul.msk.f32.gmra.mxu1 %vm1063_vm3, %v1383_v48  ;;  %v532_v48 = vld [vmem:[%s5453_s6 + $0x78] sm:$0xff] }
 0x4e2   :  { %1757 = vmatpush.msra.mxu3 %v532_v48  ;;  %v585_v48 = vld [vmem:[#allocation9 + $0x1a0] sm:$0xff] }
 0x4e4   :  { %v1360_v50 = vpop.f32.mrf.mxu0 }
 0x4e5   :  { %v1361_v51 = vadd.f32 %v1360_v50, %v1241_v49  ;;  %v548_v49 = vld [vmem:[#allocation9 + $0x78] sm:$0xff]  ;;  %v531_v50 = vld [vmem:[%s5453_s6 + $0x70] sm:$0xff] }
 0x4e6   :  { %1758 = vmatpush.msra.mxu3 %v531_v50  ;;  %v538_v50 = vld [vmem:[#allocation9 + $0x28] sm:$0xff] }
 0x4e7   :  { %v1384_v52 = vmax.f32 %v1361_v51, 0.0  ;;  %v593_v51 = vld [vmem:[#allocation9 + $0x1e0] sm:$0xff] }
 0x4e8   :  { %1854 = vmatpush.msra.mxu1 %v593_v51  ;;  %v553_v51 = vld [vmem:[#allocation9 + $0xa0] sm:$0xff] }
 0x4e9   :  { %3826 = vmatmul.msk.f32.gmra.mxu1 %vm1063_vm3, %v1384_v52  ;;  %v561_v52 = vld [vmem:[#allocation9 + $0xe0] sm:$0xff] }
 0x4ea   :  { %1808 = vmatpush.msrb.mxu0 %v561_v52  ;;  %v584_v52 = vld [vmem:[#allocation9 + $0x198] sm:$0xff] }
 0x4ec   :  { %v1363_v54 = vpop.f32.mrf.mxu0 }
 0x4ed   :  { %v1364_v55 = vadd.f32 %v1363_v54, %v1246_v53  ;;  %v547_v53 = vld [vmem:[#allocation9 + $0x70] sm:$0xff]  ;;  %v530_v54 = vld [vmem:[%s5453_s6 + $0x68] sm:$0xff] }
 0x4ee   :  { %1759 = vmatpush.msra.mxu3 %v530_v54  ;;  %v537_v54 = vld [vmem:[#allocation9 + $0x20] sm:$0xff] }
 0x4ef   :  { %v1385_v56 = vmax.f32 %v1364_v55, 0.0  ;;  %v546_v55 = vld [vmem:[#allocation9 + $0x68] sm:$0xff] }
 0x4f1   :  { %3827 = vmatmul.msk.f32.gmra.mxu1 %vm1063_vm3, %v1385_v56  ;;  %v592_v56 = vld [vmem:[#allocation9 + $0x1d8] sm:$0xff] }
 0x4f2   :  { %1855 = vmatpush.msra.mxu1 %v592_v56  ;;  %v583_v56 = vld [vmem:[#allocation9 + $0x190] sm:$0xff] }
 0x4f4   :  { %v1366_v58 = vpop.f32.mrf.mxu0 }
 0x4f5   :  { %v1367_v59 = vadd.f32 %v1366_v58, %v1251_v57  ;;  %v560_v57 = vld [vmem:[#allocation9 + $0xd8] sm:$0xff] }
 0x4f6   :  { %v529_v58 = vld [vmem:[%s5453_s6 + $0x60] sm:$0xff]  ;;  %1809 = vmatpush.msrb.mxu0 %v560_v57  ;;  %v520_v57 = vld [vmem:[%s5453_s6 + $0x18] sm:$0xff] }
 0x4f7   :  { %v1386_v60 = vmax.f32 %v1367_v59, 0.0  ;;  %v545_v59 = vld [vmem:[#allocation9 + $0x60] sm:$0xff]  ;;  %1760 = vmatpush.msra.mxu3 %v529_v58  ;;  %v536_v58 = vld [vmem:[#allocation9 + $0x18] sm:$0xff] }
 0x4f9   :  { %3828 = vmatmul.msk.f32.gmra.mxu1 %vm1063_vm3, %v1386_v60  ;;  %v591_v60 = vld [vmem:[#allocation9 + $0x1d0] sm:$0xff] }
 0x4fa   :  { %1856 = vmatpush.msra.mxu1 %v591_v60  ;;  %v582_v60 = vld [vmem:[#allocation9 + $0x188] sm:$0xff] }
 0x4fc   :  { %v1369_v62 = vpop.f32.mrf.mxu0 }
 0x4fd   :  { %v1370_v63 = vadd.f32 %v1369_v62, %v1256_v61  ;;  %v528_v61 = vld [vmem:[%s5453_s6 + $0x58] sm:$0xff]  ;;  %v544_v62 = vld [vmem:[#allocation9 + $0x58] sm:$0xff] }
 0x4fe   :  { %1761 = vmatpush.msra.mxu3 %v528_v61  ;;  %v519_v61 = vld [vmem:[%s5453_s6 + $0x10] sm:$0xff] }
 0x4ff   :  { %v1387_v0 = vmax.f32 %v1370_v63, 0.0  ;;  %v559_v63 = vld [vmem:[#allocation9 + $0xd0] sm:$0xff] }
 0x500   :  { %1810 = vmatpush.msrb.mxu0 %v559_v63  ;;  %v550_v63 = vld [vmem:[#allocation9 + $0x88] sm:$0xff] }
 0x501   :  { %3829 = vmatmul.msk.f32.gmra.mxu1 %vm1063_vm3, %v1387_v0  ;;  %v590_v0 = vld [vmem:[#allocation9 + $0x1c8] sm:$0xff] }
 0x502   :  { %1857 = vmatpush.msra.mxu1 %v590_v0  ;;  %v581_v0 = vld [vmem:[#allocation9 + $0x180] sm:$0xff] }
 0x506   :  { %v4651_v1 = vpop.f32.mrf.mxu1 }
 0x50e   :  { %v4653_v2 = vpop.f32.mrf.mxu1 }
 0x516   :  { %v4655_v3 = vpop.f32.mrf.mxu1 }
 0x51e   :  { %v4657_v4 = vpop.f32.mrf.mxu1 }
 0x526   :  { %v4659_v5 = vpop.f32.mrf.mxu1 }
 0x52e   :  { %v4661_v6 = vpop.f32.mrf.mxu1 }
 0x536   :  { %v4663_v7 = vpop.f32.mrf.mxu1 }
 0x53e   :  { %v4665_v8 = vpop.f32.mrf.mxu1 }
 0x546   :  { %v4667_v9 = vpop.f32.mrf.mxu1 }
 0x54e   :  { %v4669_v10 = vpop.f32.mrf.mxu1 }
 0x556   :  { %v4671_v11 = vpop.f32.mrf.mxu1 }
 0x55e   :  { %v4673_v12 = vpop.f32.mrf.mxu1 }
 0x566   :  { %v4675_v13 = vpop.f32.mrf.mxu1 }
 0x56e   :  { %v4677_v14 = vpop.f32.mrf.mxu1 }
 0x576   :  { %v4679_v15 = vpop.f32.mrf.mxu1 }
 0x57e   :  { %v4681_v16 = vpop.f32.mrf.mxu1 }
 0x57f   :  { %1511 = vmatpush.msrb.mxu2 %v4681_v16 }
 0x581   :  { %1512 = vmatpush.msrb.mxu2 %v4679_v15 }
 0x583   :  { %1513 = vmatpush.msrb.mxu2 %v4677_v14 }
 0x585   :  { %1514 = vmatpush.msrb.mxu2 %v4675_v13 }
 0x587   :  { %1515 = vmatpush.msrb.mxu2 %v4673_v12 }
 0x589   :  { %1516 = vmatpush.msrb.mxu2 %v4671_v11 }
 0x58b   :  { %1517 = vmatpush.msrb.mxu2 %v4669_v10 }
 0x58d   :  { %1518 = vmatpush.msrb.mxu2 %v4667_v9 }
 0x58f   :  { %1519 = vmatpush.msrb.mxu2 %v4665_v8 }
 0x591   :  { %1520 = vmatpush.msrb.mxu2 %v4663_v7 }
 0x593   :  { %1521 = vmatpush.msrb.mxu2 %v4661_v6 }
 0x595   :  { %1522 = vmatpush.msrb.mxu2 %v4659_v5 }
 0x597   :  { %1523 = vmatpush.msrb.mxu2 %v4657_v4 }
 0x599   :  { %1524 = vmatpush.msrb.mxu2 %v4655_v3 }
 0x59b   :  { %1525 = vmatpush.msrb.mxu2 %v4653_v2 }
 0x59d   :  { %1526 = vmatpush.msrb.mxu2 %v4651_v1 }
 0x59e   :  { %1527 = vmatmul.f32.vlgmr.msrb.gmra.mxu2 %v294_v17  ;;  %v527_v17 = vld [vmem:[%s5453_s6 + $0x50] sm:$0xff] }
 0x59f   :  { %1676 = vmatpush.msra.mxu2 %v4527_v23  ;;  %1762 = vmatpush.msra.mxu3 %v527_v17  ;;  %v518_v17 = vld [vmem:[%s5453_s6 + $0x8] sm:$0xff] }
 0x5a1   :  { %1677 = vmatpush.msra.mxu2 %v4529_v26  ;;  %1763 = vmatpush.msra.mxu3 %v526_v19  ;;  %v549_v19 = vld [vmem:[#allocation9 + $0x80] sm:$0xff] }
 0x5a3   :  { %1678 = vmatpush.msra.mxu2 %v4533_v27 }
 0x5a5   :  { %1679 = vmatpush.msra.mxu2 %v4537_v28 }
 0x5a6   :  { %1530 = vmatmul.f32.gmra.mxu2 %v295_v18  ;;  %v543_v18 = vld [vmem:[#allocation9 + $0x50] sm:$0xff] }
 0x5a7   :  { %1742 = vmatpush.msrb.mxu2 %v4589_v32 }
 0x5a9   :  { %1743 = vmatpush.msrb.mxu2 %v4587_v31 }
 0x5ab   :  { %1744 = vmatpush.msrb.mxu2 %v4585_v30 }
 0x5ad   :  { %1745 = vmatpush.msrb.mxu2 %v4583_v29 }
 0x5ae   :  { %3830 = vmatmul.msk.f32.vlgmr.msra.gmra.mxu2 %vm1063_vm3, %v298_v20  ;;  %v542_v20 = vld [vmem:[#allocation9 + $0x48] sm:$0xff] }
 0x5af   :  { %1746 = vmatpush.msrb.mxu2 %v4581_v25 }
 0x5b1   :  { %1747 = vmatpush.msrb.mxu2 %v4579_v24 }
 0x5b3   :  { %1748 = vmatpush.msrb.mxu2 %v4577_v22 }
 0x5b5   :  { %1749 = vmatpush.msrb.mxu2 %v4575_v21 }
 0x5b6   :  { %3831 = vmatmul.msk.f32.gmra.mxu2 %vm1063_vm3, %v299_v33  ;;  %v558_v33 = vld [vmem:[#allocation9 + $0xc8] sm:$0xff] }
 0x5b7   :  { %1782 = vmatpush.msra.mxu2 %v548_v49  ;;  %1811 = vmatpush.msrb.mxu0 %v558_v33  ;;  %v522_v49 = vld [vmem:[%s5453_s6 + $0x28] sm:$0xff]  ;;  %v517_v33 = vld [vmem:[%s5453_s6] sm:$0xff] }
 0x5b9   :  { %1783 = vmatpush.msra.mxu2 %v547_v53  ;;  %v521_v53 = vld [vmem:[%s5453_s6 + $0x20] sm:$0xff] }
 0x5bb   :  { %1784 = vmatpush.msra.mxu2 %v546_v55  ;;  %v552_v55 = vld [vmem:[#allocation9 + $0x98] sm:$0xff] }
 0x5bd   :  { %1785 = vmatpush.msra.mxu2 %v545_v59  ;;  %v551_v59 = vld [vmem:[#allocation9 + $0x90] sm:$0xff] }
 0x5be   :  { %3834 = vmatmul.msk.f32.vlgmr.msrb.gmra.mxu2 %vm1258_vm4, %v302_v34  ;;  %v589_v34 = vld [vmem:[#allocation9 + $0x1c0] sm:$0xff] }
 0x5bf   :  { %1786 = vmatpush.msra.mxu2 %v544_v62  ;;  %1858 = vmatpush.msra.mxu1 %v589_v34  ;;  %v535_v62 = vld [vmem:[#allocation9 + $0x10] sm:$0xff]  ;;  %v533_v34 = vld [vmem:[#allocation9] sm:$0xff] }
 0x5c1   :  { %1787 = vmatpush.msra.mxu2 %v543_v18  ;;  %v534_v18 = vld [vmem:[#allocation9 + $0x8] sm:$0xff] }
 0x5c3   :  { %1788 = vmatpush.msra.mxu2 %v542_v20  ;;  %v660_v20 = vld [vmem:[#allocation9 + $0x3f8] sm:$0xff] }
 0x5c6   :  { %3835 = vmatmul.msk.f32.gmra.mxu2 %vm1258_vm4, %v303_v35  ;;  %v525_v35 = vld [vmem:[%s5453_s6 + $0x40] sm:$0xff] }
 0x5c7   :  { %1764 = vmatpush.msra.mxu3 %v525_v35  ;;  %v580_v35 = vld [vmem:[#allocation9 + $0x178] sm:$0xff] }
 0x621   :  { %v1528_v37 = vpop.f32.mrf.mxu2 }
 0x622   :  { %v1529_v38 = vadd.f32 %v1528_v37, %v1504_v36  ;;  %v541_v36 = vld [vmem:[#allocation9 + $0x40] sm:$0xff] }
 0x623   :  { %v557_v37 = vld [vmem:[#allocation9 + $0xc0] sm:$0xff]  ;;  %1789 = vmatpush.msra.mxu2 %v541_v36  ;;  %v612_v36 = vld [vmem:[#allocation9 + $0x278] sm:$0xff] }
 0x624   :  { %3832 = vmatmul.msk.f32.vlgmr.msrb.gmra.mxu3 %vm933_vm2, %v1529_v38  ;;  %v556_v38 = vld [vmem:[#allocation9 + $0xb8] sm:$0xff]  ;;  %1812 = vmatpush.msrb.mxu0 %v557_v37 }
 0x625   :  { %v628_v37 = vld [vmem:[#allocation9 + $0x2f8] sm:$0xff] }
 0x626   :  { %1813 = vmatpush.msrb.mxu0 %v556_v38  ;;  %v659_v38 = vld [vmem:[#allocation9 + $0x3f0] sm:$0xff] }
 0x628   :  { %1814 = vmatpush.msrb.mxu0 %v555_v42  ;;  %v658_v42 = vld [vmem:[#allocation9 + $0x3e8] sm:$0xff] }
 0x629   :  { %v1531_v40 = vpop.f32.mrf.mxu2 }
 0x62a   :  { %v1532_v41 = vadd.f32 %v1531_v40, %v1509_v39  ;;  %v588_v39 = vld [vmem:[#allocation9 + $0x1b8] sm:$0xff]  ;;  %v524_v40 = vld [vmem:[%s5453_s6 + $0x38] sm:$0xff]  ;;  %1815 = vmatpush.msrb.mxu0 %v554_v47  ;;  %v577_v47 = vld [vmem:[#allocation9 + $0x160] sm:$0xff] }
 0x62b   :  { %1859 = vmatpush.msra.mxu1 %v588_v39  ;;  %1765 = vmatpush.msra.mxu3 %v524_v40  ;;  %v579_v39 = vld [vmem:[#allocation9 + $0x170] sm:$0xff] }
 0x62c   :  { %3833 = vmatmul.msk.f32.gmra.mxu3 %vm933_vm2, %v1532_v41  ;;  %v540_v41 = vld [vmem:[#allocation9 + $0x38] sm:$0xff]  ;;  %1816 = vmatpush.msrb.mxu0 %v553_v51  ;;  %v611_v40 = vld [vmem:[#allocation9 + $0x270] sm:$0xff] }
 0x62d   :  { %1860 = vmatpush.msra.mxu1 %v587_v43  ;;  %1790 = vmatpush.msra.mxu2 %v540_v41  ;;  %v627_v41 = vld [vmem:[#allocation9 + $0x2f0] sm:$0xff]  ;;  %v578_v43 = vld [vmem:[#allocation9 + $0x168] sm:$0xff]  ;;  %v576_v51 = vld [vmem:[#allocation9 + $0x158] sm:$0xff] }
 0x62e   :  { %1766 = vmatpush.msra.mxu3 %v523_v44  ;;  %1817 = vmatpush.msrb.mxu0 %v552_v55  ;;  %v610_v44 = vld [vmem:[#allocation9 + $0x268] sm:$0xff]  ;;  %v575_v55 = vld [vmem:[#allocation9 + $0x150] sm:$0xff] }
 0x62f   :  { %1861 = vmatpush.msra.mxu1 %v586_v46  ;;  %1791 = vmatpush.msra.mxu2 %v539_v45  ;;  %v626_v45 = vld [vmem:[#allocation9 + $0x2e8] sm:$0xff]  ;;  %v657_v46 = vld [vmem:[#allocation9 + $0x3e0] sm:$0xff] }
 0x630   :  { %1767 = vmatpush.msra.mxu3 %v522_v49  ;;  %1818 = vmatpush.msrb.mxu0 %v551_v59  ;;  %v625_v49 = vld [vmem:[#allocation9 + $0x2e0] sm:$0xff]  ;;  %v606_v59 = vld [vmem:[#allocation9 + $0x248] sm:$0xff] }
 0x631   :  { %1862 = vmatpush.msra.mxu1 %v585_v48  ;;  %1792 = vmatpush.msra.mxu2 %v538_v50  ;;  %v609_v48 = vld [vmem:[#allocation9 + $0x260] sm:$0xff]  ;;  %v656_v50 = vld [vmem:[#allocation9 + $0x3d8] sm:$0xff] }
 0x632   :  { %1768 = vmatpush.msra.mxu3 %v521_v53  ;;  %1819 = vmatpush.msrb.mxu0 %v550_v63  ;;  %v624_v53 = vld [vmem:[#allocation9 + $0x2d8] sm:$0xff] }
 0x633   :  { %1863 = vmatpush.msra.mxu1 %v584_v52  ;;  %1793 = vmatpush.msra.mxu2 %v537_v54  ;;  %v608_v52 = vld [vmem:[#allocation9 + $0x258] sm:$0xff]  ;;  %v655_v54 = vld [vmem:[#allocation9 + $0x3d0] sm:$0xff] }
 0x634   :  { %1769 = vmatpush.msra.mxu3 %v520_v57  ;;  %1820 = vmatpush.msrb.mxu0 %v549_v19  ;;  %v623_v57 = vld [vmem:[#allocation9 + $0x2d0] sm:$0xff]  ;;  %v604_v63 = vld [vmem:[#allocation9 + $0x238] sm:$0xff]  ;;  %v602_v19 = vld [vmem:[#allocation9 + $0x228] sm:$0xff] }
 0x635   :  { %1864 = vmatpush.msra.mxu1 %v583_v56  ;;  %1794 = vmatpush.msra.mxu2 %v536_v58  ;;  %v607_v56 = vld [vmem:[#allocation9 + $0x250] sm:$0xff]  ;;  %v574_v58 = vld [vmem:[#allocation9 + $0x148] sm:$0xff] }
 0x636   :  { %1770 = vmatpush.msra.mxu3 %v519_v61  ;;  %1897 = vmatpush.msra.mxu0 %v628_v37  ;;  %v605_v61 = vld [vmem:[#allocation9 + $0x240] sm:$0xff]  ;;  %v599_v37 = vld [vmem:[#allocation9 + $0x210] sm:$0xff] }
 0x637   :  { %1865 = vmatpush.msra.mxu1 %v582_v60  ;;  %1795 = vmatpush.msra.mxu2 %v535_v62  ;;  %v573_v60 = vld [vmem:[#allocation9 + $0x140] sm:$0xff]  ;;  %v572_v62 = vld [vmem:[#allocation9 + $0x138] sm:$0xff] }
 0x638   :  { %1771 = vmatpush.msra.mxu3 %v518_v17  ;;  %1898 = vmatpush.msra.mxu0 %v627_v41  ;;  %v603_v17 = vld [vmem:[#allocation9 + $0x230] sm:$0xff]  ;;  %v598_v41 = vld [vmem:[#allocation9 + $0x208] sm:$0xff] }
 0x639   :  { %1866 = vmatpush.msra.mxu1 %v581_v0  ;;  %1796 = vmatpush.msra.mxu2 %v534_v18  ;;  %v571_v0 = vld [vmem:[#allocation9 + $0x130] sm:$0xff]  ;;  %v570_v18 = vld [vmem:[#allocation9 + $0x128] sm:$0xff] }
 0x63a   :  { %1772 = vmatpush.msra.mxu3 %v517_v33  ;;  %1899 = vmatpush.msra.mxu0 %v626_v45  ;;  %v601_v33 = vld [vmem:[#allocation9 + $0x220] sm:$0xff] }
 0x63b   :  { %1943 = vmatpush.msrb.mxu1 %v660_v20  ;;  %1797 = vmatpush.msra.mxu2 %v533_v34  ;;  %v569_v20 = vld [vmem:[#allocation9 + $0x120] sm:$0xff]  ;;  %v568_v34 = vld [vmem:[#allocation9 + $0x118] sm:$0xff] }
 0x63c   :  { %1828 = vmatpush.msrb.mxu3 %v580_v35  ;;  %1900 = vmatpush.msra.mxu0 %v625_v49  ;;  %v600_v35 = vld [vmem:[#allocation9 + $0x218] sm:$0xff]  ;;  %v597_v45 = vld [vmem:[#allocation9 + $0x200] sm:$0xff]  ;;  %v651_v49 = vld [vmem:[#allocation9 + $0x3b0] sm:$0xff] }
 0x63d   :  { %1874 = vmatpush.msrb.mxu2 %v612_v36  ;;  %1944 = vmatpush.msrb.mxu1 %v659_v38  ;;  %v567_v36 = vld [vmem:[#allocation9 + $0x110] sm:$0xff]  ;;  %v622_v38 = vld [vmem:[#allocation9 + $0x2c8] sm:$0xff] }
 0x63e   :  { %1829 = vmatpush.msrb.mxu3 %v579_v39  ;;  %1901 = vmatpush.msra.mxu0 %v624_v53  ;;  %v654_v39 = vld [vmem:[#allocation9 + $0x3c8] sm:$0xff]  ;;  %v649_v53 = vld [vmem:[#allocation9 + $0x3a0] sm:$0xff] }
 0x63f   :  { %1875 = vmatpush.msrb.mxu2 %v611_v40  ;;  %1945 = vmatpush.msrb.mxu1 %v658_v42  ;;  %v566_v40 = vld [vmem:[#allocation9 + $0x108] sm:$0xff]  ;;  %v621_v42 = vld [vmem:[#allocation9 + $0x2c0] sm:$0xff] }
 0x640   :  { %1830 = vmatpush.msrb.mxu3 %v578_v43  ;;  %1902 = vmatpush.msra.mxu0 %v623_v57  ;;  %v653_v43 = vld [vmem:[#allocation9 + $0x3c0] sm:$0xff]  ;;  %v647_v57 = vld [vmem:[#allocation9 + $0x390] sm:$0xff] }
 0x641   :  { %1876 = vmatpush.msrb.mxu2 %v610_v44  ;;  %1946 = vmatpush.msrb.mxu1 %v657_v46  ;;  %v565_v44 = vld [vmem:[#allocation9 + $0x100] sm:$0xff]  ;;  %v620_v46 = vld [vmem:[#allocation9 + $0x2b8] sm:$0xff] }
 0x642   :  { %1831 = vmatpush.msrb.mxu3 %v577_v47  ;;  %1903 = vmatpush.msra.mxu0 %v622_v38  ;;  %v652_v47 = vld [vmem:[#allocation9 + $0x3b8] sm:$0xff]  ;;  %v1656_v38 = vpop.permute.xlu0 %1655 }
 0x643   :  { %1877 = vmatpush.msrb.mxu2 %v609_v48  ;;  %1947 = vmatpush.msrb.mxu1 %v656_v50  ;;  %v619_v48 = vld [vmem:[#allocation9 + $0x2b0] sm:$0xff]  ;;  %v618_v50 = vld [vmem:[#allocation9 + $0x2a8] sm:$0xff] }
 0x644   :  { %1832 = vmatpush.msrb.mxu3 %v576_v51  ;;  %1904 = vmatpush.msra.mxu0 %v621_v42  ;;  %v650_v51 = vld [vmem:[#allocation9 + $0x3a8] sm:$0xff] }
 0x645   :  { %1878 = vmatpush.msrb.mxu2 %v608_v52  ;;  %1948 = vmatpush.msrb.mxu1 %v655_v54  ;;  %v617_v52 = vld [vmem:[#allocation9 + $0x2a0] sm:$0xff]  ;;  %v616_v54 = vld [vmem:[#allocation9 + $0x298] sm:$0xff] }
 0x646   :  { %1833 = vmatpush.msrb.mxu3 %v575_v55  ;;  %1905 = vmatpush.msra.mxu0 %v620_v46  ;;  %v648_v55 = vld [vmem:[#allocation9 + $0x398] sm:$0xff]  ;;  %v639_v46 = vld [vmem:[#allocation9 + $0x350] sm:$0xff] }
 0x647   :  { %1879 = vmatpush.msrb.mxu2 %v607_v56  ;;  %1949 = vmatpush.msrb.mxu1 %v654_v39  ;;  %v615_v56 = vld [vmem:[#allocation9 + $0x290] sm:$0xff] }
 0x648   :  { %1834 = vmatpush.msrb.mxu3 %v574_v58  ;;  %1906 = vmatpush.msra.mxu0 %v619_v48  ;;  %v614_v58 = vld [vmem:[#allocation9 + $0x288] sm:$0xff] }
 0x649   :  { %1880 = vmatpush.msrb.mxu2 %v606_v59  ;;  %1950 = vmatpush.msrb.mxu1 %v653_v43  ;;  %v646_v59 = vld [vmem:[#allocation9 + $0x388] sm:$0xff] }
 0x64a   :  { %1835 = vmatpush.msrb.mxu3 %v573_v60  ;;  %1907 = vmatpush.msra.mxu0 %v618_v50  ;;  %v613_v60 = vld [vmem:[#allocation9 + $0x280] sm:$0xff]  ;;  %v638_v48 = vld [vmem:[#allocation9 + $0x348] sm:$0xff] }
 0x64b   :  { %1881 = vmatpush.msrb.mxu2 %v605_v61  ;;  %1951 = vmatpush.msrb.mxu1 %v652_v47  ;;  %v645_v61 = vld [vmem:[#allocation9 + $0x380] sm:$0xff]  ;;  %v671_v47 = vld [vmem:[#allocation9 + $0x450] sm:$0xff] }
 0x64c   :  { %1836 = vmatpush.msrb.mxu3 %v572_v62  ;;  %1908 = vmatpush.msra.mxu0 %v617_v52  ;;  %v1681_v62 = vpop.f32.mrf.mxu2  ;;  %v637_v50 = vld [vmem:[#allocation9 + $0x340] sm:$0xff]  ;;  %v636_v52 = vld [vmem:[#allocation9 + $0x338] sm:$0xff] }
 0x64d   :  { %1882 = vmatpush.msrb.mxu2 %v604_v63  ;;  %1952 = vmatpush.msrb.mxu1 %v651_v49  ;;  %v1651_v63 = vpop.permute.xlu2 %1650  ;;  %v670_v49 = vld [vmem:[#allocation9 + $0x448] sm:$0xff] }
 0x64e   :  { %1837 = vmatpush.msrb.mxu3 %v571_v0  ;;  %1909 = vmatpush.msra.mxu0 %v616_v54  ;;  %v1682_v0 = vadd.f32 %v1681_v62, %v1651_v63  ;;  %v635_v54 = vld [vmem:[#allocation9 + $0x330] sm:$0xff] }
 0x64f   :  { %1883 = vmatpush.msrb.mxu2 %v603_v17  ;;  %1953 = vmatpush.msrb.mxu1 %v650_v51  ;;  %v669_v51 = vld [vmem:[#allocation9 + $0x440] sm:$0xff]  ;;  %v631_v62 = vld [vmem:[#allocation9 + $0x310] sm:$0xff] }
 0x650   :  { %1838 = vmatpush.msrb.mxu3 %v570_v18  ;;  %1910 = vmatpush.msra.mxu0 %v615_v56  ;;  %v634_v56 = vld [vmem:[#allocation9 + $0x328] sm:$0xff]  ;;  %v663_v63 = vld [vmem:[#allocation9 + $0x410] sm:$0xff] }
 0x651   :  { %1884 = vmatpush.msrb.mxu2 %v602_v19  ;;  %1954 = vmatpush.msrb.mxu1 %v649_v53  ;;  %v644_v19 = vld [vmem:[#allocation9 + $0x378] sm:$0xff] }
 0x652   :  { %1839 = vmatpush.msrb.mxu3 %v569_v20  ;;  %1911 = vmatpush.msra.mxu0 %v614_v58  ;;  %v676_v20 = vld [vmem:[#allocation9 + $0x478] sm:$0xff]  ;;  %v633_v58 = vld [vmem:[#allocation9 + $0x320] sm:$0xff] }
 0x653   :  { %1885 = vmatpush.msrb.mxu2 %v601_v33  ;;  %1955 = vmatpush.msrb.mxu1 %v648_v55  ;;  %v643_v33 = vld [vmem:[#allocation9 + $0x370] sm:$0xff]  ;;  %v668_v53 = vld [vmem:[#allocation9 + $0x438] sm:$0xff] }
 0x654   :  { %1840 = vmatpush.msrb.mxu3 %v568_v34  ;;  %1912 = vmatpush.msra.mxu0 %v613_v60  ;;  %v675_v34 = vld [vmem:[#allocation9 + $0x470] sm:$0xff]  ;;  %v632_v60 = vld [vmem:[#allocation9 + $0x318] sm:$0xff] }
 0x655   :  { %1886 = vmatpush.msrb.mxu2 %v600_v35  ;;  %1956 = vmatpush.msrb.mxu1 %v647_v57  ;;  %v1684_v35 = vpop.f32.mrf.mxu2  ;;  %v667_v55 = vld [vmem:[#allocation9 + $0x430] sm:$0xff]  ;;  %v666_v57 = vld [vmem:[#allocation9 + $0x428] sm:$0xff] }
 0x656   :  { %1841 = vmatpush.msrb.mxu3 %v567_v36  ;;  %v642_v36 = vld [vmem:[#allocation9 + $0x368] sm:$0xff]  ;;  %v1685_v39 = vadd.f32 %v1684_v35, %v1656_v38  ;;  %v682_v38 = vld [vmem:[%s5454_s12 + $0x28] sm:$0xff] }
 0x657   :  { %1887 = vmatpush.msrb.mxu2 %v599_v37  ;;  %1957 = vmatpush.msrb.mxu1 %v646_v59  ;;  %v674_v37 = vld [vmem:[#allocation9 + $0x468] sm:$0xff]  ;;  %v665_v59 = vld [vmem:[#allocation9 + $0x420] sm:$0xff] }
 0x658   :  { %1842 = vmatpush.msrb.mxu3 %v566_v40  ;;  %v641_v40 = vld [vmem:[#allocation9 + $0x360] sm:$0xff] }
 0x659   :  { %1888 = vmatpush.msrb.mxu2 %v598_v41  ;;  %1958 = vmatpush.msrb.mxu1 %v645_v61  ;;  %v673_v41 = vld [vmem:[#allocation9 + $0x460] sm:$0xff]  ;;  %v664_v61 = vld [vmem:[#allocation9 + $0x418] sm:$0xff] }
 0x65a   :  { %1843 = vmatpush.msrb.mxu3 %v565_v44  ;;  %v640_v44 = vld [vmem:[#allocation9 + $0x358] sm:$0xff]  ;;  %v679_v35 = vld [vmem:[%s5454_s12 + $0x10] sm:$0xff] }
 0x65b   :  { %1889 = vmatpush.msrb.mxu2 %v597_v45  ;;  %v672_v45 = vld [vmem:[#allocation9 + $0x458] sm:$0xff] }
 0x6a7   :  { %v1710_v17 = vpop.f32.mrf.mxu3 }
 0x6a8   :  { %v4740_v18 = vadd.f32 %v1710_v17, %v1682_v0  ;;  %v630_v0 = vld [vmem:[#allocation9 + $0x308] sm:$0xff] }
 0x6a9   :  { %v662_v17 = vld [vmem:[#allocation9 + $0x408] sm:$0xff] }
 0x6aa   :  { %1773 = vmatmul.f32.vlgmr.msra.gmra.mxu3 %v4740_v18  ;;  %1798 = vmatmul.f32.vlgmr.msra.gmra.mxu2 %v4740_v18 }
 0x6ab   :  { %1821 = vmatmul.f32.vlgmr.msrb.gmra.mxu0 %v4740_v18  ;;  %1867 = vmatmul.f32.vlgmr.msra.gmra.mxu1 %v4740_v18 }
 0x6ac   :  { %1920 = vmatpush.msra.mxu3 %v644_v19  ;;  %1966 = vmatpush.msra.mxu2 %v676_v20  ;;  %v629_v19 = vld [vmem:[#allocation9 + $0x300] sm:$0xff] }
 0x6ad   :  { %v661_v20 = vld [vmem:[#allocation9 + $0x400] sm:$0xff] }
 0x6ae   :  { %1921 = vmatpush.msra.mxu3 %v643_v33  ;;  %1967 = vmatpush.msra.mxu2 %v675_v34  ;;  %v680_v33 = vld [vmem:[%s5454_s12 + $0x18] sm:$0xff] }
 0x6af   :  { %v1713_v42 = vpop.f32.mrf.mxu3  ;;  %v684_v34 = vld [vmem:[%s5454_s12 + $0x38] sm:$0xff]  ;;  %2070 = vmatpush.msra.mxu1 %v680_v33 }
 0x6b0   :  { %1922 = vmatpush.msra.mxu3 %v642_v36  ;;  %1968 = vmatpush.msra.mxu2 %v674_v37  ;;  %v4746_v43 = vadd.f32 %v1713_v42, %v1685_v39  ;;  %v683_v36 = vld [vmem:[%s5454_s12 + $0x30] sm:$0xff]  ;;  %v678_v37 = vld [vmem:[%s5454_s12 + $0x8] sm:$0xff]  ;;  %v681_v39 = vld [vmem:[%s5454_s12 + $0x20] sm:$0xff] }
 0x6b1   :  { %2071 = vmatpush.msra.mxu1 %v679_v35  ;;  %v695_v42 = vld [vmem:[%s5454_s12 + $0x90] sm:$0xff] }
 0x6b2   :  { %1923 = vmatpush.msra.mxu3 %v641_v40  ;;  %1969 = vmatpush.msra.mxu2 %v673_v41  ;;  %v696_v40 = vld [vmem:[%s5454_s12 + $0x98] sm:$0xff] }
 0x6b3   :  { %1776 = vmatmul.f32.gmra.mxu3 %v4746_v43  ;;  %1801 = vmatmul.f32.gmra.mxu2 %v4746_v43  ;;  %v700_v41 = vld [vmem:[%s5454_s12 + $0xb8] sm:$0xff] }
 0x6b4   :  { %1824 = vmatmul.f32.gmra.mxu0 %v4746_v43  ;;  %1870 = vmatmul.f32.gmra.mxu1 %v4746_v43 }
 0x6b5   :  { %1924 = vmatpush.msra.mxu3 %v640_v44  ;;  %1970 = vmatpush.msra.mxu2 %v672_v45  ;;  %v699_v44 = vld [vmem:[%s5454_s12 + $0xb0] sm:$0xff]  ;;  %v694_v45 = vld [vmem:[%s5454_s12 + $0x88] sm:$0xff] }
 0x6b6   :  { %2072 = vmatpush.msra.mxu1 %v678_v37 }
 0x6b7   :  { %1925 = vmatpush.msra.mxu3 %v639_v46  ;;  %1971 = vmatpush.msra.mxu2 %v671_v47  ;;  %v698_v46 = vld [vmem:[%s5454_s12 + $0xa8] sm:$0xff]  ;;  %v693_v47 = vld [vmem:[%s5454_s12 + $0x80] sm:$0xff] }
 0x6b9   :  { %1926 = vmatpush.msra.mxu3 %v638_v48  ;;  %1972 = vmatpush.msra.mxu2 %v670_v49  ;;  %v697_v48 = vld [vmem:[%s5454_s12 + $0xa0] sm:$0xff] }
 0x6bb   :  { %1927 = vmatpush.msra.mxu3 %v637_v50  ;;  %1973 = vmatpush.msra.mxu2 %v669_v51  ;;  %v1721_v51 = vpop.permute.xlu1 %1720 }
 0x6bc   :  { %1844 = vmatmul.f32.vlgmr.msrb.gmra.mxu3 %v4740_v18  ;;  %1890 = vmatmul.f32.vlgmr.msrb.gmra.mxu2 %v4740_v18 }
 0x6bd   :  { %1913 = vmatmul.f32.vlgmr.msra.gmra.mxu0 %v4740_v18  ;;  %1959 = vmatmul.f32.vlgmr.msrb.gmra.mxu1 %v4740_v18 }
 0x6be   :  { %1928 = vmatpush.msra.mxu3 %v636_v52  ;;  %1974 = vmatpush.msra.mxu2 %v668_v53 }
 0x6c0   :  { %1929 = vmatpush.msra.mxu3 %v635_v54  ;;  %1975 = vmatpush.msra.mxu2 %v667_v55 }
 0x6c2   :  { %1930 = vmatpush.msra.mxu3 %v634_v56  ;;  %1976 = vmatpush.msra.mxu2 %v666_v57  ;;  %v712_v56 = vld [vmem:[%s5454_s12 + $0x118] sm:$0xff]  ;;  %v711_v57 = vld [vmem:[%s5454_s12 + $0x110] sm:$0xff] }
 0x6c4   :  { %1931 = vmatpush.msra.mxu3 %v633_v58  ;;  %1977 = vmatpush.msra.mxu2 %v665_v59  ;;  %v710_v59 = vld [vmem:[%s5454_s12 + $0x108] sm:$0xff] }
 0x6c5   :  { %1847 = vmatmul.f32.gmra.mxu3 %v4746_v43  ;;  %1893 = vmatmul.f32.gmra.mxu2 %v4746_v43 }
 0x6c6   :  { %1916 = vmatmul.f32.gmra.mxu0 %v4746_v43  ;;  %1962 = vmatmul.f32.gmra.mxu1 %v4746_v43 }
 0x6c7   :  { %1932 = vmatpush.msra.mxu3 %v632_v60  ;;  %1978 = vmatpush.msra.mxu2 %v664_v61  ;;  %v1726_v60 = vpop.permute.xlu2 %1725  ;;  %v709_v61 = vld [vmem:[%s5454_s12 + $0x100] sm:$0xff] }
 0x6c9   :  { %1933 = vmatpush.msra.mxu3 %v631_v62  ;;  %1979 = vmatpush.msra.mxu2 %v663_v63 }
 0x6cb   :  { %1934 = vmatpush.msra.mxu3 %v630_v0  ;;  %1980 = vmatpush.msra.mxu2 %v662_v17 }
 0x6cd   :  { %1935 = vmatpush.msra.mxu3 %v629_v19  ;;  %1981 = vmatpush.msra.mxu2 %v661_v20 }
 0x6ce   :  { %1936 = vmatmul.f32.vlgmr.msra.gmra.mxu3 %v4740_v18  ;;  %1982 = vmatmul.f32.vlgmr.msra.gmra.mxu2 %v4740_v18  ;;  %v677_v18 = vld [vmem:[%s5454_s12] sm:$0xff] }
 0x6cf   :  { %2093 = vmatpush.msrb.mxu2 %v684_v34  ;;  %2073 = vmatpush.msra.mxu1 %v677_v18 }
 0x6d1   :  { %2094 = vmatpush.msrb.mxu2 %v683_v36  ;;  %2162 = vmatpush.msrb.mxu1 %v696_v40 }
 0x6d3   :  { %2095 = vmatpush.msrb.mxu2 %v682_v38  ;;  %2163 = vmatpush.msrb.mxu1 %v695_v42 }
 0x6d5   :  { %2096 = vmatpush.msrb.mxu2 %v681_v39  ;;  %2164 = vmatpush.msrb.mxu1 %v694_v45 }
 0x6d6   :  { %1939 = vmatmul.f32.gmra.mxu3 %v4746_v43  ;;  %1985 = vmatmul.f32.gmra.mxu2 %v4746_v43  ;;  %v1751_v43 = vpop.f32.mrf.mxu2 }
 0x6d7   :  { %2185 = vmatpush.msra.mxu2 %v700_v41  ;;  %2165 = vmatpush.msrb.mxu1 %v693_v47  ;;  %v1752_v52 = vadd.f32 %v1751_v43, %v1721_v51  ;;  %v307_v43 = vld [vmem:[%s5455_s10 + $0x8] sm:$0xff]  ;;  %v704_v51 = vld [vmem:[%s5454_s12 + $0xd8] sm:$0xff] }
 0x6d8   :  { %v686_v47 = vld [vmem:[%s5454_s12 + $0x48] sm:$0xff] }
 0x6d9   :  { %2186 = vmatpush.msra.mxu2 %v699_v44  ;;  %v688_v44 = vld [vmem:[%s5454_s12 + $0x58] sm:$0xff] }
 0x6db   :  { %2187 = vmatpush.msra.mxu2 %v698_v46  ;;  %v687_v46 = vld [vmem:[%s5454_s12 + $0x50] sm:$0xff] }
 0x6dd   :  { %2188 = vmatpush.msra.mxu2 %v697_v48  ;;  %v685_v48 = vld [vmem:[%s5454_s12 + $0x40] sm:$0xff] }
 0x6de   :  { %v1754_v49 = vpop.f32.mrf.mxu2 }
 0x6df   :  { %v1755_v62 = vadd.f32 %v1754_v49, %v1726_v60  ;;  %v309_v49 = vld [vmem:[%s5455_s10 + $0x18] sm:$0xff]  ;;  %v689_v60 = vld [vmem:[%s5454_s12 + $0x60] sm:$0xff] }
 0x728   :  { %v4780_v50 = vpop.f32.mrf.mxu1  ;;  %v1822_v20 = vpop.f32.mrf.mxu0 }
 0x72d   :  { %v1774_v53 = vpop.f32.mrf.mxu3  ;;  %v4782_v54 = vpop.f32.mrf.mxu2 }
 0x72e   :  { %v4784_v55 = vadd.f32 %v1774_v53, %v1752_v52  ;;  %v703_v52 = vld [vmem:[%s5454_s12 + $0xd0] sm:$0xff]  ;;  %v702_v53 = vld [vmem:[%s5454_s12 + $0xc8] sm:$0xff] }
 0x730   :  { %3838 = vmatmul.msk.f32.vlgmr.msra.gmra.mxu1 %vm1063_vm3, %v4784_v55  ;;  %3840 = vmatmul.msk.f32.vlgmr.msrb.gmra.mxu2 %vm1063_vm3, %v4784_v55 }
 0x731   :  { %v1871_v58 = vpop.f32.mrf.mxu1  ;;  %2254 = vmatpush.msra.mxu1 %v712_v56  ;;  %v1825_v38 = vpop.f32.mrf.mxu0  ;;  %v701_v56 = vld [vmem:[%s5454_s12 + $0xc0] sm:$0xff] }
 0x733   :  { %2255 = vmatpush.msra.mxu1 %v711_v57  ;;  %v306_v57 = vld [vmem:[%s5455_s10] sm:$0xff] }
 0x735   :  { %2256 = vmatpush.msra.mxu1 %v710_v59  ;;  %v690_v59 = vld [vmem:[%s5454_s12 + $0x68] sm:$0xff] }
 0x736   :  { %v1777_v63 = vpop.f32.mrf.mxu3  ;;  %v1802_v0 = vpop.f32.mrf.mxu2 }
 0x737   :  { %v4794_v17 = vadd.f32 %v1777_v63, %v1755_v62  ;;  %2257 = vmatpush.msra.mxu1 %v709_v61  ;;  %v308_v61 = vld [vmem:[%s5455_s10 + $0x10] sm:$0xff]  ;;  %v708_v62 = vld [vmem:[%s5454_s12 + $0xf8] sm:$0xff]  ;;  %v706_v63 = vld [vmem:[%s5454_s12 + $0xe8] sm:$0xff] }
 0x739   :  { %3839 = vmatmul.msk.f32.gmra.mxu1 %vm1063_vm3, %v4794_v17  ;;  %3841 = vmatmul.msk.f32.gmra.mxu2 %vm1063_vm3, %v4794_v17 }
 0x73a   :  { %v1960_v19 = vpop.f32.mrf.mxu1  ;;  %v1914_v40 = vpop.f32.mrf.mxu0 }
 0x73f   :  { %v1845_v33 = vpop.f32.mrf.mxu3  ;;  %v1891_v34 = vpop.f32.mrf.mxu2 }
 0x741   :  { %3846 = vmatmul.msk.f32.vlgmr.msrb.gmra.mxu1 %vm1063_vm3, %v4784_v55  ;;  %3848 = vmatmul.msk.f32.vlgmr.msra.gmra.mxu2 %vm1063_vm3, %v4784_v55 }
 0x743   :  { %v1963_v35 = vpop.f32.mrf.mxu1  ;;  %v1917_v45 = vpop.f32.mrf.mxu0 }
 0x744   :  { %2006 = vmatpush.msrb.mxu0 %v1963_v35  ;;  %v727_v35 = vld [vmem:[%s5456_s3 + $0x68] sm:$0xff] }
 0x746   :  { %2007 = vmatpush.msrb.mxu0 %v1960_v19 }
 0x748   :  { %v1848_v36 = vpop.f32.mrf.mxu3  ;;  %v1894_v37 = vpop.f32.mrf.mxu2 }
 0x749   :  { %3847 = vmatmul.msk.f32.gmra.mxu1 %vm1063_vm3, %v4794_v17  ;;  %3849 = vmatmul.msk.f32.gmra.mxu2 %vm1063_vm3, %v4794_v17 }
 0x751   :  { %v1937_v18 = vpop.f32.mrf.mxu3  ;;  %v1983_v39 = vpop.f32.mrf.mxu2  ;;  %3854 = vmatmul.msk.f32.vlgmr.msra.gmra.mxu1 %vm1063_vm3, %v4784_v55 }
 0x759   :  { %v1940_v41 = vpop.f32.mrf.mxu3  ;;  %v1986_v42 = vpop.f32.mrf.mxu2  ;;  %3855 = vmatmul.msk.f32.gmra.mxu1 %vm1063_vm3, %v4794_v17 }
 0x75a   :  { %2008 = vmatpush.msrb.mxu0 %v1940_v41  ;;  %2043 = vmatpush.msrb.mxu3 %v1986_v42  ;;  %v720_v41 = vld [vmem:[%s5456_s3 + $0x30] sm:$0xff]  ;;  %v719_v42 = vld [vmem:[%s5456_s3 + $0x28] sm:$0xff] }
 0x75c   :  { %2009 = vmatpush.msrb.mxu0 %v1937_v18  ;;  %2044 = vmatpush.msrb.mxu3 %v1983_v39  ;;  %v722_v18 = vld [vmem:[%s5456_s3 + $0x40] sm:$0xff] }
 0x75d   :  { %3836 = vmatmul.msk.f32.vlgmr.msrb.gmra.mxu3 %vm1999_vm5, %v307_v43  ;;  %v718_v43 = vld [vmem:[%s5456_s3 + $0x20] sm:$0xff] }
 0x75e   :  { %2010 = vmatpush.msrb.mxu0 %v1917_v45  ;;  %2116 = vmatpush.msra.mxu3 %v688_v44  ;;  %v717_v45 = vld [vmem:[%s5456_s3 + $0x18] sm:$0xff] }
 0x760   :  { %2011 = vmatpush.msrb.mxu0 %v1914_v40  ;;  %2117 = vmatpush.msra.mxu3 %v687_v46  ;;  %v721_v40 = vld [vmem:[%s5456_s3 + $0x38] sm:$0xff]  ;;  %v716_v46 = vld [vmem:[%s5456_s3 + $0x10] sm:$0xff] }
 0x762   :  { %2012 = vmatpush.msrb.mxu0 %v1894_v37  ;;  %2118 = vmatpush.msra.mxu3 %v686_v47  ;;  %v724_v37 = vld [vmem:[%s5456_s3 + $0x50] sm:$0xff]  ;;  %v715_v47 = vld [vmem:[%s5456_s3 + $0x8] sm:$0xff] }
 0x764   :  { %2013 = vmatpush.msrb.mxu0 %v1891_v34  ;;  %2119 = vmatpush.msra.mxu3 %v685_v48  ;;  %v728_v34 = vld [vmem:[%s5456_s3 + $0x70] sm:$0xff]  ;;  %v714_v48 = vld [vmem:[%s5456_s3] sm:$0xff] }
 0x765   :  { %3837 = vmatmul.msk.f32.gmra.mxu3 %vm1999_vm5, %v309_v49 }
 0x766   :  { %2014 = vmatpush.msrb.mxu0 %v1871_v58  ;;  %2208 = vmatpush.msrb.mxu3 %v704_v51  ;;  %v691_v58 = vld [vmem:[%s5454_s12 + $0x70] sm:$0xff] }
 0x768   :  { %2015 = vmatpush.msrb.mxu0 %v4780_v50  ;;  %2209 = vmatpush.msrb.mxu3 %v703_v52  ;;  %v692_v50 = vld [vmem:[%s5454_s12 + $0x78] sm:$0xff]  ;;  %v1992_v52 = vpop.permute.xlu0 %1991 }
 0x76a   :  { %2016 = vmatpush.msrb.mxu0 %v1848_v36  ;;  %2210 = vmatpush.msrb.mxu3 %v702_v53  ;;  %v726_v36 = vld [vmem:[%s5456_s3 + $0x60] sm:$0xff] }
 0x76c   :  { %2017 = vmatpush.msrb.mxu0 %v1845_v33  ;;  %2211 = vmatpush.msrb.mxu3 %v701_v56 }
 0x76d   :  { %3842 = vmatmul.msk.f32.vlgmr.msra.gmra.mxu3 %vm1063_vm3, %v4784_v55 }
 0x76e   :  { %2018 = vmatpush.msrb.mxu0 %v1825_v38  ;;  %v723_v38 = vld [vmem:[%s5456_s3 + $0x48] sm:$0xff] }
 0x770   :  { %2019 = vmatpush.msrb.mxu0 %v1822_v20  ;;  %v729_v20 = vld [vmem:[%s5456_s3 + $0x78] sm:$0xff] }
 0x772   :  { %2020 = vmatpush.msrb.mxu0 %v1802_v0  ;;  %v705_v0 = vld [vmem:[%s5454_s12 + $0xe0] sm:$0xff] }
 0x774   :  { %2021 = vmatpush.msrb.mxu0 %v4782_v54  ;;  %v707_v54 = vld [vmem:[%s5454_s12 + $0xf0] sm:$0xff] }
 0x775   :  { %2022 = vmatmul.f32.vlgmr.msrb.gmra.mxu0 %v306_v57  ;;  %3843 = vmatmul.msk.f32.gmra.mxu3 %vm1063_vm3, %v4794_v17 }
 0x776   :  { %2139 = vmatpush.msra.mxu0 %v692_v50 }
 0x778   :  { %2140 = vmatpush.msra.mxu0 %v691_v58 }
 0x77a   :  { %2141 = vmatpush.msra.mxu0 %v690_v59  ;;  %v1997_v59 = vpop.permute.xlu1 %1996 }
 0x77c   :  { %2142 = vmatpush.msra.mxu0 %v689_v60 }
 0x77d   :  { %2025 = vmatmul.f32.gmra.mxu0 %v308_v61  ;;  %3850 = vmatmul.msk.f32.vlgmr.msrb.gmra.mxu3 %vm1063_vm3, %v4784_v55 }
 0x77e   :  { %2231 = vmatpush.msrb.mxu0 %v708_v62 }
 0x780   :  { %2232 = vmatpush.msrb.mxu0 %v707_v54 }
 0x782   :  { %2233 = vmatpush.msrb.mxu0 %v706_v63 }
 0x784   :  { %2234 = vmatpush.msrb.mxu0 %v705_v0 }
 0x785   :  { %3844 = vmatmul.msk.f32.vlgmr.msra.gmra.mxu0 %vm1063_vm3, %v4784_v55  ;;  %3851 = vmatmul.msk.f32.gmra.mxu3 %vm1063_vm3, %v4794_v17 }
 0x786   :  { %2327 = vmatpush.msra.mxu0 %v729_v20 }
 0x788   :  { %2328 = vmatpush.msra.mxu0 %v728_v34 }
 0x78a   :  { %2329 = vmatpush.msra.mxu0 %v727_v35 }
 0x78c   :  { %2330 = vmatpush.msra.mxu0 %v726_v36 }
 0x78d   :  { %3845 = vmatmul.msk.f32.gmra.mxu0 %vm1063_vm3, %v4794_v17 }
 0x795   :  { %3852 = vmatmul.msk.f32.vlgmr.msrb.gmra.mxu0 %vm1063_vm3, %v4784_v55 }
 0x79d   :  { %3853 = vmatmul.msk.f32.gmra.mxu0 %vm1063_vm3, %v4794_v17  ;;  %v725_v17 = vld [vmem:[%s5456_s3 + $0x58] sm:$0xff] }
 0x79e   :  { %2331 = vmatpush.msra.mxu0 %v725_v17 }
 0x7a0   :  { %2332 = vmatpush.msra.mxu0 %v724_v37 }
 0x7a2   :  { %2333 = vmatpush.msra.mxu0 %v723_v38 }
 0x7a4   :  { %2334 = vmatpush.msra.mxu0 %v722_v18 }
 0x7a6   :  { %2335 = vmatpush.msra.mxu0 %v721_v40  ;;  %v320_v40 = vld [vmem:[%s5457_s0] sm:$0xff] }
 0x7a8   :  { %2336 = vmatpush.msra.mxu0 %v720_v41  ;;  %v321_v41 = vld [vmem:[%s5457_s0 + $0x8] sm:$0xff] }
 0x7aa   :  { %2337 = vmatpush.msra.mxu0 %v719_v42 }
 0x7ac   :  { %2338 = vmatpush.msra.mxu0 %v718_v43 }
 0x7ad   :  { %v4852_v19 = vpop.f32.mrf.mxu1 }
 0x7ae   :  { %2339 = vmatpush.msra.mxu0 %v717_v45 }
 0x7b0   :  { %2340 = vmatpush.msra.mxu0 %v716_v46  ;;  %v326_v46 = vld [vmem:[%s5458_s25] sm:$0xff] }
 0x7b2   :  { %2341 = vmatpush.msra.mxu0 %v715_v47 }
 0x7b3   :  { %v2098_v36 = vpop.f32.mrf.mxu2 }
 0x7b4   :  { %2342 = vmatpush.msra.mxu0 %v714_v48 }
 0x7b6   :  { %v4855_v33 = vpop.f32.mrf.mxu1 }
 0x7bc   :  { %v2101_v18 = vpop.f32.mrf.mxu2 }
 0x7be   :  { %v4860_v55 = vpop.f32.mrf.mxu1 }
 0x7c4   :  { %v2190_v45 = vpop.f32.mrf.mxu2 }
 0x7c6   :  { %v4866_v39 = vpop.f32.mrf.mxu1 }
 0x7ce   :  { %v2259_v44 = vpop.f32.mrf.mxu1 }
 0x7d6   :  { %v2262_v49 = vpop.f32.mrf.mxu1 }
 0x7d7   :  { %2318 = vmatpush.msra.mxu3 %v2262_v49  ;;  %v329_v49 = vld [vmem:[%s5458_s25 + $0x18] sm:$0xff] }
 0x7d9   :  { %2319 = vmatpush.msra.mxu3 %v2259_v44  ;;  %v328_v44 = vld [vmem:[%s5458_s25 + $0x10] sm:$0xff] }
 0x7e0   :  { %v2046_v51 = vpop.f32.mrf.mxu3 }
 0x7e8   :  { %v2049_v50 = vpop.f32.mrf.mxu3 }
 0x7f0   :  { %v2121_v34 = vpop.f32.mrf.mxu3 }
 0x7f2   :  { %v2023_v53 = vpop.f32.mrf.mxu0 }
 0x7f3   :  { %v2024_v56 = vadd.f32 %v2023_v53, %v1992_v52 }
 0x7f5   :  { %v2047_v57 = vadd.f32 %v2046_v51, %v2024_v56  ;;  %v2193_v51 = vpop.f32.mrf.mxu2 }
 0x7f7   :  { %2343 = vmatmul.f32.vlgmr.msra.gmra.mxu0 %v2047_v57  ;;  %v2350_v58 = vsel %vm1258_vm4, %v2047_v57, -inf  ;;  %v2357_v17 = vsel %vm2356_vm6, %v2047_v57, -inf }
 0x7f8   :  { %2351 = vmax.xlane.f32.xlu1 %v2350_v58  ;;  %v2124_v37 = vpop.f32.mrf.mxu3  ;;  %v327_v58 = vld [vmem:[%s5458_s25 + $0x8] sm:$0xff] }
 0x7fa   :  { %v2026_v60 = vpop.f32.mrf.mxu0 }
 0x7fb   :  { %v2027_v61 = vadd.f32 %v2026_v60, %v1997_v59 }
 0x7fd   :  { %v2050_v62 = vadd.f32 %v2049_v50, %v2027_v61 }
 0x7ff   :  { %v4877_v54 = vadd.f32 %v2050_v62, %v2047_v57  ;;  %v4879_v63 = vmax.f32 %v2047_v57, %v2050_v62  ;;  %2346 = vmatmul.f32.gmra.mxu0 %v2050_v62  ;;  %v2360_v0 = vsel %vm2356_vm6, %v2050_v62, -inf  ;;  %v2353_v20 = vsel %vm1258_vm4, %v2050_v62, -inf }
 0x800   :  { %2361 = vmax.xlane.f32.xlu0 %v2360_v0  ;;  %2354 = vmax.xlane.f32.xlu2 %v2353_v20  ;;  %v2213_v43 = vpop.f32.mrf.mxu3  ;;  %v318_v20 = vld [vmem:[%s5460_s15] sm:$0xff] }
 0x802   :  { %v2144_v35 = vpop.f32.mrf.mxu0 }
 0x808   :  { %2358 = vmax.xlane.f32.xlu2 %v2357_v17  ;;  %v2216_v48 = vpop.f32.mrf.mxu3 }
 0x80a   :  { %v2147_v38 = vpop.f32.mrf.mxu0 }
 0x811   :  { %2378 = vperm.xlu1 %3966, %v320_v40  }
 0x812   :  { %v2236_v42 = vpop.f32.mrf.mxu0 }
 0x814   :  { %2383 = vperm.xlu0 %3965, %v321_v41  }
 0x819   :  { %2429 = vperm.xlu1 %3966, %v328_v44   ;;  %v322_v44 = vld [vmem:[%s5461_s20] sm:$0xff] }
 0x81a   :  { %v2239_v47 = vpop.f32.mrf.mxu0 }
 0x81b   :  { %2281 = vmatpush.msrb.mxu2 %v2239_v47  ;;  %v325_v47 = vld [vmem:[%s5461_s20 + $0x18] sm:$0xff] }
 0x81c   :  { %2419 = vperm.xlu0 %3965, %v326_v46   ;;  %v324_v46 = vld [vmem:[%s5461_s20 + $0x10] sm:$0xff] }
 0x81d   :  { %2282 = vmatpush.msrb.mxu2 %v2236_v42 }
 0x81f   :  { %2283 = vmatpush.msrb.mxu2 %v2216_v48  ;;  %v312_v48 = vld [vmem:[%s5459_s4] sm:$0xff] }
 0x821   :  { %2284 = vmatpush.msrb.mxu2 %v2213_v43 }
 0x823   :  { %2285 = vmatpush.msrb.mxu2 %v2193_v51 }
 0x824   :  { %2434 = vperm.xlu0 %3965, %v329_v49   ;;  %v314_v49 = vld [vmem:[%s5459_s4 + $0x10] sm:$0xff] }
 0x825   :  { %2286 = vmatpush.msrb.mxu2 %v2190_v45  ;;  %v323_v45 = vld [vmem:[%s5461_s20 + $0x8] sm:$0xff] }
 0x827   :  { %2287 = vmatpush.msrb.mxu2 %v4866_v39 }
 0x829   :  { %2288 = vmatpush.msrb.mxu2 %v4860_v55 }
 0x82b   :  { %2289 = vmatpush.msrb.mxu2 %v2147_v38 }
 0x82d   :  { %2290 = vmatpush.msrb.mxu2 %v2144_v35  ;;  %v319_v35 = vld [vmem:[%s5460_s15 + $0x8] sm:$0xff] }
 0x82f   :  { %2291 = vmatpush.msrb.mxu2 %v2124_v37 }
 0x831   :  { %2292 = vmatpush.msrb.mxu2 %v2121_v34 }
 0x833   :  { %2293 = vmatpush.msrb.mxu2 %v2101_v18 }
 0x835   :  { %2294 = vmatpush.msrb.mxu2 %v2098_v36  ;;  %v315_v36 = vld [vmem:[%s5459_s4 + $0x18] sm:$0xff] }
 0x837   :  { %2295 = vmatpush.msrb.mxu2 %v4855_v33  ;;  %v313_v33 = vld [vmem:[%s5459_s4 + $0x8] sm:$0xff] }
 0x838   :  { %3856 = vmatmul.msk.f32.vlgmr.msra.gmra.mxu3 %vm1999_vm5, %v313_v33 }
 0x839   :  { %2296 = vmatpush.msrb.mxu2 %v4852_v19 }
 0x83a   :  { %2297 = vmatmul.f32.vlgmr.msrb.gmra.mxu2 %v312_v48 }
 0x840   :  { %3857 = vmatmul.msk.f32.gmra.mxu3 %vm1999_vm5, %v315_v36 }
 0x842   :  { %2300 = vmatmul.f32.gmra.mxu2 %v314_v49 }
 0x86b   :  { %v2352_v56 = vpop.xlane.xlu1 %2351 }
 0x873   :  { %v2355_v52 = vpop.xlane.xlu2 %2354  ;;  %v2362_v53 = vpop.xlane.xlu0 %2361 }
 0x874   :  { %v2364_v39 = vsel %vm1631_vm7, %v2355_v52, %v2362_v53  ;;  %v2344_v19 = vpop.f32.mrf.mxu0 }
 0x87b   :  { %v2359_v57 = vpop.xlane.xlu2 %2358 }
 0x87c   :  { %v2363_v55 = vsel %vm1631_vm7, %v2352_v56, %v2359_v57  ;;  %v2347_v62 = vpop.f32.mrf.mxu0 }
 0x87d   :  { %v3968_v50 = vpack.i.bf16 %v2363_v55, %v2364_v39 }
 0x87f   :  { %3969 = vrot.lane.b32.xlu2 %v3968_v50, %s4220_s18 }
 0x883   :  { %v2379_v37 = vpop.permute.xlu1 %2378 }
 0x886   :  { %v2384_v38 = vpop.permute.xlu0 %2383 }
 0x887   :  { %2424 = vperm.xlu2 %3967, %v327_v58  }
 0x88b   :  { %v2430_v58 = vpop.permute.xlu1 %2429 }
 0x88e   :  { %v2420_v53 = vpop.permute.xlu0 %2419 }
 0x8bb   :  { %v4915_v51 = vpop.f32.mrf.mxu3 }
 0x8c3   :  { %v4917_v52 = vpop.f32.mrf.mxu3 }
 0x8d9   :  { %v3970_v59 = vpop.permute.xlu2 %3969 }
 0x8da   :  { %v3972_v60 = vunpack.i.h.bf16 %v3970_v59  ;;  %v3971_v61 = vunpack.i.l.bf16 %v3970_v59 }
 0x8dc   :  { %v2375_v0 = vsel %vm2373_vm8, %v2347_v62, %v3971_v61  ;;  %v2374_v34 = vsel %vm2373_vm8, %v2344_v19, %v3972_v60  ;;  %v316_v19 = vld [vmem:[%s5462_s23] sm:$0xff]  ;;  %v2435_v60 = vpop.permute.xlu0 %2434  ;;  %v317_v62 = vld [vmem:[%s5462_s23 + $0x8] sm:$0xff] }
 0x8dd   :  { %2406 = vmatpush.msrb.mxu1 %v2375_v0 }
 0x8df   :  { %2407 = vmatpush.msrb.mxu1 %v2374_v34 }
 0x8e0   :  { %3858 = vmatmul.msk.f32.vlgmr.msrb.gmra.mxu1 %vm1999_vm5, %v318_v20  ;;  %v713_v20 = vld [vmem:[%s5463_s26] sm:$0x3] }
 0x8e1   :  { %v2425_v39 = vpop.permute.xlu2 %2424  ;;  %3864 = vmatpush.msk.msra.mxu1 %vm2586_vm9, %v713_v20 }
 0x8e8   :  { %3859 = vmatmul.msk.f32.gmra.mxu1 %vm1999_vm5, %v319_v35 }
 0x95d   :  { %v2409_v17 = vpop.f32.mrf.mxu1 }
 0x95e   :  { %v2410_v40 = vadd.f32 %v2409_v17, %v2379_v37 }
 0x960   :  { %v2415_v43 = vmax.f32 %v2410_v40, 0.0 }
 0x965   :  { %v2412_v18 = vpop.f32.mrf.mxu1 }
 0x966   :  { %v2413_v41 = vadd.f32 %v2412_v18, %v2384_v38 }
 0x968   :  { %v2416_v42 = vmax.f32 %v2413_v41, 0.0 }
 0x96a   :  { %2463 = vmatpush.msrb.mxu3 %v2416_v42 }
 0x96c   :  { %2464 = vmatpush.msrb.mxu3 %v2415_v43 }
 0x96d   :  { %3860 = vmatmul.msk.f32.vlgmr.msrb.gmra.mxu3 %vm1999_vm5, %v322_v44 }
 0x975   :  { %3861 = vmatmul.msk.f32.gmra.mxu3 %vm1999_vm5, %v323_v45 }
 0x97d   :  { %3862 = vmatmul.msk.f32.gmra.mxu3 %vm1999_vm5, %v324_v46 }
 0x985   :  { %3863 = vmatmul.msk.f32.gmra.mxu3 %vm1999_vm5, %v325_v47 }
 0x9f0   :  { %v2466_v56 = vpop.f32.mrf.mxu3 }
 0x9f1   :  { %v2467_v57 = vadd.f32 %v2466_v56, %v2420_v53 }
 0x9f3   :  { %2482 = vrot.lane.b32.xlu2 %v2467_v57, %s4221_s28 }
 0x9f8   :  { %v2469_v55 = vpop.f32.mrf.mxu3 }
 0x9f9   :  { %v2470_v50 = vadd.f32 %v2469_v55, %v2425_v39 }
 0x9fb   :  { %2484 = vrot.lane.b32.xlu1 %v2470_v50, %s4221_s28 }
 0xa00   :  { %v2472_v33 = vpop.f32.mrf.mxu3 }
 0xa01   :  { %v2473_v59 = vadd.f32 %v2472_v33, %v2430_v58  ;;  %v2298_v33 = vpop.f32.mrf.mxu2 }
 0xa03   :  { %2486 = vrot.lane.b32.xlu0 %v2473_v59, %s4221_s28  ;;  %2267 = vperm.xlu1 %3966, %v316_v19  }
 0xa08   :  { %v2475_v61 = vpop.f32.mrf.mxu3 }
 0xa09   :  { %v2476_v0 = vadd.f32 %v2475_v61, %v2435_v60 }
 0xa0b   :  { %2272 = vperm.xlu0 %3965, %v317_v62   ;;  %2488 = vrot.lane.b32.xlu2 %v2476_v0, %s4221_s28 }
 0xa4d   :  { %v2483_v34 = vpop.permute.xlu2 %2482 }
 0xa4e   :  { %v2494_v35 = vadd.f32 %v2483_v34, %v2467_v57 }
 0xa50   :  { %v2498_v36 = vsub.f32 0.0, %v2494_v35 }
 0xa52   :  { %v2502_v17 = vmul.f32 1.442695, %v2498_v36 }
 0xa54   :  { %3978 = vpow2.f32 %v2502_v17 }
 0xa5a   :  { %v3979_v37 = vpop.eup %3978 }
 0xa5b   :  { %v2510_v38 = vadd.f32 1.0, %v3979_v37 }
 0xa5d   :  { %3980 = vrcp.f32 %v2510_v38  ;;  %v2525_v44 = vand.u32 2147483648, %v2510_v38  ;;  %v2523_v46 = vand.u32 2147483647, %v2510_v38  ;;  %vm2519_vm11 = vweird.f32 %v2510_v38 }
 0xa5f   :  { %v2526_v49 = vor.u32 1.1754944e-38, %v2525_v44  ;;  %vm2524_vm13 = vcmp.eq.f32.partialorder %v2523_v46, 8.507059e+37 }
 0xa63   :  { %v3981_v18 = vpop.eup %3980 }
 0xa64   :  { %v2515_v40 = vmul.f32 %v3981_v18, %v2510_v38  ;;  %vm2520_vm10 = vweird.f32 %v3981_v18  ;;  %v2301_v38 = vpop.f32.mrf.mxu2 }
 0xa65   :  { %v2489_v41 = vpop.permute.xlu2 %2488  ;;  %vm2521_vm12 = vmor %vm2519_vm11, %vm2520_vm10 }
 0xa66   :  { %v2516_v42 = vsub.f32 1.0, %v2515_v40  ;;  %v2497_v43 = vadd.f32 %v2489_v41, %v2476_v0 }
 0xa68   :  { %v2517_v45 = vmul.f32 %v3981_v18, %v2516_v42  ;;  %v2501_v48 = vsub.f32 0.0, %v2497_v43 }
 0xa6a   :  { %v2518_v47 = vadd.f32 %v3981_v18, %v2517_v45  ;;  %v2508_v55 = vmul.f32 1.442695, %v2501_v48 }
 0xa6c   :  { %v2522_v53 = vsel %vm2521_vm12, %v3981_v18, %v2518_v47  ;;  %3982 = vpow2.f32 %v2508_v55 }
 0xa6d   :  { %v2485_v56 = vpop.permute.xlu1 %2484  ;;  %v2527_v57 = vsel %vm2524_vm13, %v2526_v49, %v2522_v53 }
 0xa6e   :  { %v2495_v39 = vadd.f32 %v2485_v56, %v2470_v50  ;;  %3865 = vmatmul.msk.f32.vlgmr.msra.gmra.mxu1 %vm2373_vm8, %v2527_v57 }
 0xa70   :  { %v2499_v58 = vsub.f32 0.0, %v2495_v39 }
 0xa72   :  { %v2504_v19 = vmul.f32 1.442695, %v2499_v58  ;;  %v3983_v35 = vpop.eup %3982 }
 0xa73   :  { %v2513_v18 = vadd.f32 1.0, %v3983_v35 }
 0xa74   :  { %3984 = vpow2.f32 %v2504_v19  ;;  %v334_v19 = vld [vmem:[%s5464_s24 + $0x8] sm:$0xff] }
 0xa75   :  { %v2487_v60 = vpop.permute.xlu0 %2486  ;;  %v2268_v61 = vpop.permute.xlu1 %2267 }
 0xa76   :  { %v2496_v62 = vadd.f32 %v2487_v60, %v2473_v59  ;;  %v2299_v0 = vadd.f32 %v2298_v33, %v2268_v61 }
 0xa78   :  { %v2500_v20 = vsub.f32 0.0, %v2496_v62  ;;  %v4929_v34 = vadd.f32 %v4915_v51, %v2299_v0 }
 0xa7a   :  { %v3985_v36 = vpop.eup %3984  ;;  %v2506_v17 = vmul.f32 1.442695, %v2500_v20  ;;  %v2825_v50 = vsel %vm1999_vm5, %v4929_v34, -inf  ;;  %v2832_v56 = vsel %vm2831_vm14, %v4929_v34, -inf }
 0xa7b   :  { %v2511_v37 = vadd.f32 1.0, %v3985_v36  ;;  %2826 = vmax.xlane.f32.xlu0 %v2825_v50 }
 0xa7c   :  { %3986 = vpow2.f32 %v2506_v17 }
 0xa7d   :  { %3988 = vrcp.f32 %v2511_v37  ;;  %v2273_v40 = vpop.permute.xlu0 %2272  ;;  %v2538_v53 = vand.u32 2147483647, %v2511_v37  ;;  %vm2534_vm0 = vweird.f32 %v2511_v37 }
 0xa7e   :  { %v2302_v41 = vadd.f32 %v2301_v38, %v2273_v40  ;;  %3990 = vrcp.f32 %v2513_v18  ;;  %v343_v40 = vld [vmem:[%s5465_s1] sm:$0xff] }
 0xa7f   :  { %vm2539_vm4 = vcmp.eq.f32.partialorder %v2538_v53, 8.507059e+37  ;;  %v348_v53 = vld [vmem:[%s5465_s1 + $0x28] sm:$0xff] }
 0xa80   :  { %v4934_v59 = vadd.f32 %v4917_v52, %v2302_v41  ;;  %v2540_v52 = vand.u32 2147483648, %v2511_v37 }
 0xa82   :  { %v3987_v51 = vpop.eup %3986  ;;  %v2835_v42 = vsel %vm2831_vm14, %v4934_v59, -inf  ;;  %v2828_v43 = vsel %vm1999_vm5, %v4934_v59, -inf  ;;  %v2541_v58 = vor.u32 1.1754944e-38, %v2540_v52  ;;  %vm2564_vm14 = vweird.f32 %v2513_v18  ;;  %v333_v52 = vld [vmem:[%s5464_s24] sm:$0xff] }
 0xa83   :  { %v3989_v44 = vpop.eup %3988  ;;  %v2512_v45 = vadd.f32 1.0, %v3987_v51  ;;  %2836 = vmax.xlane.f32.xlu1 %v2835_v42  ;;  %2829 = vmax.xlane.f32.xlu2 %v2828_v43  ;;  %v2570_v42 = vand.u32 2147483648, %v2513_v18  ;;  %v2568_v43 = vand.u32 2147483647, %v2513_v18 }
 0xa84   :  { %v2530_v46 = vmul.f32 %v3989_v44, %v2511_v37  ;;  %v3991_v48 = vpop.eup %3990  ;;  %vm2535_vm15 = vweird.f32 %v3989_v44 }
 0xa85   :  { %3992 = vrcp.f32 %v2512_v45  ;;  %v2560_v39 = vmul.f32 %v3991_v48, %v2513_v18  ;;  %vm2536_vm2 = vmor %vm2534_vm0, %vm2535_vm15  ;;  %v2555_v20 = vand.u32 2147483648, %v2512_v45  ;;  %v2553_v36 = vand.u32 2147483647, %v2512_v45  ;;  %v399_v18 = vld [vmem:[#allocation4 + $0x178] sm:$0xff] }
 0xa86   :  { %v2531_v47 = vsub.f32 1.0, %v2530_v46  ;;  %vm2549_vm10 = vweird.f32 %v2512_v45  ;;  %vm2565_vm13 = vweird.f32 %v3991_v48  ;;  %vm2569_vm0 = vcmp.eq.f32.partialorder %v2568_v43, 8.507059e+37  ;;  %v346_v46 = vld [vmem:[%s5465_s1 + $0x18] sm:$0xff]  ;;  %2721 = vmatpush.msrb.mxu0 %v399_v18  ;;  %v411_v43 = vld [vmem:[#allocation4 + $0x1d8] sm:$0xff] }
 0xa87   :  { %v2561_v0 = vsub.f32 1.0, %v2560_v39  ;;  %v2556_v37 = vor.u32 1.1754944e-38, %v2555_v20  ;;  %vm2554_vm12 = vcmp.eq.f32.partialorder %v2553_v36, 8.507059e+37  ;;  %vm2566_vm15 = vmor %vm2564_vm14, %vm2565_vm13  ;;  %v366_v39 = vld [vmem:[#allocation4 + $0x70] sm:$0xff]  ;;  %v413_v20 = vld [vmem:[#allocation4 + $0x1e8] sm:$0xff] }
 0xa88   :  { %v2532_v49 = vmul.f32 %v3989_v44, %v2531_v47  ;;  %v363_v36 = vld [vmem:[#allocation4 + $0x58] sm:$0xff]  ;;  %v409_v18 = vld [vmem:[#allocation4 + $0x1c8] sm:$0xff] }
 0xa89   :  { %v2562_v50 = vmul.f32 %v3991_v48, %v2561_v0  ;;  %v397_v0 = vld [vmem:[#allocation4 + $0x168] sm:$0xff] }
 0xa8a   :  { %v2533_v57 = vadd.f32 %v3989_v44, %v2532_v49  ;;  %v345_v49 = vld [vmem:[%s5465_s1 + $0x10] sm:$0xff] }
 0xa8b   :  { %v3993_v55 = vpop.eup %3992  ;;  %2833 = vmax.xlane.f32.xlu2 %v2832_v56  ;;  %v2563_v51 = vadd.f32 %v3991_v48, %v2562_v50  ;;  %v367_v56 = vld [vmem:[#allocation4 + $0x78] sm:$0xff]  ;;  %v412_v50 = vld [vmem:[#allocation4 + $0x1e0] sm:$0xff] }
 0xa8c   :  { %v2537_v33 = vsel %vm2536_vm2, %v3989_v44, %v2533_v57  ;;  %v2545_v60 = vmul.f32 %v3993_v55, %v2512_v45  ;;  %vm2550_vm6 = vweird.f32 %v3993_v55  ;;  %v2571_v45 = vor.u32 1.1754944e-38, %v2570_v42  ;;  %2699 = vmatpush.msra.mxu3 %v367_v56  ;;  %v383_v57 = vld [vmem:[#allocation4 + $0xf8] sm:$0xff]  ;;  %v377_v56 = vld [vmem:[#allocation4 + $0xc8] sm:$0xff] }
 0xa8d   :  { %v2542_v61 = vsel %vm2539_vm4, %v2541_v58, %v2537_v33  ;;  %vm2551_vm11 = vmor %vm2549_vm10, %vm2550_vm6  ;;  %v2567_v44 = vsel %vm2566_vm15, %v3991_v48, %v2563_v51  ;;  %2679 = vmatpush.msra.mxu2 %v383_v57  ;;  %v415_v48 = vld [vmem:[#allocation4 + $0x1f8] sm:$0xff]  ;;  %v382_v58 = vld [vmem:[#allocation4 + $0xf0] sm:$0xff]  ;;  %vm2671_vm6 = vcmask 1040384   ;;  %vm2674_vm10 = vcmask 1042432  }
 0xa8e   :  { %3866 = vmatmul.msk.f32.gmra.mxu1 %vm2373_vm8, %v2542_v61  ;;  %v2546_v62 = vsub.f32 1.0, %v2545_v60  ;;  %v2572_v47 = vsel %vm2569_vm0, %v2571_v45, %v2567_v44  ;;  %2700 = vmatpush.msra.mxu3 %v366_v39  ;;  %v365_v33 = vld [vmem:[#allocation4 + $0x68] sm:$0xff]  ;;  %v414_v60 = vld [vmem:[#allocation4 + $0x1f0] sm:$0xff]  ;;  %v360_v57 = vld [vmem:[#allocation4 + $0x40] sm:$0xff] }
 0xa8f   :  { %2857 = vperm.xlu0 %3965, %v334_v19   ;;  %2744 = vmatpush.msrb.mxu1 %v415_v48  ;;  %v398_v19 = vld [vmem:[#allocation4 + $0x170] sm:$0xff]  ;;  %v381_v61 = vld [vmem:[#allocation4 + $0xe8] sm:$0xff]  ;;  %v376_v48 = vld [vmem:[#allocation4 + $0xc0] sm:$0xff] }
 0xa90   :  { %v2547_v35 = vmul.f32 %v3993_v55, %v2546_v62  ;;  %2680 = vmatpush.msra.mxu2 %v382_v58  ;;  %2701 = vmatpush.msra.mxu3 %v365_v33  ;;  %v364_v62 = vld [vmem:[#allocation4 + $0x60] sm:$0xff]  ;;  %v393_v39 = vld [vmem:[#allocation4 + $0x148] sm:$0xff]  ;;  %v359_v58 = vld [vmem:[#allocation4 + $0x38] sm:$0xff] }
 0xa91   :  { %2722 = vmatpush.msrb.mxu0 %v398_v19  ;;  %2745 = vmatpush.msrb.mxu1 %v414_v60  ;;  %v392_v33 = vld [vmem:[#allocation4 + $0x140] sm:$0xff]  ;;  %v375_v60 = vld [vmem:[#allocation4 + $0xb8] sm:$0xff] }
 0xa92   :  { %v2548_v17 = vadd.f32 %v3993_v55, %v2547_v35  ;;  %v380_v35 = vld [vmem:[#allocation4 + $0xe0] sm:$0xff]  ;;  %2681 = vmatpush.msra.mxu2 %v381_v61  ;;  %2702 = vmatpush.msra.mxu3 %v364_v62  ;;  %v358_v61 = vld [vmem:[#allocation4 + $0x30] sm:$0xff]  ;;  %v391_v62 = vld [vmem:[#allocation4 + $0x138] sm:$0xff] }
 0xa93   :  { %2723 = vmatpush.msrb.mxu0 %v397_v0  ;;  %2746 = vmatpush.msrb.mxu1 %v413_v20  ;;  %v408_v19 = vld [vmem:[#allocation4 + $0x1c0] sm:$0xff]  ;;  %v407_v20 = vld [vmem:[#allocation4 + $0x1b8] sm:$0xff] }
 0xa94   :  { %v2552_v38 = vsel %vm2551_vm11, %v3993_v55, %v2548_v17  ;;  %v396_v17 = vld [vmem:[#allocation4 + $0x160] sm:$0xff]  ;;  %2682 = vmatpush.msra.mxu2 %v380_v35  ;;  %2703 = vmatpush.msra.mxu3 %v363_v36  ;;  %v374_v35 = vld [vmem:[#allocation4 + $0xb0] sm:$0xff]  ;;  %v357_v36 = vld [vmem:[#allocation4 + $0x28] sm:$0xff] }
 0xa95   :  { %v2557_v41 = vsel %vm2554_vm12, %v2556_v37, %v2552_v38  ;;  %2724 = vmatpush.msrb.mxu0 %v396_v17  ;;  %2747 = vmatpush.msrb.mxu1 %v412_v50  ;;  %v379_v38 = vld [vmem:[#allocation4 + $0xd8] sm:$0xff]  ;;  %v390_v17 = vld [vmem:[#allocation4 + $0x130] sm:$0xff] }
 0xa96   :  { %3867 = vmatmul.msk.f32.gmra.mxu1 %vm2373_vm8, %v2557_v41  ;;  %v395_v41 = vld [vmem:[#allocation4 + $0x158] sm:$0xff]  ;;  %2683 = vmatpush.msra.mxu2 %v379_v38  ;;  %v406_v50 = vld [vmem:[#allocation4 + $0x1b0] sm:$0xff]  ;;  %v356_v38 = vld [vmem:[#allocation4 + $0x20] sm:$0xff] }
 0xa97   :  { %2893 = vperm.xlu0 %3965, %v343_v40   ;;  %v362_v40 = vld [vmem:[#allocation4 + $0x50] sm:$0xff]  ;;  %2725 = vmatpush.msrb.mxu0 %v395_v41  ;;  %v344_v0 = vld [vmem:[%s5465_s1 + $0x8] sm:$0xff]  ;;  %v405_v41 = vld [vmem:[#allocation4 + $0x1a8] sm:$0xff] }
 0xa98   :  { %2704 = vmatpush.msra.mxu3 %v362_v40  ;;  %2748 = vmatpush.msrb.mxu1 %v411_v43  ;;  %v389_v40 = vld [vmem:[#allocation4 + $0x128] sm:$0xff]  ;;  %v355_v43 = vld [vmem:[#allocation4 + $0x18] sm:$0xff] }
 0xa9e   :  { %3868 = vmatmul.msk.f32.gmra.mxu1 %vm2373_vm8, %v2572_v47  ;;  %v361_v47 = vld [vmem:[#allocation4 + $0x48] sm:$0xff] }
 0xa9f   :  { %2908 = vperm.xlu0 %3965, %v346_v46   ;;  %v378_v46 = vld [vmem:[#allocation4 + $0xd0] sm:$0xff]  ;;  %2705 = vmatpush.msra.mxu3 %v361_v47 }
 0xaa0   :  { %2684 = vmatpush.msra.mxu2 %v378_v46  ;;  %v371_v46 = vld [vmem:[#allocation4 + $0x98] sm:$0xff]  ;;  %v354_v47 = vld [vmem:[#allocation4 + $0x10] sm:$0xff] }
 0xaa1   :  { %2706 = vmatpush.msra.mxu3 %v360_v57  ;;  %v347_v57 = vld [vmem:[%s5465_s1 + $0x20] sm:$0xff] }
 0xaa2   :  { %2685 = vmatpush.msra.mxu2 %v377_v56  ;;  %v353_v56 = vld [vmem:[#allocation4 + $0x8] sm:$0xff] }
 0xaa3   :  { %2852 = vperm.xlu2 %3967, %v333_v52   ;;  %v394_v52 = vld [vmem:[#allocation4 + $0x150] sm:$0xff]  ;;  %2707 = vmatpush.msra.mxu3 %v359_v58 }
 0xaa4   :  { %2726 = vmatpush.msrb.mxu0 %v394_v52  ;;  %2686 = vmatpush.msra.mxu2 %v376_v48  ;;  %v387_v52 = vld [vmem:[#allocation4 + $0x118] sm:$0xff]  ;;  %v4223_v48 = vmov 32.0   ;;  %v402_v58 = vld [vmem:[#allocation4 + $0x190] sm:$0xff] }
 0xaa5   :  { %2708 = vmatpush.msra.mxu3 %v358_v61  ;;  %v401_v61 = vld [vmem:[#allocation4 + $0x188] sm:$0xff] }
 0xaa6   :  { %2727 = vmatpush.msrb.mxu0 %v393_v39  ;;  %2687 = vmatpush.msra.mxu2 %v375_v60  ;;  %v386_v39 = vld [vmem:[#allocation4 + $0x110] sm:$0xff]  ;;  %v385_v60 = vld [vmem:[#allocation4 + $0x108] sm:$0xff] }
 0xaa7   :  { %2709 = vmatpush.msra.mxu3 %v357_v36  ;;  %v734_v36 = vld [vmem:[%s4444_s16 + $0x18] sm:$0xff] }
 0xaa8   :  { %2728 = vmatpush.msrb.mxu0 %v392_v33  ;;  %2688 = vmatpush.msra.mxu2 %v374_v35  ;;  %v369_v33 = vld [vmem:[#allocation4 + $0x88] sm:$0xff]  ;;  %v400_v35 = vld [vmem:[#allocation4 + $0x180] sm:$0xff] }
 0xaa9   :  { %2710 = vmatpush.msra.mxu3 %v356_v38 }
 0xaaa   :  { %2729 = vmatpush.msrb.mxu0 %v391_v62  ;;  %v368_v62 = vld [vmem:[#allocation4 + $0x80] sm:$0xff] }
 0xaab   :  { %2903 = vperm.xlu2 %3967, %v345_v49   ;;  %2711 = vmatpush.msra.mxu3 %v355_v43 }
 0xaac   :  { %2730 = vmatpush.msrb.mxu0 %v390_v17 }
 0xaad   :  { %2712 = vmatpush.msra.mxu3 %v354_v47 }
 0xaae   :  { %2731 = vmatpush.msrb.mxu0 %v389_v40 }
 0xaaf   :  { %2713 = vmatpush.msra.mxu3 %v353_v56 }
 0xab3   :  { %2918 = vperm.xlu2 %3967, %v348_v53   ;;  %v410_v53 = vld [vmem:[#allocation4 + $0x1d0] sm:$0xff] }
 0xab4   :  { %2749 = vmatpush.msrb.mxu1 %v410_v53  ;;  %v370_v53 = vld [vmem:[#allocation4 + $0x90] sm:$0xff] }
 0xab6   :  { %2750 = vmatpush.msrb.mxu1 %v409_v18  ;;  %v4222_v18 = vmov 16.0  }
 0xab7   :  { %3994 = vrcp.f32 %v4222_v18 }
 0xab8   :  { %2751 = vmatpush.msrb.mxu1 %v408_v19  ;;  %3996 = vrcp.f32 %v4223_v48  ;;  %v352_v19 = vld [vmem:[#allocation4] sm:$0xff] }
 0xab9   :  { %2714 = vmatpush.msra.mxu3 %v352_v19 }
 0xaba   :  { %2752 = vmatpush.msrb.mxu1 %v407_v20  ;;  %v384_v20 = vld [vmem:[#allocation4 + $0x100] sm:$0xff] }
 0xabc   :  { %2753 = vmatpush.msrb.mxu1 %v406_v50  ;;  %v2650_v50 = vrot.slane %v4877_v54, 4 }
 0xabd   :  { %v3995_v17 = vpop.eup %3994 }
 0xabe   :  { %2754 = vmatpush.msrb.mxu1 %v405_v41  ;;  %v3997_v38 = vpop.eup %3996  ;;  %v349_v41 = vld [vmem:[%s5465_s1 + $0x30] sm:$0xff]  ;;  %v2657_v47 = vmul.f32 16.0, %v3995_v17  ;;  %vm2661_vm4 = vweird.f32 %v3995_v17 }
 0xabf   :  { %vm2637_vm2 = vweird.f32 %v3997_v38 }
 0xaee   :  { %v2827_v51 = vpop.xlane.xlu0 %2826 }
 0xaf6   :  { %v2830_v55 = vpop.xlane.xlu2 %2829  ;;  %v2837_v37 = vpop.xlane.xlu1 %2836 }
 0xaf7   :  { %v2839_v44 = vsel %vm1631_vm7, %v2830_v55, %v2837_v37  ;;  %v4954_v55 = vpop.f32.mrf.mxu1  ;;  %v373_v37 = vld [vmem:[#allocation4 + $0xa8] sm:$0xff] }
 0xaf8   :  { %2689 = vmatpush.msra.mxu2 %v373_v37  ;;  %v733_v37 = vld [vmem:[%s4444_s16 + $0x10] sm:$0xff]  ;;  %v4968_v43 = vmul.f32 %v4954_v55, %v4537_v28 }
 0xafe   :  { %v2834_v42 = vpop.xlane.xlu2 %2833 }
 0xaff   :  { %v2838_v45 = vsel %vm1631_vm7, %v2827_v51, %v2834_v42  ;;  %v372_v42 = vld [vmem:[#allocation4 + $0xa0] sm:$0xff] }
 0xb00   :  { %v3973_v49 = vpack.i.bf16 %v2838_v45, %v2839_v44  ;;  %v388_v44 = vld [vmem:[#allocation4 + $0x120] sm:$0xff]  ;;  %2690 = vmatpush.msra.mxu2 %v372_v42 }
 0xb01   :  { %v404_v45 = vld [vmem:[#allocation4 + $0x1a0] sm:$0xff]  ;;  %2732 = vmatpush.msrb.mxu0 %v388_v44 }
 0xb02   :  { %3974 = vrot.lane.b32.xlu1 %v3973_v49, %s4220_s18  ;;  %v403_v49 = vld [vmem:[#allocation4 + $0x198] sm:$0xff]  ;;  %2755 = vmatpush.msrb.mxu1 %v404_v45  ;;  %v2651_v45 = vadd.f32 %v2650_v50, %v4877_v54  ;;  %v2658_v54 = vsub.f32 1.0, %v2657_v47 }
 0xb03   :  { %2691 = vmatpush.msra.mxu2 %v371_v46  ;;  %2733 = vmatpush.msrb.mxu0 %v387_v52  ;;  %v732_v42 = vld [vmem:[%s4444_s16 + $0x8] sm:$0xff]  ;;  %v2633_v46 = vmul.f32 32.0, %v3997_v38  ;;  %v731_v52 = vld [vmem:[%s4444_s16] sm:$0xff] }
 0xb04   :  { %2756 = vmatpush.msrb.mxu1 %v403_v49 }
 0xb05   :  { %2692 = vmatpush.msra.mxu2 %v370_v53  ;;  %2734 = vmatpush.msrb.mxu0 %v386_v39  ;;  %v2652_v53 = vrot.slane %v2651_v45, 2 }
 0xb06   :  { %2757 = vmatpush.msrb.mxu1 %v402_v58 }
 0xb07   :  { %2693 = vmatpush.msra.mxu2 %v369_v33  ;;  %2735 = vmatpush.msrb.mxu0 %v385_v60  ;;  %v2653_v19 = vadd.f32 %v2652_v53, %v2651_v45 }
 0xb08   :  { %2758 = vmatpush.msrb.mxu1 %v401_v61 }
 0xb09   :  { %2694 = vmatpush.msra.mxu2 %v368_v62  ;;  %2736 = vmatpush.msrb.mxu0 %v384_v20 }
 0xb0a   :  { %2898 = vperm.xlu1 %3966, %v344_v0   ;;  %2759 = vmatpush.msrb.mxu1 %v400_v35 }
 0xb0b   :  { %v2610_v51 = vpop.f32.mrf.mxu1  ;;  %2814 = vmatpush.msrb.mxu2 %v734_v36  ;;  %v2654_v36 = vrot.slane %v2653_v19, 1 }
 0xb0c   :  { %v4962_v40 = vmul.f32 %v2610_v51, %v4533_v27  ;;  %v2665_v51 = vrot.slane %v4879_v63, 4 }
 0xb0d   :  { %2815 = vmatpush.msrb.mxu2 %v733_v37 }
 0xb0e   :  { %v2623_v27 = vadd.f32 %v4962_v40, %v4968_v43  ;;  %v2640_v56 = vmax.f32 %v4968_v43, %v4962_v40  ;;  %v2666_v18 = vmax.f32 %v4879_v63, %v2665_v51 }
 0xb0f   :  { %2816 = vmatpush.msrb.mxu2 %v732_v42 }
 0xb10   :  { %v2667_v62 = vrot.slane %v2666_v18, 2 }
 0xb11   :  { %2817 = vmatpush.msrb.mxu2 %v731_v52  ;;  %v2655_v52 = vadd.f32 %v2654_v36, %v2653_v19 }
 0xb12   :  { %2913 = vperm.xlu1 %3966, %v347_v57   ;;  %v2668_v42 = vmax.f32 %v2666_v18, %v2667_v62  ;;  %v331_v62 = vld [vmem:[%s5466_s2] sm:$0xff] }
 0xb13   :  { %v2613_v0 = vpop.f32.mrf.mxu1 }
 0xb14   :  { %v4971_v44 = vmul.f32 %v2613_v0, %v4529_v26  ;;  %v2634_v26 = vsub.f32 1.0, %v2633_v46 }
 0xb16   :  { %v2624_v28 = vadd.f32 %v2623_v27, %v4971_v44  ;;  %v2635_v33 = vmul.f32 %v3997_v38, %v2634_v26 }
 0xb18   :  { %v2636_v35 = vadd.f32 %v3997_v38, %v2635_v33 }
 0xb1a   :  { %2923 = vperm.xlu1 %3966, %v349_v41   ;;  %v4988_v47 = vsel %vm2637_vm2, %v3997_v38, %v2636_v35 }
 0xb1b   :  { %v2616_v49 = vpop.f32.mrf.mxu1 }
 0xb1c   :  { %v4980_v55 = vmul.f32 %v2616_v49, %v4527_v23  ;;  %v2659_v23 = vmul.f32 %v3995_v17, %v2658_v54  ;;  %v2669_v49 = vrot.slane %v2668_v42, 1 }
 0xb1e   :  { %v2625_v57 = vadd.f32 %v2624_v28, %v4980_v55  ;;  %v2641_v39 = vmax.f32 %v4971_v44, %v4980_v55  ;;  %v2660_v50 = vadd.f32 %v3995_v17, %v2659_v23  ;;  %v2670_v54 = vmax.f32 %v2668_v42, %v2669_v49  ;;  %v337_v49 = vld [vmem:[%s5467_s7 + $0x10] sm:$0xff] }
 0xb20   :  { %v2626_v48 = vrot.slane %v2625_v57, 4  ;;  %v2642_v58 = vmax.f32 %v2640_v56, %v2641_v39  ;;  %v4990_v51 = vsel %vm2661_vm4, %v3995_v17, %v2660_v50  ;;  %v2858_v50 = vpop.permute.xlu0 %2857 }
 0xb21   :  { %v2663_v53 = vmul.f32 %v4990_v51, %v2655_v52 }
 0xb22   :  { %v2627_v60 = vadd.f32 %v2626_v48, %v2625_v57  ;;  %v2643_v61 = vrot.slane %v2642_v58, 4 }
 0xb24   :  { %v2628_v0 = vrot.slane %v2627_v60, 2  ;;  %v2644_v20 = vmax.f32 %v2642_v58, %v2643_v61 }
 0xb26   :  { %v2629_v37 = vadd.f32 %v2628_v0, %v2627_v60  ;;  %v2645_v41 = vrot.slane %v2644_v20, 2 }
 0xb28   :  { %v2630_v46 = vrot.slane %v2629_v37, 1  ;;  %v2646_v63 = vmax.f32 %v2644_v20, %v2645_v41  ;;  %v332_v20 = vld [vmem:[%s5466_s2 + $0x8] sm:$0xff] }
 0xb2a   :  { %v2631_v45 = vadd.f32 %v2630_v46, %v2629_v37  ;;  %v2647_v27 = vrot.slane %v2646_v63, 1  ;;  %v2853_v37 = vpop.permute.xlu2 %2852 }
 0xb2c   :  { %v2639_v28 = vmul.f32 %v4988_v47, %v2631_v45  ;;  %v2648_v26 = vmax.f32 %v2646_v63, %v2647_v27  ;;  %v335_v45 = vld [vmem:[%s5467_s7] sm:$0xff]  ;;  %v336_v27 = vld [vmem:[%s5467_s7 + $0x8] sm:$0xff] }
 0xb2e   :  { %v2672_v56 = vsel %vm2671_vm6, %v2639_v28, %v2648_v26  ;;  %v338_v28 = vld [vmem:[%s5467_s7 + $0x18] sm:$0xff]  ;;  %v339_v26 = vld [vmem:[%s5467_s7 + $0x20] sm:$0xff] }
 0xb2f   :  { %v2673_v57 = vsel %vm2586_vm9, %v2672_v56, %v2663_v53  ;;  %v340_v53 = vld [vmem:[%s5467_s7 + $0x28] sm:$0xff]  ;;  %v342_v56 = vld [vmem:[%s5467_s7 + $0x38] sm:$0xff] }
 0xb30   :  { %v2675_v38 = vsel %vm2674_vm10, %v2673_v57, %v2670_v54  ;;  %v341_v54 = vld [vmem:[%s5467_s7 + $0x30] sm:$0xff] }
 0xb31   :  { %v2677_v39 = vrot.slane %v2675_v38, 1  ;;  %2715 = vmatmul.f32.vlgmr.msra.gmra.mxu3 %v2675_v38  ;;  %v2719_v17 = vrot.slane %v2675_v38, 2  ;;  %v2742_v18 = vrot.slane %v2675_v38, 3  ;;  %v2894_v38 = vpop.permute.xlu0 %2893 }
 0xb33   :  { %2695 = vmatmul.f32.vlgmr.msra.gmra.mxu2 %v2677_v39  ;;  %2737 = vmatmul.f32.vlgmr.msrb.gmra.mxu0 %v2719_v17 }
 0xb34   :  { %2760 = vmatmul.f32.vlgmr.msrb.gmra.mxu1 %v2742_v18 }
 0xb3b   :  { %3869 = vmatmul.msk.f32.vlgmr.msrb.gmra.mxu2 %vm1063_vm3, %v4929_v34 }
 0xb43   :  { %3870 = vmatmul.msk.f32.gmra.mxu2 %vm1063_vm3, %v4934_v59 }
 0xb74   :  { %v3975_v33 = vpop.permute.xlu1 %3974 }
 0xb75   :  { %v3976_v19 = vunpack.i.l.bf16 %v3975_v33  ;;  %v3977_v60 = vunpack.i.h.bf16 %v3975_v33  ;;  %v350_v33 = vld [vmem:[%s5465_s1 + $0x38] sm:$0xff] }
 0xb7c   :  { %v2899_v18 = vpop.permute.xlu1 %2898 }
 0xbb0   :  { %v5027_v57 = vpop.f32.mrf.mxu0 }
 0xbb4   :  { %v5009_v35 = vpop.f32.mrf.mxu3 }
 0xbb6   :  { %v5001_v48 = vpop.f32.mrf.mxu2 }
 0xbbe   :  { %v2819_v58 = vpop.f32.mrf.mxu2 }
 0xbbf   :  { %v2848_v0 = vsel %vm2373_vm8, %v2819_v58, %v3977_v60 }
 0xbc6   :  { %v2822_v23 = vpop.f32.mrf.mxu2 }
 0xbc7   :  { %v2849_v61 = vsel %vm2373_vm8, %v2822_v23, %v3976_v19  ;;  %v2904_v23 = vpop.permute.xlu2 %2903 }
 0xbc8   :  { %2880 = vmatpush.msrb.mxu3 %v2849_v61 }
 0xbca   :  { %2881 = vmatpush.msrb.mxu3 %v2848_v0 }
 0xbcb   :  { %3871 = vmatmul.msk.f32.vlgmr.msrb.gmra.mxu3 %vm1999_vm5, %v331_v62  ;;  %v2909_v62 = vpop.permute.xlu0 %2908 }
 0xbd3   :  { %3872 = vmatmul.msk.f32.gmra.mxu3 %vm1999_vm5, %v332_v20 }
 0xc4e   :  { %v2883_v36 = vpop.f32.mrf.mxu3 }
 0xc4f   :  { %v2884_v42 = vadd.f32 %v2883_v36, %v2853_v37  ;;  %v2914_v36 = vpop.permute.xlu1 %2913 }
 0xc51   :  { %v2889_v52 = vmax.f32 %v2884_v42, 0.0 }
 0xc56   :  { %v2886_v41 = vpop.f32.mrf.mxu3 }
 0xc57   :  { %v2887_v46 = vadd.f32 %v2886_v41, %v2858_v50  ;;  %v2919_v41 = vpop.permute.xlu2 %2918 }
 0xc59   :  { %v2890_v63 = vmax.f32 %v2887_v46, 0.0 }
 0xc5b   :  { %2969 = vmatpush.msra.mxu0 %v2890_v63  ;;  %v2924_v63 = vpop.permute.xlu1 %2923 }
 0xc5d   :  { %2970 = vmatpush.msra.mxu0 %v2889_v52 }
 0xc5e   :  { %3873 = vmatmul.msk.f32.vlgmr.msra.gmra.mxu0 %vm1999_vm5, %v335_v45  ;;  %v351_v45 = vld [vmem:[#allocation3] sm:$0x1] }
 0xc66   :  { %3874 = vmatmul.msk.f32.gmra.mxu0 %vm1999_vm5, %v336_v27 }
 0xc6e   :  { %3875 = vmatmul.msk.f32.gmra.mxu0 %vm1999_vm5, %v337_v49  ;;  %v330_v49 = vld [vmem:[#allocation2] sm:$0x1] }
 0xc76   :  { %3876 = vmatmul.msk.f32.gmra.mxu0 %vm1999_vm5, %v338_v28  ;;  %v1537_v28 = vsel %vm751_vm1, %v4653_v2, -inf }
 0xc7e   :  { %3877 = vmatmul.msk.f32.gmra.mxu0 %vm1999_vm5, %v339_v26  ;;  %v1540_v26 = vsel %vm751_vm1, %v4655_v3, -inf }
 0xc86   :  { %3878 = vmatmul.msk.f32.gmra.mxu0 %vm1999_vm5, %v340_v53  ;;  %v1546_v53 = vsel %vm751_vm1, %v4659_v5, -inf }
 0xc8e   :  { %3879 = vmatmul.msk.f32.gmra.mxu0 %vm1999_vm5, %v341_v54 }
 0xc96   :  { %3880 = vmatmul.msk.f32.gmra.mxu0 %vm1999_vm5, %v342_v56  ;;  %vm1582_vm5 = vcmask 64544  }
 0xcdb   :  { %v2972_v39 = vpop.f32.mrf.mxu0 }
 0xcdc   :  { %v2973_v17 = vadd.f32 %v2972_v39, %v2894_v38  ;;  %v1549_v38 = vsel %vm751_vm1, %v4661_v6, -inf }
 0xcde   :  { %3004 = vrot.lane.b32.xlu0 %v2973_v17, %s4221_s28 }
 0xce3   :  { %v2975_v58 = vpop.f32.mrf.mxu0 }
 0xce4   :  { %v2976_v19 = vadd.f32 %v2975_v58, %v2899_v18  ;;  %v1555_v18 = vsel %vm751_vm1, %v4665_v8, -inf }
 0xce6   :  { %3006 = vrot.lane.b32.xlu2 %v2976_v19, %s4221_s28  ;;  %2928 = vperm.xlu0 %3965, %v350_v33   ;;  %v1558_v33 = vsel %vm751_vm1, %v4667_v9, -inf }
 0xceb   :  { %v2978_v60 = vpop.f32.mrf.mxu0 }
 0xcec   :  { %v5032_v61 = vadd.f32 %v2978_v60, %v2904_v23  ;;  %v1564_v23 = vsel %vm751_vm1, %v4671_v11, -inf }
 0xcee   :  { %3008 = vrot.lane.b32.xlu1 %v5032_v61, %s4221_s28 }
 0xcf3   :  { %v2981_v0 = vpop.f32.mrf.mxu0 }
 0xcf4   :  { %v2982_v20 = vadd.f32 %v2981_v0, %v2909_v62  ;;  %v730_v0 = vld [vmem:[%s4439_s27] sm:$0x3]  ;;  %s5468_s27 = sld [smem:[#allocation32_spill]] }
 0xcf5   :  { %3881 = vmatpush.msk.msra.mxu1 %vm2586_vm9, %v730_v0  ;;  %v1586_v0 = vsel %vm1582_vm5, %v4653_v2, -inf }
 0xcf6   :  { %3010 = vrot.lane.b32.xlu2 %v2982_v20, %s4221_s28 }
 0xcfb   :  { %v2984_v50 = vpop.f32.mrf.mxu0 }
 0xcfc   :  { %v5037_v37 = vadd.f32 %v2984_v50, %v2914_v36 }
 0xcfe   :  { %3012 = vrot.lane.b32.xlu0 %v5037_v37, %s4221_s28 }
 0xd03   :  { %v2987_v42 = vpop.f32.mrf.mxu0 }
 0xd04   :  { %v5041_v46 = vadd.f32 %v2987_v42, %v2919_v41 }
 0xd06   :  { %3014 = vrot.lane.b32.xlu1 %v5041_v46, %s4221_s28 }
 0xd0b   :  { %v2990_v52 = vpop.f32.mrf.mxu0 }
 0xd0c   :  { %v5045_v27 = vadd.f32 %v2990_v52, %v2924_v63  ;;  %v1567_v63 = vsel %vm751_vm1, %v4673_v12, -inf }
 0xd0e   :  { %3016 = vrot.lane.b32.xlu2 %v5045_v27, %s4221_s28  ;;  %3432 = vperm.xlu1 %3966, %v351_v45  }
 0xd13   :  { %v2993_v52 = vpop.f32.mrf.mxu0 }
 0xd16   :  { %2767 = vperm.xlu2 %3967, %v330_v49   ;;  %v1573_v49 = vsel %vm751_vm1, %v4677_v14, -inf }
 0xd38   :  { %1538 = vmax.xlane.f32.xlu1 %v1537_v28 }
 0xd3f   :  { %1541 = vmax.xlane.f32.xlu2 %v1540_v26 }
 0xd40   :  { %1547 = vmax.xlane.f32.xlu1 %v1546_v53  ;;  %v3007_v54 = vpop.permute.xlu2 %3006 }
 0xd41   :  { %v3029_v56 = vadd.f32 %v3007_v54, %v2976_v19 }
 0xd43   :  { %v3037_v39 = vsub.f32 0.0, %v3029_v56  ;;  %v1576_v56 = vsel %vm751_vm1, %v4679_v15, -inf }
 0xd45   :  { %v3046_v58 = vmul.f32 1.442695, %v3037_v39 }
 0xd47   :  { %1550 = vmax.xlane.f32.xlu2 %v1549_v38  ;;  %3998 = vpow2.f32 %v3046_v58  ;;  %v1583_v38 = vsel %vm1582_vm5, %v4651_v1, -inf }
 0xd48   :  { %1556 = vmax.xlane.f32.xlu1 %v1555_v18 }
 0xd4d   :  { %v3999_v41 = vpop.eup %3998 }
 0xd4e   :  { %v5069_v28 = vadd.f32 1.0, %v3999_v41 }
 0xd4f   :  { %1559 = vmax.xlane.f32.xlu2 %v1558_v33 }
 0xd50   :  { %v3005_v60 = vpop.permute.xlu0 %3004  ;;  %1565 = vmax.xlane.f32.xlu1 %v1564_v23  ;;  %v3011_v19 = vpop.permute.xlu2 %3010  ;;  %vm3088_vm0 = vweird.f32 %v5069_v28 }
 0xd51   :  { %v3028_v62 = vadd.f32 %v3005_v60, %v2973_v17  ;;  %v3031_v50 = vadd.f32 %v3011_v19, %v2982_v20 }
 0xd53   :  { %v3036_v36 = vsub.f32 0.0, %v3028_v62  ;;  %v3039_v45 = vsub.f32 0.0, %v3031_v50  ;;  %v1592_v50 = vsel %vm1582_vm5, %v4657_v4, -inf }
 0xd55   :  { %v3044_v42 = vmul.f32 1.442695, %v3036_v36  ;;  %v3050_v53 = vmul.f32 1.442695, %v3039_v45 }
 0xd57   :  { %4000 = vpow2.f32 %v3044_v42  ;;  %1568 = vmax.xlane.f32.xlu2 %v1567_v63 }
 0xd58   :  { %v2929_v17 = vpop.permute.xlu0 %2928  ;;  %1574 = vmax.xlane.f32.xlu1 %v1573_v49  ;;  %4002 = vrcp.f32 %v5069_v28 }
 0xd59   :  { %v5071_v26 = vadd.f32 %v2993_v52, %v2929_v17  ;;  %4004 = vpow2.f32 %v3050_v53 }
 0xd5b   :  { %3018 = vrot.lane.b32.xlu0 %v5071_v26, %s4221_s28 }
 0xd5d   :  { %v4001_v20 = vpop.eup %4000 }
 0xd5e   :  { %v3060_v54 = vadd.f32 1.0, %v4001_v20  ;;  %v5081_v58 = vpop.eup %4002 }
 0xd5f   :  { %1577 = vmax.xlane.f32.xlu2 %v1576_v56  ;;  %v4005_v23 = vpop.eup %4004  ;;  %v3084_v19 = vmul.f32 %v5081_v58, %v5069_v28  ;;  %vm3089_vm15 = vweird.f32 %v5081_v58 }
 0xd60   :  { %4006 = vrcp.f32 %v3060_v54  ;;  %v3009_v39 = vpop.permute.xlu1 %3008  ;;  %1584 = vmax.xlane.f32.xlu1 %v1583_v38  ;;  %v5089_v41 = vadd.f32 1.0, %v4005_v23  ;;  %v3079_v45 = vand.u32 2147483648, %v3060_v54  ;;  %v3077_v17 = vand.u32 2147483647, %v3060_v54  ;;  %vm3090_vm2 = vmor %vm3088_vm0, %vm3089_vm15 }
 0xd61   :  { %v3030_v18 = vadd.f32 %v3009_v39, %v5032_v61  ;;  %v3085_v63 = vsub.f32 1.0, %v3084_v19  ;;  %vm3073_vm12 = vweird.f32 %v3060_v54  ;;  %v1595_v39 = vsel %vm1582_vm5, %v4659_v5, -inf }
 0xd62   :  { %vm3078_vm14 = vcmp.eq.f32.partialorder %v3077_v17, 8.507059e+37  ;;  %vm3118_vm0 = vweird.f32 %v5089_v41 }
 0xd63   :  { %v3038_v33 = vsub.f32 0.0, %v3030_v18  ;;  %v3086_v20 = vmul.f32 %v5081_v58, %v3085_v63  ;;  %v3080_v18 = vor.u32 1.1754944e-38, %v3079_v45 }
 0xd65   :  { %v3048_v60 = vmul.f32 1.442695, %v3038_v33  ;;  %v3087_v19 = vadd.f32 %v5081_v58, %v3086_v20 }
 0xd66   :  { %v4007_v62 = vpop.eup %4006 }
 0xd67   :  { %v3069_v36 = vmul.f32 %v4007_v62, %v3060_v54  ;;  %4008 = vpow2.f32 %v3048_v60  ;;  %1587 = vmax.xlane.f32.xlu2 %v1586_v0  ;;  %vm3074_vm11 = vweird.f32 %v4007_v62 }
 0xd68   :  { %1593 = vmax.xlane.f32.xlu1 %v1592_v50  ;;  %v3017_v61 = vpop.permute.xlu2 %3016  ;;  %4010 = vrcp.f32 %v5089_v41  ;;  %vm3075_vm13 = vmor %vm3073_vm12, %vm3074_vm11 }
 0xd69   :  { %v3070_v42 = vsub.f32 1.0, %v3069_v36  ;;  %v3034_v52 = vadd.f32 %v3017_v61, %v5045_v27  ;;  %v1601_v27 = vsel %vm1582_vm5, %v4663_v7, -inf  ;;  %v3094_v36 = vand.u32 2147483648, %v5069_v28 }
 0xd6b   :  { %v3071_v49 = vmul.f32 %v4007_v62, %v3070_v42  ;;  %v3042_v38 = vsub.f32 0.0, %v3034_v52  ;;  %v1604_v52 = vsel %vm1582_vm5, %v4665_v8, -inf  ;;  %v3095_v45 = vor.u32 1.1754944e-38, %v3094_v36 }
 0xd6d   :  { %v4009_v2 = vpop.eup %4008  ;;  %v3072_v53 = vadd.f32 %v4007_v62, %v3071_v49  ;;  %v3056_v0 = vmul.f32 1.442695, %v3042_v38 }
 0xd6e   :  { %v3062_v56 = vadd.f32 1.0, %v4009_v2  ;;  %v5102_v5 = vpop.eup %4010 }
 0xd6f   :  { %1596 = vmax.xlane.f32.xlu2 %v1595_v39  ;;  %v3076_v33 = vsel %vm3075_vm13, %v4007_v62, %v3072_v53  ;;  %v3092_v62 = vand.u32 2147483647, %v5069_v28  ;;  %v3114_v42 = vmul.f32 %v5102_v5, %v5089_v41  ;;  %vm3119_vm15 = vweird.f32 %v5102_v5 }
 0xd70   :  { %4012 = vrcp.f32 %v3062_v56  ;;  %v3013_v23 = vpop.permute.xlu0 %3012  ;;  %1602 = vmax.xlane.f32.xlu1 %v1601_v27  ;;  %v3081_v60 = vsel %vm3078_vm14, %v3080_v18, %v3076_v33  ;;  %v3109_v20 = vand.u32 2147483648, %v3062_v56  ;;  %v3107_v18 = vand.u32 2147483647, %v3062_v56 }
 0xd71   :  { %v3032_v54 = vadd.f32 %v3013_v23, %v5037_v37  ;;  %3882 = vmatmul.msk.f32.vlgmr.msra.gmra.mxu1 %vm2373_vm8, %v3081_v60  ;;  %v3091_v37 = vsel %vm3090_vm2, %v5081_v58, %v3087_v19  ;;  %4014 = vpow2.f32 %v3056_v0  ;;  %vm3093_vm4 = vcmp.eq.f32.partialorder %v3092_v62, 8.507059e+37  ;;  %vm3120_vm2 = vmor %vm3118_vm0, %vm3119_vm15 }
 0xd72   :  { %v3096_v2 = vsel %vm3093_vm4, %v3095_v45, %v3091_v37  ;;  %v3115_v53 = vsub.f32 1.0, %v3114_v42  ;;  %vm3103_vm12 = vweird.f32 %v3062_v56  ;;  %v3110_v19 = vor.u32 1.1754944e-38, %v3109_v20 }
 0xd73   :  { %v3040_v50 = vsub.f32 0.0, %v3032_v54  ;;  %vm3108_vm14 = vcmp.eq.f32.partialorder %v3107_v18, 8.507059e+37  ;;  %v3122_v62 = vand.u32 2147483647, %v5089_v41 }
 0xd74   :  { %v3116_v60 = vmul.f32 %v5102_v5, %v3115_v53  ;;  %v1543_v53 = vsel %vm751_vm1, %v4657_v4, -inf }
 0xd75   :  { %v3052_v61 = vmul.f32 1.442695, %v3040_v50  ;;  %vm3123_vm4 = vcmp.eq.f32.partialorder %v3122_v62, 8.507059e+37 }
 0xd76   :  { %v4013_v63 = vpop.eup %4012  ;;  %v3117_v50 = vadd.f32 %v5102_v5, %v3116_v60 }
 0xd77   :  { %4016 = vpow2.f32 %v3052_v61  ;;  %1605 = vmax.xlane.f32.xlu2 %v1604_v52  ;;  %v3099_v49 = vmul.f32 %v4013_v63, %v3062_v56  ;;  %vm3104_vm11 = vweird.f32 %v4013_v63  ;;  %v4015_v27 = vpop.eup %4014  ;;  %v3124_v56 = vand.u32 2147483648, %v5089_v41 }
 0xd78   :  { %v3015_v17 = vpop.permute.xlu1 %3014  ;;  %vm3105_vm13 = vmor %vm3103_vm12, %vm3104_vm11  ;;  %v5115_v0 = vadd.f32 1.0, %v4015_v27  ;;  %v1534_v61 = vsel %vm751_vm1, %v4651_v1, -inf  ;;  %v3121_v42 = vsel %vm3120_vm2, %v5102_v5, %v3117_v50 }
 0xd79   :  { %v3033_v28 = vadd.f32 %v3015_v17, %v5041_v46  ;;  %3883 = vmatmul.msk.f32.gmra.mxu1 %vm2373_vm8, %v3096_v2  ;;  %v3100_v58 = vsub.f32 1.0, %v3099_v49  ;;  %v3125_v45 = vor.u32 1.1754944e-38, %v3124_v56 }
 0xd7b   :  { %v3041_v38 = vsub.f32 0.0, %v3033_v28  ;;  %v3101_v39 = vmul.f32 %v4013_v63, %v3100_v58  ;;  %v3126_v17 = vsel %vm3123_vm4, %v3125_v45, %v3121_v42  ;;  %v3167_v42 = vand.u32 2147483647, %v5115_v0 }
 0xd7d   :  { %v4017_v8 = vpop.eup %4016  ;;  %v3054_v33 = vmul.f32 1.442695, %v3041_v38  ;;  %v3102_v23 = vadd.f32 %v4013_v63, %v3101_v39 }
 0xd7e   :  { %v3064_v54 = vadd.f32 1.0, %v4017_v8 }
 0xd7f   :  { %4018 = vpow2.f32 %v3054_v33  ;;  %v3106_v46 = vsel %vm3105_vm13, %v4013_v63, %v3102_v23 }
 0xd80   :  { %4020 = vrcp.f32 %v3064_v54  ;;  %v3111_v36 = vsel %vm3108_vm14, %v3110_v19, %v3106_v46  ;;  %v3139_v28 = vand.u32 2147483648, %v3064_v54  ;;  %v3137_v1 = vand.u32 2147483647, %v3064_v54 }
 0xd81   :  { %3884 = vmatmul.msk.f32.gmra.mxu1 %vm2373_vm8, %v3111_v36  ;;  %4022 = vrcp.f32 %v5115_v0  ;;  %vm3133_vm12 = vweird.f32 %v3064_v54 }
 0xd82   :  { %v3140_v39 = vor.u32 1.1754944e-38, %v3139_v28  ;;  %vm3138_vm14 = vcmp.eq.f32.partialorder %v3137_v1, 8.507059e+37 }
 0xd85   :  { %v4019_v37 = vpop.eup %4018  ;;  %1535 = vmax.xlane.f32.xlu0 %v1534_v61 }
 0xd86   :  { %v4021_v63 = vpop.eup %4020  ;;  %v3065_v52 = vadd.f32 1.0, %v4019_v37  ;;  %v3169_v37 = vand.u32 2147483648, %v5115_v0 }
 0xd87   :  { %v3129_v49 = vmul.f32 %v4021_v63, %v3064_v54  ;;  %v4023_v2 = vpop.eup %4022  ;;  %vm3134_vm11 = vweird.f32 %v4021_v63  ;;  %v1552_v54 = vsel %vm751_vm1, %v4663_v7, -inf  ;;  %v1561_v7 = vsel %vm751_vm1, %v4669_v10, -inf }
 0xd88   :  { %4024 = vrcp.f32 %v3065_v52  ;;  %v3159_v20 = vmul.f32 %v4023_v2, %v5115_v0  ;;  %vm3135_vm13 = vmor %vm3133_vm12, %vm3134_vm11  ;;  %v3154_v60 = vand.u32 2147483648, %v3065_v52  ;;  %v3152_v4 = vand.u32 2147483647, %v3065_v52 }
 0xd89   :  { %3885 = vmatmul.msk.f32.gmra.mxu1 %vm2373_vm8, %v3126_v17  ;;  %v3130_v41 = vsub.f32 1.0, %v3129_v49  ;;  %vm3148_vm0 = vweird.f32 %v3065_v52  ;;  %vm3164_vm11 = vweird.f32 %v4023_v2  ;;  %vm3163_vm12 = vweird.f32 %v5115_v0  ;;  %v5143_v17 = vpop.permute.xlu2 %2767 }
 0xd8a   :  { %v3160_v23 = vsub.f32 1.0, %v3159_v20  ;;  %v3155_v50 = vor.u32 1.1754944e-38, %v3154_v60  ;;  %vm3153_vm4 = vcmp.eq.f32.partialorder %v3152_v4, 8.507059e+37  ;;  %v1570_v49 = vsel %vm751_vm1, %v4675_v13, -inf }
 0xd8b   :  { %v3131_v58 = vmul.f32 %v4021_v63, %v3130_v41  ;;  %v1579_v0 = vsel %vm751_vm1, %v4681_v16, -inf  ;;  %v1610_v20 = vsel %vm1582_vm5, %v4669_v10, -inf }
 0xd8c   :  { %v3161_v36 = vmul.f32 %v4023_v2, %v3160_v23 }
 0xd8d   :  { %1544 = vmax.xlane.f32.xlu0 %v1543_v53  ;;  %v3132_v5 = vadd.f32 %v4021_v63, %v3131_v58  ;;  %v1598_v58 = vsel %vm1582_vm5, %v4661_v6, -inf  ;;  %v1607_v53 = vsel %vm1582_vm5, %v4667_v9, -inf  ;;  %v1613_v9 = vsel %vm1582_vm5, %v4671_v11, -inf }
 0xd8e   :  { %v4025_v38 = vpop.eup %4024  ;;  %v3162_v61 = vadd.f32 %v4023_v2, %v3161_v36  ;;  %v1622_v11 = vsel %vm1582_vm5, %v4677_v14, -inf }
 0xd8f   :  { %v3136_v18 = vsel %vm3135_vm13, %v4021_v63, %v3132_v5  ;;  %v3144_v27 = vmul.f32 %v4025_v38, %v3065_v52  ;;  %vm3149_vm15 = vweird.f32 %v4025_v38  ;;  %vm3165_vm13 = vmor %vm3163_vm12, %vm3164_vm11  ;;  %v3170_v52 = vor.u32 1.1754944e-38, %v3169_v37 }
 0xd90   :  { %v3141_v8 = vsel %vm3138_vm14, %v3140_v39, %v3136_v18  ;;  %vm3150_vm2 = vmor %vm3148_vm0, %vm3149_vm15  ;;  %v3166_v63 = vsel %vm3165_vm13, %v4023_v2, %v3162_v61  ;;  %vm3168_vm14 = vcmp.eq.f32.partialorder %v3167_v42, 8.507059e+37  ;;  %v1589_v2 = vsel %vm1582_vm5, %v4655_v3, -inf  ;;  %v5164_v39 = vpop.permute.xlu1 %3432 }
 0xd91   :  { %3886 = vmatmul.msk.f32.gmra.mxu1 %vm2373_vm8, %v3141_v8  ;;  %v3145_v33 = vsub.f32 1.0, %v3144_v27  ;;  %v3171_v45 = vsel %vm3168_vm14, %v3170_v52, %v3166_v63  ;;  %v1625_v42 = vsel %vm1582_vm5, %v4679_v15, -inf  ;;  %v1628_v63 = vsel %vm1582_vm5, %v4681_v16, -inf  ;;  %v2761_v52 = vpop.f32.mrf.mxu1 }
 0xd92   :  { %v2770_v16 = vperm.slane %v5143_v17, 0 }
 0xd93   :  { %v3146_v19 = vmul.f32 %v4025_v38, %v3145_v33 }
 0xd95   :  { %1553 = vmax.xlane.f32.xlu0 %v1552_v54  ;;  %v3147_v46 = vadd.f32 %v4025_v38, %v3146_v19 }
 0xd97   :  { %v3151_v56 = vsel %vm3150_vm2, %v4025_v38, %v3147_v46 }
 0xd98   :  { %v3156_v62 = vsel %vm3153_vm4, %v3155_v50, %v3151_v56 }
 0xd99   :  { %3887 = vmatmul.msk.f32.gmra.mxu1 %vm2373_vm8, %v3156_v62 }
 0xd9d   :  { %1562 = vmax.xlane.f32.xlu0 %v1561_v7 }
 0xda1   :  { %3888 = vmatmul.msk.f32.gmra.mxu1 %vm2373_vm8, %v3171_v45 }
 0xda5   :  { %1571 = vmax.xlane.f32.xlu0 %v1570_v49 }
 0xdab   :  { %v1539_v8 = vpop.xlane.xlu1 %1538 }
 0xdad   :  { %1580 = vmax.xlane.f32.xlu0 %v1579_v0 }
 0xdb2   :  { %v5147_v41 = vpop.xlane.xlu2 %1541 }
 0xdb3   :  { %v1548_v19 = vpop.xlane.xlu1 %1547 }
 0xdb5   :  { %1590 = vmax.xlane.f32.xlu0 %v1589_v2  ;;  %v427_v2 = vld [vmem:[%s5468_s27 + $0x58] sm:$0xff] }
 0xdb6   :  { %3397 = vmatpush.msra.mxu3 %v427_v2 }
 0xdba   :  { %v5151_v28 = vpop.xlane.xlu2 %1550 }
 0xdbd   :  { %1599 = vmax.xlane.f32.xlu0 %v1598_v58  ;;  %v2717_v58 = vadd.f32 %v5009_v35, %v5001_v48  ;;  %v4049_v48 = vld [vmem:[%s5456_s3 + $0x70] sm:$0xff] }
 0xdc2   :  { %v5155_v1 = vpop.xlane.xlu2 %1559 }
 0xdc5   :  { %1608 = vmax.xlane.f32.xlu0 %v1607_v53  ;;  %v426_v53 = vld [vmem:[%s5468_s27 + $0x50] sm:$0xff] }
 0xdc6   :  { %3398 = vmatpush.msra.mxu3 %v426_v53  ;;  %v4058_v53 = vld [vmem:[%s5456_s3 + $0x28] sm:$0xff] }
 0xdca   :  { %v5159_v5 = vpop.xlane.xlu2 %1568 }
 0xdcd   :  { %1611 = vmax.xlane.f32.xlu0 %v1610_v20  ;;  %v3019_v3 = vpop.permute.xlu0 %3018  ;;  %v2741_v20 = vadd.f32 %v5027_v57, %v2717_v58  ;;  %v4050_v57 = vld [vmem:[%s5456_s3 + $0x68] sm:$0xff] }
 0xdce   :  { %v3035_v38 = vadd.f32 %v3019_v3, %v5071_v26  ;;  %v1616_v26 = vsel %vm1582_vm5, %v4673_v12, -inf  ;;  %v425_v3 = vld [vmem:[%s5468_s27 + $0x48] sm:$0xff] }
 0xdcf   :  { %3399 = vmatpush.msra.mxu3 %v425_v3 }
 0xdd0   :  { %v3043_v18 = vsub.f32 0.0, %v3035_v38  ;;  %v2764_v38 = vadd.f32 %v2761_v52, %v2741_v20  ;;  %v3325_v20 = vsel %vm1063_vm3, %v4934_v59, -inf }
 0xdd2   :  { %v3058_v6 = vmul.f32 1.442695, %v3043_v18  ;;  %v5166_v27 = vpop.xlane.xlu2 %1577 }
 0xdd4   :  { %4026 = vpow2.f32 %v3058_v6  ;;  %v424_v6 = vld [vmem:[%s5468_s27 + $0x40] sm:$0xff] }
 0xdd5   :  { %1614 = vmax.xlane.f32.xlu0 %v1613_v9  ;;  %v2771_v9 = vadd.f32 %v2770_v16, %v2764_v38  ;;  %3400 = vmatpush.msra.mxu3 %v424_v6  ;;  %v4059_v6 = vld [vmem:[%s5456_s3 + $0x20] sm:$0xff] }
 0xdd7   :  { %v2772_v35 = vsub.f32 0.0, %v2771_v9  ;;  %v418_v9 = vld [vmem:[%s5468_s27 + $0x10] sm:$0xff] }
 0xdd9   :  { %v2773_v17 = vmul.f32 1.442695, %v2772_v35 }
 0xdda   :  { %v4027_v33 = vpop.eup %4026  ;;  %v1588_v23 = vpop.xlane.xlu2 %1587 }
 0xddb   :  { %v3067_v60 = vadd.f32 1.0, %v4027_v33  ;;  %v5171_v10 = vsel %vm1631_vm7, %v1539_v8, %v1588_v23  ;;  %v4048_v8 = vld [vmem:[%s5456_s3 + $0x78] sm:$0xff]  ;;  %v4051_v33 = vld [vmem:[%s5456_s3 + $0x60] sm:$0xff] }
 0xddc   :  { %3465 = vmatpush.msrb.mxu3 %v4048_v8  ;;  %v3324_v8 = vsel %vm1063_vm3, %v4929_v34, -inf }
 0xddd   :  { %4028 = vrcp.f32 %v3067_v60  ;;  %1617 = vmax.xlane.f32.xlu0 %v1616_v26  ;;  %v3184_v56 = vand.u32 2147483648, %v3067_v60  ;;  %v3182_v61 = vand.u32 2147483647, %v3067_v60  ;;  %vm3178_vm15 = vweird.f32 %v3067_v60  ;;  %v4053_v26 = vld [vmem:[%s5456_s3 + $0x50] sm:$0xff] }
 0xdde   :  { %3466 = vmatpush.msrb.mxu3 %v4049_v48  ;;  %4030 = vpow2.f32 %v2773_v17 }
 0xddf   :  { %v3185_v12 = vor.u32 1.1754944e-38, %v3184_v56  ;;  %vm3183_vm2 = vcmp.eq.f32.partialorder %v3182_v61, 8.507059e+37 }
 0xde0   :  { %3467 = vmatpush.msrb.mxu3 %v4050_v57  ;;  %v4060_v57 = vld [vmem:[%s5456_s3 + $0x18] sm:$0xff] }
 0xde2   :  { %v1597_v4 = vpop.xlane.xlu2 %1596  ;;  %3468 = vmatpush.msrb.mxu3 %v4051_v33  ;;  %v417_v33 = vld [vmem:[%s5468_s27 + $0x8] sm:$0xff] }
 0xde3   :  { %v4029_v54 = vpop.eup %4028  ;;  %v5176_v46 = vsel %vm1631_vm7, %v1548_v19, %v1597_v4  ;;  %v4054_v4 = vld [vmem:[%s5456_s3 + $0x48] sm:$0xff] }
 0xde4   :  { %v3174_v36 = vmul.f32 %v4029_v54, %v3067_v60  ;;  %vm3179_vm1 = vweird.f32 %v4029_v54  ;;  %v4052_v60 = vld [vmem:[%s5456_s3 + $0x58] sm:$0xff]  ;;  %v4031_v61 = vpop.eup %4030 }
 0xde5   :  { %1623 = vmax.xlane.f32.xlu0 %v1622_v11  ;;  %vm3180_vm0 = vmor %vm3178_vm15, %vm3179_vm1  ;;  %3469 = vmatpush.msrb.mxu3 %v4052_v60  ;;  %vm3652_vm15 = vcmask 254976  }
 0xde6   :  { %v3175_v50 = vsub.f32 1.0, %v3174_v36  ;;  %v4055_v36 = vld [vmem:[%s5456_s3 + $0x40] sm:$0xff] }
 0xde7   :  { %3470 = vmatpush.msrb.mxu3 %v4053_v26 }
 0xde8   :  { %v3176_v62 = vmul.f32 %v4029_v54, %v3175_v50  ;;  %v3315_v50 = vsel %vm1063_vm3, %v4934_v59, 0.0 }
 0xde9   :  { %3471 = vmatpush.msrb.mxu3 %v4054_v4 }
 0xdea   :  { %v3177_v37 = vadd.f32 %v4029_v54, %v3176_v62  ;;  %v423_v62 = vld [vmem:[%s5468_s27 + $0x38] sm:$0xff] }
 0xdeb   :  { %3472 = vmatpush.msrb.mxu3 %v4055_v36  ;;  %3352 = vmatpush.msra.mxu2 %v423_v62  ;;  %v4061_v36 = vld [vmem:[%s5456_s3 + $0x10] sm:$0xff] }
 0xdec   :  { %v3181_v7 = vsel %vm3180_vm0, %v4029_v54, %v3177_v37  ;;  %vm3679_vm0 = vcmask 517120  }
 0xded   :  { %1626 = vmax.xlane.f32.xlu0 %v1625_v42  ;;  %v3186_v14 = vsel %vm3183_vm2, %v3185_v12, %v3181_v7  ;;  %v421_v7 = vld [vmem:[%s5468_s27 + $0x28] sm:$0xff] }
 0xdee   :  { %3889 = vmatmul.msk.f32.gmra.mxu1 %vm2373_vm8, %v3186_v14  ;;  %v3232_v45 = vpop.f32.mrf.mxu1 }
 0xdef   :  { %v5204_v54 = vmul.f32 %v3232_v45, %v4575_v21  ;;  %v4056_v21 = vld [vmem:[%s5456_s3 + $0x38] sm:$0xff]  ;;  %v4224_v45 = vmov 64.0  }
 0xdf0   :  { %3473 = vmatpush.msrb.mxu3 %v4056_v21  ;;  %4032 = vrcp.f32 %v4224_v45 }
 0xdf1   :  { %v3264_v37 = vsel %vm1063_vm3, %v5204_v54, 0.0 }
 0xdf5   :  { %1629 = vmax.xlane.f32.xlu0 %v1628_v63 }
 0xdf6   :  { %v3235_v49 = vpop.f32.mrf.mxu1  ;;  %v5254_v48 = vpop.eup %4032 }
 0xdf7   :  { %v5200_v19 = vmul.f32 %v3235_v49, %v4577_v22  ;;  %v4057_v49 = vld [vmem:[%s5456_s3 + $0x30] sm:$0xff]  ;;  %vm3290_vm8 = vweird.f32 %v5254_v48 }
 0xdf8   :  { %3474 = vmatpush.msrb.mxu3 %v4057_v49 }
 0xdf9   :  { %v3265_v56 = vsel %vm1063_vm3, %v5200_v19, 0.0  ;;  %v3294_v60 = vsel %vm1063_vm3, %v5200_v19, -inf }
 0xdfa   :  { %v3266_v63 = vadd.f32 %v3265_v56, %v3264_v37  ;;  %3475 = vmatpush.msrb.mxu3 %v4058_v53  ;;  %v3293_v37 = vsel %vm1063_vm3, %v5204_v54, -inf  ;;  %v4063_v53 = vld [vmem:[%s5456_s3] sm:$0xff] }
 0xdfc   :  { %3476 = vmatpush.msrb.mxu3 %v4059_v6 }
 0xdfe   :  { %v3238_v0 = vpop.f32.mrf.mxu1  ;;  %3477 = vmatpush.msrb.mxu3 %v4060_v57 }
 0xdff   :  { %v5207_v11 = vmul.f32 %v3238_v0, %v4579_v24  ;;  %v3314_v24 = vsel %vm1063_vm3, %v4929_v34, 0.0 }
 0xe00   :  { %v3316_v14 = vadd.f32 %v3315_v50, %v3314_v24  ;;  %3478 = vmatpush.msrb.mxu3 %v4061_v36  ;;  %v416_v50 = vld [vmem:[%s5468_s27] sm:$0xff] }
 0xe01   :  { %v3267_v12 = vsel %vm1063_vm3, %v5207_v11, 0.0 }
 0xe02   :  { %v3268_v58 = vadd.f32 %v3267_v12, %v3266_v63  ;;  %v3317_v38 = vrot.slane %v3316_v14, 4 }
 0xe06   :  { %v3241_v15 = vpop.f32.mrf.mxu1 }
 0xe07   :  { %v5215_v22 = vmul.f32 %v3241_v15, %v4581_v25  ;;  %v422_v25 = vld [vmem:[%s5468_s27 + $0x30] sm:$0xff]  ;;  %v5237_v15 = vadd.f32 1.0, %v4031_v61  ;;  %v3286_v61 = vmul.f32 64.0, %v5254_v48 }
 0xe08   :  { %3353 = vmatpush.msra.mxu2 %v422_v25 }
 0xe09   :  { %v3269_v0 = vsel %vm1063_vm3, %v5215_v22, 0.0  ;;  %4034 = vrcp.f32 %v5237_v15  ;;  %v3296_v63 = vsel %vm1063_vm3, %v5215_v22, -inf  ;;  %vm2781_vm11 = vweird.f32 %v5237_v15 }
 0xe0a   :  { %3354 = vmatpush.msra.mxu2 %v421_v7  ;;  %v4062_v7 = vld [vmem:[%s5456_s3 + $0x8] sm:$0xff] }
 0xe0b   :  { %3479 = vmatpush.msrb.mxu3 %v4062_v7 }
 0xe0d   :  { %3480 = vmatpush.msrb.mxu3 %v4063_v53 }
 0xe0e   :  { %v3244_v18 = vpop.f32.mrf.mxu1 }
 0xe0f   :  { %v5226_v42 = vmul.f32 %v3244_v18, %v4583_v29  ;;  %v420_v29 = vld [vmem:[%s5468_s27 + $0x20] sm:$0xff]  ;;  %v3270_v18 = vadd.f32 %v3269_v0, %v3268_v58  ;;  %v4035_v45 = vpop.eup %4034 }
 0xe10   :  { %3355 = vmatpush.msra.mxu2 %v420_v29  ;;  %vm2782_vm4 = vweird.f32 %v4035_v45 }
 0xe11   :  { %v3271_v16 = vsel %vm1063_vm3, %v5226_v42, 0.0  ;;  %v3297_v56 = vsel %vm1063_vm3, %v5226_v42, -inf  ;;  %vm2783_vm12 = vmor %vm2781_vm11, %vm2782_vm4 }
 0xe12   :  { %v3272_v35 = vadd.f32 %v3271_v16, %v3270_v18  ;;  %v3298_v49 = vmax.f32 %v3293_v37, %v3297_v56  ;;  %v3287_v16 = vsub.f32 1.0, %v3286_v61 }
 0xe14   :  { %v3288_v57 = vmul.f32 %v5254_v48, %v3287_v16 }
 0xe16   :  { %v3247_v23 = vpop.f32.mrf.mxu1 }
 0xe17   :  { %v5234_v2 = vmul.f32 %v3247_v23, %v4585_v30  ;;  %v419_v30 = vld [vmem:[%s5468_s27 + $0x18] sm:$0xff]  ;;  %v3318_v23 = vadd.f32 %v3317_v38, %v3316_v14  ;;  %v3295_v14 = vsel %vm1063_vm3, %v5207_v11, -inf }
 0xe18   :  { %3374 = vmatpush.msrb.mxu2 %v419_v30 }
 0xe19   :  { %v3273_v59 = vsel %vm1063_vm3, %v5234_v2, 0.0  ;;  %v3299_v17 = vsel %vm1063_vm3, %v5234_v2, -inf }
 0xe1a   :  { %3375 = vmatpush.msrb.mxu2 %v418_v9  ;;  %v3274_v26 = vadd.f32 %v3273_v59, %v3272_v35  ;;  %v3300_v12 = vmax.f32 %v3294_v60, %v3299_v17  ;;  %v2777_v9 = vmul.f32 %v4035_v45, %v5237_v15 }
 0xe1c   :  { %3376 = vmatpush.msrb.mxu2 %v417_v33  ;;  %v3305_v38 = vmax.f32 %v3298_v49, %v3300_v12  ;;  %v2778_v60 = vsub.f32 1.0, %v2777_v9  ;;  %v428_v9 = vld [vmem:[%s5468_s27 + $0x60] sm:$0xff] }
 0xe1e   :  { %v3250_v52 = vpop.f32.mrf.mxu1  ;;  %3377 = vmatpush.msrb.mxu2 %v416_v50  ;;  %v3289_v50 = vadd.f32 %v5254_v48, %v3288_v57  ;;  %v2779_v61 = vmul.f32 %v4035_v45, %v2778_v60  ;;  %v4066_v57 = vld [vmem:[%s4444_s16 + $0x8] sm:$0xff] }
 0xe1f   :  { %v5245_v3 = vmul.f32 %v3250_v52, %v4587_v31  ;;  %v3326_v31 = vmax.f32 %v3324_v8, %v3325_v20  ;;  %v3319_v20 = vrot.slane %v3318_v23, 2 }
 0xe20   :  { %v5292_v12 = vsel %vm3290_vm8, %v5254_v48, %v3289_v50 }
 0xe21   :  { %v3275_v34 = vsel %vm1063_vm3, %v5245_v3, 0.0  ;;  %v3301_v62 = vsel %vm1063_vm3, %v5245_v3, -inf  ;;  %v3327_v24 = vrot.slane %v3326_v31, 4  ;;  %v3320_v35 = vadd.f32 %v3319_v20, %v3318_v23 }
 0xe22   :  { %v3276_v25 = vadd.f32 %v3275_v34, %v3274_v26  ;;  %v3302_v0 = vmax.f32 %v3295_v14, %v3301_v62  ;;  %v2780_v14 = vadd.f32 %v4035_v45, %v2779_v61  ;;  %v3435_v61 = vperm.slane %v5164_v39, 0 }
 0xe23   :  { %v3328_v30 = vmax.f32 %v3326_v31, %v3327_v24  ;;  %v3321_v36 = vrot.slane %v3320_v35, 1 }
 0xe25   :  { %v3329_v33 = vrot.slane %v3328_v30, 2  ;;  %v3322_v23 = vadd.f32 %v3321_v36, %v3320_v35  ;;  %v4065_v35 = vld [vmem:[%s4444_s16 + $0x10] sm:$0xff] }
 0xe27   :  { %v3330_v31 = vmax.f32 %v3328_v30, %v3329_v33  ;;  %v3323_v49 = vmul.f32 %v3322_v23, %v4990_v51 }
 0xe6b   :  { %v3253_v4 = vpop.f32.mrf.mxu1 }
 0xe6c   :  { %v5272_v21 = vmul.f32 %v3253_v4, %v4589_v32 }
 0xe6e   :  { %v3277_v32 = vsel %vm1063_vm3, %v5272_v21, 0.0  ;;  %v3303_v52 = vsel %vm1063_vm3, %v5272_v21, -inf }
 0xe6f   :  { %v3278_v29 = vadd.f32 %v3277_v32, %v3276_v25  ;;  %v3304_v58 = vmax.f32 %v3296_v63, %v3303_v52  ;;  %v3331_v25 = vrot.slane %v3330_v31, 1  ;;  %v2787_v63 = vand.u32 2147483648, %v5237_v15 }
 0xe71   :  { %v3279_v18 = vrot.slane %v3278_v29, 4  ;;  %v3306_v6 = vmax.f32 %v3302_v0, %v3304_v58  ;;  %v2785_v0 = vand.u32 2147483647, %v5237_v15  ;;  %v2784_v58 = vsel %vm2783_vm12, %v4035_v45, %v2780_v14  ;;  %v430_v15 = vld [vmem:[%s5468_s27 + $0x70] sm:$0xff] }
 0xe72   :  { %v2788_v20 = vor.u32 1.1754944e-38, %v2787_v63 }
 0xe73   :  { %v3280_v8 = vadd.f32 %v3279_v18, %v3278_v29  ;;  %v3307_v59 = vmax.f32 %v3305_v38, %v3306_v6  ;;  %v3332_v29 = vmax.f32 %v3330_v31, %v3331_v25  ;;  %vm2786_vm13 = vcmp.eq.f32.partialorder %v2785_v0, 8.507059e+37  ;;  %v431_v38 = vld [vmem:[%s5468_s27 + $0x78] sm:$0xff]  ;;  %v429_v6 = vld [vmem:[%s5468_s27 + $0x68] sm:$0xff] }
 0xe74   :  { %v2789_v18 = vsel %vm2786_vm13, %v2788_v20, %v2784_v58 }
 0xe75   :  { %v3281_v17 = vrot.slane %v3280_v8, 2  ;;  %v3308_v34 = vrot.slane %v3307_v59, 4  ;;  %v2791_v45 = vperm.slane %v2789_v18, 0 }
 0xe77   :  { %v3282_v26 = vadd.f32 %v3281_v17, %v3280_v8  ;;  %v3309_v4 = vmax.f32 %v3307_v59, %v3308_v34  ;;  %v2792_v8 = vmul.f32 %v2791_v45, %v4968_v43  ;;  %v4064_v59 = vld [vmem:[%s4444_s16 + $0x18] sm:$0xff]  ;;  %v2793_v17 = vmul.f32 %v2791_v45, %v4962_v40  ;;  %v4067_v34 = vld [vmem:[%s4444_s16] sm:$0xff]  ;;  %s4225_s16 = smov 96  }
 0xe78   :  { %v2794_v43 = vmul.f32 %v2791_v45, %v4971_v44  ;;  %v2795_v60 = vmul.f32 %v2791_v45, %v4980_v55 }
 0xe79   :  { %v3283_v56 = vrot.slane %v3282_v26, 1  ;;  %v3310_v62 = vrot.slane %v3309_v4, 2 }
 0xe7b   :  { %v3284_v24 = vadd.f32 %v3283_v56, %v3282_v26  ;;  %v3311_v37 = vmax.f32 %v3309_v4, %v3310_v62 }
 0xe7d   :  { %v3312_v7 = vrot.slane %v3311_v37, 1  ;;  %v3292_v32 = vmul.f32 %v5292_v12, %v3284_v24 }
 0xe7f   :  { %v3313_v52 = vmax.f32 %v3311_v37, %v3312_v7 }
 0xe81   :  { %v3333_v48 = vsel %vm2671_vm6, %v3292_v32, %v3313_v52 }
 0xe82   :  { %v3334_v53 = vsel %vm2586_vm9, %v3333_v48, %v3323_v49 }
 0xe83   :  { %v3335_v16 = vsel %vm2674_vm10, %v3334_v53, %v3332_v29 }
 0xe84   :  { %v3337_v30 = vrot.slane %v3335_v16, 1  ;;  %v3382_v51 = vrot.slane %v3335_v16, 2  ;;  %v3406_v33 = vrot.slane %v3335_v16, 3 }
 0xe86   :  { %3890 = vmatmul.msk.f32.vlgmr.msra.gmra.mxu2 %vm1063_vm3, %v3337_v30  ;;  %3892 = vmatmul.msk.f32.vlgmr.msra.gmra.mxu3 %vm1063_vm3, %v3382_v51 }
 0xe87   :  { %3421 = vmatpush.msra.mxu2 %v431_v38 }
 0xe89   :  { %3422 = vmatpush.msra.mxu2 %v430_v15 }
 0xe8b   :  { %3423 = vmatpush.msra.mxu2 %v429_v6 }
 0xe8d   :  { %3424 = vmatpush.msra.mxu2 %v428_v9 }
 0xe8e   :  { %3891 = vmatmul.msk.f32.vlgmr.msrb.gmra.mxu2 %vm1063_vm3, %v3335_v16  ;;  %3481 = vmatmul.f32.vlgmr.msrb.gmra.mxu3 %v2792_v8  ;;  %v1557_v8 = vpop.xlane.xlu1 %1556 }
 0xe8f   :  { %3530 = vmatpush.msrb.mxu2 %v4064_v59 }
 0xe91   :  { %3531 = vmatpush.msrb.mxu2 %v4065_v35 }
 0xe93   :  { %3532 = vmatpush.msrb.mxu2 %v4066_v57 }
 0xe95   :  { %3533 = vmatpush.msrb.mxu2 %v4067_v34  ;;  %v1619_v34 = vsel %vm1582_vm5, %v4675_v13, -inf }
 0xe96   :  { %3893 = vmatmul.msk.f32.vlgmr.msra.gmra.mxu2 %vm1063_vm3, %v3406_v33  ;;  %3484 = vmatmul.f32.gmra.mxu3 %v2793_v17 }
 0xe9e   :  { %3487 = vmatmul.f32.gmra.mxu3 %v2794_v43 }
 0xea6   :  { %3490 = vmatmul.f32.gmra.mxu3 %v2795_v60  ;;  %v1606_v60 = vpop.xlane.xlu2 %1605 }
 0xf09   :  { %v3357_v26 = vpop.f32.mrf.mxu2  ;;  %v3402_v4 = vpop.f32.mrf.mxu3 }
 0xf11   :  { %v3379_v36 = vpop.f32.mrf.mxu2  ;;  %v3482_v50 = vpop.f32.mrf.mxu3 }
 0xf12   :  { %3591 = vxpose.xlu1.b32.start [1/12] (short) (narrow) %v3482_v50, 8  ;;  %v3380_v31 = vadd.f32 %v3379_v36, %v3357_v26  ;;  %v1536_v26 = vpop.xlane.xlu0 %1535 }
 0xf14   :  { %v3405_v56 = vadd.f32 %v3402_v4, %v3380_v31 }
 0xf19   :  { %v3426_v62 = vpop.f32.mrf.mxu2  ;;  %v3485_v40 = vpop.f32.mrf.mxu3 }
 0xf1a   :  { %v3429_v24 = vadd.f32 %v3426_v62, %v3405_v56  ;;  %3592 = vxpose.xlu1.b32.cont [2/12] (short) (narrow) %v3485_v40, 8  ;;  %v1545_v50 = vpop.xlane.xlu0 %1544 }
 0xf1c   :  { %v3436_v37 = vadd.f32 %v3435_v61, %v3429_v24 }
 0xf1e   :  { %v3437_v23 = vsub.f32 0.0, %v3436_v37 }
 0xf20   :  { %v3438_v44 = vmul.f32 1.442695, %v3437_v23 }
 0xf21   :  { %v3488_v25 = vpop.f32.mrf.mxu3 }
 0xf22   :  { %4036 = vpow2.f32 %v3438_v44  ;;  %3593 = vxpose.xlu1.b32.cont [3/12] (short) (narrow) %v3488_v25, 8  ;;  %v1554_v31 = vpop.xlane.xlu0 %1553 }
 0xf28   :  { %v4037_v55 = vpop.eup %4036 }
 0xf29   :  { %v3440_v7 = vadd.f32 1.0, %v4037_v55  ;;  %v3491_v14 = vpop.f32.mrf.mxu3 }
 0xf2a   :  { %3594 = vxpose.xlu1.b32.cont [4/12] (short) (narrow) %v3491_v14, 8  ;;  %v1563_v56 = vpop.xlane.xlu0 %1562 }
 0xf2b   :  { %4038 = vrcp.f32 %v3440_v7  ;;  %v3452_v49 = vand.u32 2147483648, %v3440_v7  ;;  %v3450_v39 = vand.u32 2147483647, %v3440_v7  ;;  %vm3446_vm10 = vweird.f32 %v3440_v7 }
 0xf2d   :  { %v3453_v48 = vor.u32 1.1754944e-38, %v3452_v49  ;;  %vm3451_vm1 = vcmp.eq.f32.partialorder %v3450_v39, 8.507059e+37 }
 0xf31   :  { %v4039_v63 = vpop.eup %4038 }
 0xf32   :  { %v3442_v32 = vmul.f32 %v4039_v63, %v3440_v7  ;;  %vm3447_vm6 = vweird.f32 %v4039_v63  ;;  %v1572_v62 = vpop.xlane.xlu0 %1571 }
 0xf33   :  { %vm3448_vm14 = vmor %vm3446_vm10, %vm3447_vm6 }
 0xf34   :  { %v3443_v52 = vsub.f32 1.0, %v3442_v32 }
 0xf36   :  { %v3444_v0 = vmul.f32 %v4039_v63, %v3443_v52 }
 0xf38   :  { %v3445_v29 = vadd.f32 %v4039_v63, %v3444_v0 }
 0xf3a   :  { %v3449_v58 = vsel %vm3448_vm14, %v4039_v63, %v3445_v29  ;;  %v1581_v13 = vpop.xlane.xlu0 %1580  ;;  %vm3712_vm14 = vcmask 781314  }
 0xf3b   :  { %v3454_v53 = vsel %vm3451_vm1, %v3453_v48, %v3449_v58  ;;  %vm3713_vm1 = vmor %vm3712_vm14, %vm2586_vm9 }
 0xf3c   :  { %v3456_v20 = vperm.slane %v3454_v53, 0 }
 0xf3e   :  { %v3457_v16 = vmul.f32 %v3456_v20, %v5204_v54  ;;  %v3458_v30 = vmul.f32 %v3456_v20, %v5200_v19  ;;  %v3459_v51 = vmul.f32 %v3456_v20, %v5207_v11  ;;  %v3460_v38 = vmul.f32 %v3456_v20, %v5215_v22 }
 0xf3f   :  { %v3461_v18 = vmul.f32 %v3456_v20, %v5226_v42  ;;  %v3462_v54 = vmul.f32 %v3456_v20, %v5234_v2  ;;  %v3463_v19 = vmul.f32 %v3456_v20, %v5245_v3  ;;  %v3464_v11 = vmul.f32 %v3456_v20, %v5272_v21  ;;  %v1566_v21 = vpop.xlane.xlu1 %1565 }
 0xf40   :  { %3894 = vmatmul.msk.f32.vlgmr.msrb.gmra.mxu2 %vm1063_vm3, %v3457_v16 }
 0xf42   :  { %v1591_v61 = vpop.xlane.xlu0 %1590 }
 0xf43   :  { %v1634_v24 = vsel %vm1631_vm7, %v5147_v41, %v1591_v61 }
 0xf47   :  { %v1575_v59 = vpop.xlane.xlu1 %1574 }
 0xf48   :  { %3895 = vmatmul.msk.f32.gmra.mxu2 %vm1063_vm3, %v3458_v30 }
 0xf4a   :  { %v1600_v23 = vpop.xlane.xlu0 %1599 }
 0xf4b   :  { %v1637_v44 = vsel %vm1631_vm7, %v5151_v28, %v1600_v23 }
 0xf4f   :  { %v1585_v35 = vpop.xlane.xlu1 %1584 }
 0xf50   :  { %3896 = vmatmul.msk.f32.gmra.mxu2 %vm1063_vm3, %v3459_v51  ;;  %v1632_v40 = vsel %vm1631_vm7, %v1536_v26, %v1585_v35 }
 0xf52   :  { %v1609_v55 = vpop.xlane.xlu0 %1608 }
 0xf53   :  { %v1640_v41 = vsel %vm1631_vm7, %v5155_v1, %v1609_v55 }
 0xf57   :  { %v1594_v57 = vpop.xlane.xlu1 %1593 }
 0xf58   :  { %3897 = vmatmul.msk.f32.gmra.mxu2 %vm1063_vm3, %v3460_v38  ;;  %v1635_v37 = vsel %vm1631_vm7, %v1545_v50, %v1594_v57 }
 0xf5a   :  { %v1612_v7 = vpop.xlane.xlu0 %1611 }
 0xf5b   :  { %v1641_v14 = vsel %vm1631_vm7, %v1563_v56, %v1612_v7 }
 0xf5f   :  { %v1603_v33 = vpop.xlane.xlu1 %1602 }
 0xf60   :  { %3898 = vmatmul.msk.f32.gmra.mxu2 %vm1063_vm3, %v3461_v18  ;;  %v1638_v25 = vsel %vm1631_vm7, %v1554_v31, %v1603_v33 }
 0xf68   :  { %3899 = vmatmul.msk.f32.gmra.mxu2 %vm1063_vm3, %v3462_v54 }
 0xf70   :  { %3900 = vmatmul.msk.f32.gmra.mxu2 %vm1063_vm3, %v3463_v19 }
 0xf78   :  { %3901 = vmatmul.msk.f32.gmra.mxu2 %vm1063_vm3, %v3464_v11  ;;  %v4226_v11 = vmov 128.0  }
 0xf79   :  { %4040 = vrcp.f32 %v4226_v11 }
 0xfc3   :  { %v3535_v15 = vpop.f32.mrf.mxu2 }
 0xfc4   :  { %3595 = vxpose.xlu1.b32.cont [5/12] (short) (narrow) %v3535_v15, 8  ;;  %v4041_v15 = vpop.eup %4040 }
 0xfcb   :  { %v3538_v22 = vpop.f32.mrf.mxu2 }
 0xfcc   :  { %3596 = vxpose.xlu1.b32.cont [6/12] (short) (narrow) %v3538_v22, 8  ;;  %v3627_v22 = vmul.f32 128.0, %v4041_v15 }
 0xfd3   :  { %v3541_v45 = vpop.f32.mrf.mxu2 }
 0xfd4   :  { %3597 = vxpose.xlu1.b32.cont [7/12] (short) (narrow) %v3541_v45, 8  ;;  %v3628_v45 = vsub.f32 1.0, %v3627_v22 }
 0xfdb   :  { %v3544_v42 = vpop.f32.mrf.mxu2 }
 0xfdc   :  { %3598 = vxpose.xlu1.b32.cont [8/12] (short) (narrow) %v3544_v42, 8  ;;  %v3629_v42 = vmul.f32 %v4041_v15, %v3628_v45 }
 0xfe3   :  { %v3547_v6 = vpop.f32.mrf.mxu2 }
 0xfe4   :  { %3599 = vxpose.xlu1.b32.cont [9/12] (short) (narrow) %v3547_v6, 8  ;;  %v3630_v6 = vadd.f32 %v4041_v15, %v3629_v42 }
 0xfeb   :  { %v3550_v2 = vpop.f32.mrf.mxu2 }
 0xfec   :  { %3600 = vxpose.xlu1.b32.cont [10/12] (short) (narrow) %v3550_v2, 8 }
 0xff3   :  { %v3553_v9 = vpop.f32.mrf.mxu2 }
 0xff4   :  { %3601 = vxpose.xlu1.b32.cont [11/12] (short) (narrow) %v3553_v9, 8 }
 0xffb   :  { %v3556_v3 = vpop.f32.mrf.mxu2 }
 0xffc   :  { %3602 = vxpose.xlu1.b32.end [12/12] (short) (narrow) %v3556_v3, 8 }
0x1048   :  { %v5335_v17 = vpop.trf.xlu1 }
0x1049   :  { %3676 = vrot.lane.b32.xlu2 %v5335_v17, %s4225_s16  ;;  %v3653_v43 = vsel %vm3652_vm15, %v5335_v17, 0.0 }
0x1072   :  { %1620 = vmax.xlane.f32.xlu2 %v1619_v34 }
0x107a   :  { %3654 = vadd.xlane.f32.xlu2 %v3653_v43 }
0x10a3   :  { %v3677_v4 = vpop.permute.xlu2 %3676 }
0x10a4   :  { %v3680_v36 = vsel %vm3679_vm0, %v3677_v4, 0.0 }
0x10a5   :  { %3681 = vadd.xlane.f32.xlu0 %v3680_v36 }
0x10ce   :  { %3559 = vxpose.xlu0.b32.start [1/16] (narrow) %v1632_v40, 8 }
0x10d6   :  { %3560 = vxpose.xlu0.b32.cont [2/16] (narrow) %v5171_v10, 8  ;;  %v1639_v10 = vsel %vm1631_vm7, %v1557_v8, %v1606_v60 }
0x10de   :  { %3561 = vxpose.xlu0.b32.cont [3/16] (narrow) %v1634_v24, 8 }
0x10e5   :  { %v1621_v52 = vpop.xlane.xlu2 %1620 }
0x10e6   :  { %3562 = vxpose.xlu0.b32.cont [4/16] (narrow) %v1635_v37, 8  ;;  %v1644_v49 = vsel %vm1631_vm7, %v1572_v62, %v1621_v52 }
0x10ee   :  { %3563 = vxpose.xlu0.b32.cont [5/16] (narrow) %v5176_v46, 8  ;;  %v1615_v46 = vpop.xlane.xlu0 %1614 }
0x10ef   :  { %v1642_v63 = vsel %vm1631_vm7, %v1566_v21, %v1615_v46 }
0x10f6   :  { %3564 = vxpose.xlu0.b32.cont [6/16] (narrow) %v1637_v44, 8  ;;  %v1618_v28 = vpop.xlane.xlu0 %1617 }
0x10f7   :  { %v1643_v32 = vsel %vm1631_vm7, %v5159_v5, %v1618_v28 }
0x10fe   :  { %3565 = vxpose.xlu0.b32.cont [7/16] (narrow) %v1638_v25, 8  ;;  %v1624_v0 = vpop.xlane.xlu0 %1623 }
0x10ff   :  { %v1645_v1 = vsel %vm1631_vm7, %v1575_v59, %v1624_v0 }
0x1106   :  { %3566 = vxpose.xlu0.b32.cont [8/16] (narrow) %v1639_v10, 8  ;;  %v1627_v39 = vpop.xlane.xlu0 %1626 }
0x1107   :  { %v1646_v29 = vsel %vm1631_vm7, %v5166_v27, %v1627_v39  ;;  %v3655_v27 = vpop.xlane.xlu2 %3654 }
0x1108   :  { %v3656_v38 = vmul.f32 %v3655_v27, %v4988_v47 }
0x110a   :  { %v5375_v18 = vsub.f32 %v5335_v17, %v3656_v38 }
0x110c   :  { %v3658_v54 = vmul.f32 %v5375_v18, %v5375_v18 }
0x110e   :  { %3567 = vxpose.xlu0.b32.cont [9/16] (narrow) %v1640_v41, 8  ;;  %v1630_v48 = vpop.xlane.xlu0 %1629  ;;  %v3659_v19 = vsel %vm3652_vm15, %v3658_v54, 0.0 }
0x110f   :  { %v1647_v58 = vsel %vm1631_vm7, %v1581_v13, %v1630_v48  ;;  %vm3631_vm7 = vweird.f32 %v4041_v15 }
0x1110   :  { %v3632_v2 = vsel %vm3631_vm7, %v4041_v15, %v3630_v6 }
0x1116   :  { %3568 = vxpose.xlu0.b32.cont [10/16] (narrow) %v1641_v14, 8 }
0x1118   :  { %v3682_v53 = vpop.xlane.xlu0 %3681 }
0x1119   :  { %v3683_v16 = vmul.f32 %v3682_v53, %v5292_v12 }
0x111b   :  { %v5368_v30 = vsub.f32 %v5335_v17, %v3683_v16 }
0x111d   :  { %v3685_v51 = vmul.f32 %v5368_v30, %v5368_v30 }
0x111e   :  { %3569 = vxpose.xlu0.b32.cont [11/16] (narrow) %v1642_v63, 8 }
0x1126   :  { %3570 = vxpose.xlu0.b32.cont [12/16] (narrow) %v1643_v32, 8 }
0x112e   :  { %3571 = vxpose.xlu0.b32.cont [13/16] (narrow) %v1644_v49, 8 }
0x1136   :  { %3572 = vxpose.xlu0.b32.cont [14/16] (narrow) %v1645_v1, 8 }
0x113e   :  { %3573 = vxpose.xlu0.b32.cont [15/16] (narrow) %v1646_v29, 8 }
0x1146   :  { %3574 = vxpose.xlu0.b32.end [16/16] (narrow) %v1647_v58, 8 }
0x1172   :  { %v3575_v5 = vpop.trf.xlu0 }
0x1173   :  { %v3623_v20 = vsel %vm2586_vm9, %v3575_v5, 0.0 }
0x1174   :  { %3624 = vadd.xlane.f32.xlu2 %v3623_v20 }
0x118c   :  { %3687 = vrot.lane.b32.xlu2 %v3685_v51, %s4225_s16 }
0x11b5   :  { %3660 = vadd.xlane.f32.xlu2 %v3659_v19 }
0x11e7   :  { %v3625_v9 = vpop.xlane.xlu2 %3624 }
0x11e8   :  { %v3633_v3 = vmul.f32 %v3632_v2, %v3625_v9 }
0x11ea   :  { %v3634_v8 = vsub.f32 %v3575_v5, %v3633_v3 }
0x11ec   :  { %v3635_v21 = vmul.f32 %v3634_v8, %v3634_v8 }
0x11ee   :  { %v3636_v59 = vsel %vm2586_vm9, %v3635_v21, 0.0 }
0x11ef   :  { %3637 = vadd.xlane.f32.xlu2 %v3636_v59  ;;  %v3688_v35 = vpop.permute.xlu2 %3687 }
0x11f0   :  { %v3690_v57 = vsel %vm3679_vm0, %v3688_v35, 0.0 }
0x11f1   :  { %3691 = vadd.xlane.f32.xlu1 %v3690_v57 }
0x1228   :  { %v3661_v33 = vpop.xlane.xlu2 %3660 }
0x1229   :  { %v3662_v17 = vmul.f32 %v3661_v33, %v4988_v47 }
0x122b   :  { %v3663_v34 = vadd.f32 1e-05, %v3662_v17 }
0x122d   :  { %4042 = vrsqrt.f32 %v3663_v34  ;;  %vm3670_vm2 = vweird.f32 %v3663_v34 }
0x1233   :  { %v4043_v43 = vpop.eup %4042 }
0x1234   :  { %v3665_v4 = vmul.f32 %v4043_v43, %v3663_v34  ;;  %vm3671_vm5 = vweird.f32 %v4043_v43 }
0x1235   :  { %vm3672_vm4 = vmor %vm3670_vm2, %vm3671_vm5 }
0x1236   :  { %v3666_v62 = vmul.f32 %v4043_v43, %v3665_v4 }
0x1238   :  { %v3667_v40 = vmul.f32 0.5, %v3666_v62 }
0x123a   :  { %v3668_v37 = vsub.f32 1.5, %v3667_v40 }
0x123c   :  { %v3669_v55 = vmul.f32 %v4043_v43, %v3668_v37 }
0x123e   :  { %v3673_v14 = vsel %vm3672_vm4, %v4043_v43, %v3669_v55 }
0x123f   :  { %v3674_v28 = vmul.f32 %v3673_v14, %v5375_v18 }
0x1262   :  { %v3638_v60 = vpop.xlane.xlu2 %3637 }
0x1263   :  { %v3639_v26 = vmul.f32 %v3638_v60, %v3632_v2 }
0x1264   :  { %v3692_v36 = vpop.xlane.xlu1 %3691 }
0x1265   :  { %v3640_v50 = vadd.f32 1e-05, %v3639_v26  ;;  %v3693_v31 = vmul.f32 %v3692_v36, %v5292_v12 }
0x1267   :  { %4044 = vrsqrt.f32 %v3640_v50  ;;  %v3694_v56 = vadd.f32 1e-05, %v3693_v31  ;;  %vm3647_vm13 = vweird.f32 %v3640_v50 }
0x1269   :  { %4046 = vrsqrt.f32 %v3694_v56  ;;  %vm3701_vm12 = vweird.f32 %v3694_v56 }
0x126d   :  { %v4045_v13 = vpop.eup %4044 }
0x126e   :  { %v3642_v61 = vmul.f32 %v4045_v13, %v3640_v50  ;;  %vm3648_vm11 = vweird.f32 %v4045_v13 }
0x126f   :  { %v4047_v24 = vpop.eup %4046  ;;  %vm3649_vm10 = vmor %vm3647_vm13, %vm3648_vm11 }
0x1270   :  { %v3643_v47 = vmul.f32 %v4045_v13, %v3642_v61  ;;  %v3696_v23 = vmul.f32 %v4047_v24, %v3694_v56  ;;  %vm3702_vm8 = vweird.f32 %v4047_v24 }
0x1271   :  { %vm3703_vm6 = vmor %vm3701_vm12, %vm3702_vm8 }
0x1272   :  { %v3644_v44 = vmul.f32 0.5, %v3643_v47  ;;  %v3697_v25 = vmul.f32 %v4047_v24, %v3696_v23 }
0x1274   :  { %v3645_v10 = vsub.f32 1.5, %v3644_v44  ;;  %v3698_v41 = vmul.f32 0.5, %v3697_v25 }
0x1276   :  { %v3699_v7 = vsub.f32 1.5, %v3698_v41  ;;  %v3646_v12 = vmul.f32 %v4045_v13, %v3645_v10 }
0x1278   :  { %v3700_v46 = vmul.f32 %v4047_v24, %v3699_v7  ;;  %v3650_v32 = vsel %vm3649_vm10, %v4045_v13, %v3646_v12 }
0x1279   :  { %v3651_v0 = vmul.f32 %v3650_v32, %v3634_v8 }
0x127a   :  { %v3704_v63 = vsel %vm3703_vm6, %v4047_v24, %v3700_v46 }
0x127b   :  { %v3705_v52 = vmul.f32 %v3704_v63, %v5368_v30 }
0x127d   :  { %v3706_v49 = vsel %vm1063_vm3, %v3674_v28, %v3705_v52 }
0x127e   :  { %v3709_v1 = vrot.slane %v3706_v49, 6 }
0x1280   :  { %v3710_v39 = vsel %vm2586_vm9, %v3651_v0, %v3709_v1 }
0x1281   :  { %3714 = vst.msk [vmem:[#allocation10] sm:$0xf] %vm3713_vm1, %v3710_v39 }
0x1282   :  { %4163 = shalt.err (!%p4160_p5)
}
0x1283   :  { %3725 = dma.vmem_to_hbm [thread:$0]  %s3721_s5, 64, %s3723_s9, [#allocation6]  }
0x1284   :  { %4168 = dma.done.wait [#allocation6], 64  }
0x1285   :  { %4169 = vsyncadd [#allocation6], 4294967232 }
0x1286   :  { %3730 = vsyncpa [#allocation5], 1 }
0x1287   :  { %3731 = vsyncpa [#allocation8], 1 }
0x1288   :  { %3732 = vsyncpa [#allocation6], 1 }

</bundles_post_ra>
